<compile_context>
chip_gen: v7x
topology: tpu7x:2x2x1
jax: 0.10.0
libtpu: 0.0.40
codegen_flags: <defaults>
</compile_context>

<pallas_src>
import jax
import jax.numpy as jnp
from jax.experimental import pallas as pl
from jax.experimental.pallas import tpu as pltpu


# ---------------------------------------------------------------------------
# Pallas kernels
# ---------------------------------------------------------------------------

def _conv_relu_pool_kernel(p_ref, w_ref, b_ref, o_ref):
    """Fused conv (as matmul) + bias + ReLU + 2x2 max-pool.

    p_ref : (4, Kp, TM) bf16  im2col patches, one slab per pool corner,
            columns indexed by pooled output position (n, py, px).
    w_ref : (Cout, Kp) bf16   conv weights, K ordered (ki, kj, cin).
    b_ref : (Cout, 1)  f32    bias column.
    o_ref : (Cout, TM) bf16   pooled output (lane-dense, TM % 128 == 0).

    bf16 MXU inputs with f32 accumulation; bias/ReLU/max stay f32 (v5e VPU has
    no bf16 datapath); single cast at the store gets the HBM-byte savings.
    """
    w = w_ref[...]
    b = b_ref[...]

    def corner(p):
        y = jnp.dot(w, p_ref[p], preferred_element_type=jnp.float32)
        return jnp.maximum(y + b, 0.0)

    m = jnp.maximum(jnp.maximum(corner(0), corner(1)),
                    jnp.maximum(corner(2), corner(3)))
    o_ref[...] = m.astype(o_ref.dtype)


def _fc_head_kernel(x_ref, w1_ref, b1_ref, w2_ref, b2_ref, o_ref):
    """Fused fc1 + ReLU + fc2 + Sigmoid for the tiny (batch, 576) head."""
    h = jnp.dot(x_ref[...], w1_ref[...], preferred_element_type=jnp.float32)
    h = jnp.maximum(h + b1_ref[...], 0.0)
    y = jnp.dot(h.astype(w2_ref.dtype), w2_ref[...],
                preferred_element_type=jnp.float32) + b2_ref[...]
    o_ref[...] = pl.reciprocal(1.0 + jnp.exp(-y), approx=False)   # sigmoid


# ---------------------------------------------------------------------------
# Fused conv3x3(stride 2) + ReLU + maxpool2x2 stage
# ---------------------------------------------------------------------------

def _round_up(x, m):
    return (x + m - 1) // m * m


def conv3x3s2_relu_pool2(x_cm, w_oihw, b, *, tile_m):
    """x_cm: (Cin, N, H, W) bf16 channel-major -> (Cout, N, PH, PW) bf16."""
    cin, n, h, w = x_cm.shape
    cout, cin2, kh, kw = w_oihw.shape
    assert (cin2, kh, kw) == (cin, 3, 3)
    oh = (h - 3) // 2 + 1
    ow = (w - 3) // 2 + 1
    ph, pw = oh // 2, ow // 2            # MaxPool2d(2) floor semantics
    M = n * ph * pw                      # pooled output positions
    K = 9 * cin
    Kp = _round_up(K, 8)

    tile_m = min(tile_m, _round_up(M, 128))
    grid_m = pl.cdiv(M, tile_m)
    Mp = grid_m * tile_m                 # == round_up(M, 128) by construction

    # im2col, pool-corner-major.  Pooled pixel (py, px), corner (dy, dx),
    # tap (ki, kj) reads input (4*py + 2*dy + ki, 4*px + 2*dx + kj).
    # These stride-4 gathers are the only XLA glue left in the stage.
    def phase(dy, dx):
        taps = []
        for ki in range(3):
            for kj in range(3):
                r0 = 2 * dy + ki
                c0 = 2 * dx + kj
                t = x_cm[:, :,
                         r0:r0 + 4 * (ph - 1) + 1:4,
                         c0:c0 + 4 * (pw - 1) + 1:4]      # (cin, n, ph, pw)
                taps.append(t.reshape(cin, M))
        if Kp > K:
            taps.append(jnp.zeros((Kp - K, M), x_cm.dtype))
        return jnp.concatenate(taps, axis=0)               # (Kp, M)

    patches = jnp.stack([phase(dy, dx) for dy in (0, 1) for dx in (0, 1)])
    if Mp > M:
        patches = jnp.pad(patches, ((0, 0), (0, 0), (0, Mp - M)))
    patches = patches.astype(jnp.bfloat16)                 # (4, Kp, Mp)

    # Weight matrix (Cout, Kp), K ordered (ki, kj, cin) to match patches.
    w_mat = jnp.transpose(w_oihw, (0, 2, 3, 1)).reshape(cout, K)
    if Kp > K:
        w_mat = jnp.pad(w_mat, ((0, 0), (0, Kp - K)))
    w_mat = w_mat.astype(jnp.bfloat16)
    b_col = b.reshape(cout, 1).astype(jnp.float32)

    out = pl.pallas_call(
        _conv_relu_pool_kernel,
        out_shape=jax.ShapeDtypeStruct((cout, Mp), jnp.bfloat16),
        grid_spec=pltpu.PrefetchScalarGridSpec(
            num_scalar_prefetch=0,
            grid=(grid_m,),
            in_specs=[
                pl.BlockSpec((4, Kp, tile_m), lambda i: (0, 0, i)),  # patches
                pl.BlockSpec((cout, Kp), lambda i: (0, 0)),          # weights
                pl.BlockSpec((cout, 1), lambda i: (0, 0)),           # bias
            ],
            out_specs=pl.BlockSpec((cout, tile_m), lambda i: (0, i)),
        ),
        compiler_params=pltpu.CompilerParams(
            dimension_semantics=("parallel",)),
    )(patches, w_mat, b_col)

    # Mp == round_up(M, 128); dropping the pad columns is a tiny bf16 slice
    # that fuses into the next stage's patch-building fusion.
    return out[:, :M].reshape(cout, n, ph, pw)


# ---------------------------------------------------------------------------
# Fused FC head
# ---------------------------------------------------------------------------

def fc_head(x, w1, b1, w2, b2):
    """x: (n, F) bf16, w1: (F, H) bf16, b1: (1, H) f32, w2: (H, 1) bf16,
    b2: (1, 1) f32 -> (n, 1) f32."""
    n, f = x.shape
    hdim = w1.shape[1]
    return pl.pallas_call(
        _fc_head_kernel,
        out_shape=jax.ShapeDtypeStruct((n, 1), jnp.float32),
        grid_spec=pltpu.PrefetchScalarGridSpec(
            num_scalar_prefetch=0,
            grid=(1,),
            in_specs=[
                pl.BlockSpec((n, f), lambda i: (0, 0)),
                pl.BlockSpec((f, hdim), lambda i: (0, 0)),
                pl.BlockSpec((1, hdim), lambda i: (0, 0)),
                pl.BlockSpec((hdim, 1), lambda i: (0, 0)),
                pl.BlockSpec((1, 1), lambda i: (0, 0)),
            ],
            out_specs=pl.BlockSpec((n, 1), lambda i: (0, 0)),
        ),
    )(x, w1, b1, w2, b2)


# ---------------------------------------------------------------------------
# Full forward pass
# ---------------------------------------------------------------------------

def cnn_forward(params, x_nchw):
    n = x_nchw.shape[0]
    # NCHW -> channel-major (C, N, H, W); bf16 for all inter-layer traffic.
    x = jnp.transpose(x_nchw, (1, 0, 2, 3)).astype(jnp.bfloat16)
    x = conv3x3s2_relu_pool2(x, params["w1"], params["b1"], tile_m=2048)  # grid 3
    x = conv3x3s2_relu_pool2(x, params["w2"], params["b2"], tile_m=128)   # grid 3
    x = conv3x3s2_relu_pool2(x, params["w3"], params["b3"], tile_m=128)   # grid 1
    # Flatten in torch NCHW order: (C, N, 3, 3) -> (N, C*3*3) = (N, 576).
    x = jnp.transpose(x, (1, 0, 2, 3)).reshape(n, -1)
    return fc_head(
        x,
        params["w_fc1"].T.astype(jnp.bfloat16),
        params["b_fc1"].reshape(1, -1).astype(jnp.float32),
        params["w_fc2"].T.astype(jnp.bfloat16),
        params["b_fc2"].reshape(1, -1).astype(jnp.float32),
    )


def init_params(key):
    ks = jax.random.split(key, 10)

    def conv_w(k, cout, cin, kh, kw):
        fan_in = cin * kh * kw
        return jax.random.normal(k, (cout, cin, kh, kw), jnp.float32) / jnp.sqrt(fan_in)

    def lin_w(k, cout, cin):
        return jax.random.normal(k, (cout, cin), jnp.float32) / jnp.sqrt(cin)

    return {
        "w1": conv_w(ks[0], 16, 3, 3, 3),
        "b1": 0.01 * jax.random.normal(ks[1], (16,), jnp.float32),
        "w2": conv_w(ks[2], 32, 16, 3, 3),
        "b2": 0.01 * jax.random.normal(ks[3], (32,), jnp.float32),
        "w3": conv_w(ks[4], 64, 32, 3, 3),
        "b3": 0.01 * jax.random.normal(ks[5], (64,), jnp.float32),
        "w_fc1": lin_w(ks[6], 10, 576),
        "b_fc1": 0.01 * jax.random.normal(ks[7], (10,), jnp.float32),
        "w_fc2": lin_w(ks[8], 1, 10),
        "b_fc2": 0.01 * jax.random.normal(ks[9], (1,), jnp.float32),
    }


if __name__ == "__main__":
    key = jax.random.PRNGKey(0)
    k_param, k_x = jax.random.split(key)
    params = init_params(k_param)

    # fc_1 expects 576 = 64*3*3 features, which pins the input spatial size:
    # 224 -> conv(s2) 111 -> pool 55 -> conv(s2) 27 -> pool 13 -> conv(s2) 6 -> pool 3.
    x = jax.random.normal(k_x, (2, 3, 224, 224), jnp.float32)  # NCHW, matches PyTorch

    out = jax.jit(cnn_forward)(params, x)
    out = jax.block_until_ready(out)
    assert out.shape == (2, 1), out.shape
    assert bool(jnp.all((out >= 0.0) & (out <= 1.0)))
    assert bool(jnp.all(jnp.isfinite(out)))
    print("KERNEL_OK")
</pallas_src>

<mosaic_0001>
module attributes {stable_mosaic.version = 11 : i64} {
  func.func @_conv_relu_pool_kernel(%arg0: i32, %arg1: memref<4x32x2048xbf16, #tpu.memory_space<vmem>>, %arg2: memref<16x32xbf16, #tpu.memory_space<vmem>>, %arg3: memref<16x1xf32, #tpu.memory_space<vmem>>, %arg4: memref<16x2048xbf16, #tpu.memory_space<vmem>>) attributes {dimension_semantics = [#tpu.dimension_semantics<parallel>], iteration_bounds = array<i64: 3>, scalar_prefetch = 0 : i64, scratch_operands = 0 : i64, tpu.core_type = #tpu.core_type<tc>, window_params = [{transform_indices = @transform_0, window_bounds = array<i64: 4, 32, 2048>}, {pipeline_mode = #tpu.pipeline_mode<synchronous>, transform_indices = @transform_1, window_bounds = array<i64: 16, 32>}, {pipeline_mode = #tpu.pipeline_mode<synchronous>, transform_indices = @transform_2, window_bounds = array<i64: 16, 1>}, {transform_indices = @transform_3, window_bounds = array<i64: 16, 2048>}]} {
    %c0 = arith.constant 0 : index
    %c0_0 = arith.constant 0 : index
    %0 = vector.load %arg2[%c0, %c0_0] : memref<16x32xbf16, #tpu.memory_space<vmem>>, vector<16x32xbf16>
    %c0_1 = arith.constant 0 : index
    %c0_2 = arith.constant 0 : index
    %1 = vector.load %arg3[%c0_1, %c0_2] : memref<16x1xf32, #tpu.memory_space<vmem>>, vector<16x1xf32>
    %c0_3 = arith.constant 0 : index
    %c0_4 = arith.constant 0 : index
    %c0_5 = arith.constant 0 : index
    %2 = vector.load %arg1[%c0_3, %c0_4, %c0_5] : memref<4x32x2048xbf16, #tpu.memory_space<vmem>>, vector<1x32x2048xbf16>
    %3 = vector.shape_cast %2 : vector<1x32x2048xbf16> to vector<32x2048xbf16>
    %cst = arith.constant dense<0.000000e+00> : vector<16x2048xf32>
    %4 = tpu.matmul %0, %3, %cst {dimension_numbers = #tpu.dot_dimension_numbers<[1], [0], [0], [1], [0, 0, 1, 1], [], []>} : vector<16x32xbf16>, vector<32x2048xbf16>, vector<16x2048xf32> -> vector<16x2048xf32>
    %5 = vector.broadcast %1 : vector<16x1xf32> to vector<16x2048xf32>
    %6 = arith.addf %4, %5 : vector<16x2048xf32>
    %cst_6 = arith.constant 0.000000e+00 : f32
    %7 = vector.broadcast %cst_6 : f32 to vector<16x2048xf32>
    %8 = arith.maximumf %6, %7 : vector<16x2048xf32>
    %c1 = arith.constant 1 : index
    %c0_7 = arith.constant 0 : index
    %c0_8 = arith.constant 0 : index
    %9 = vector.load %arg1[%c1, %c0_7, %c0_8] : memref<4x32x2048xbf16, #tpu.memory_space<vmem>>, vector<1x32x2048xbf16>
    %10 = vector.shape_cast %9 : vector<1x32x2048xbf16> to vector<32x2048xbf16>
    %cst_9 = arith.constant dense<0.000000e+00> : vector<16x2048xf32>
    %11 = tpu.matmul %0, %10, %cst_9 {dimension_numbers = #tpu.dot_dimension_numbers<[1], [0], [0], [1], [0, 0, 1, 1], [], []>} : vector<16x32xbf16>, vector<32x2048xbf16>, vector<16x2048xf32> -> vector<16x2048xf32>
    %12 = vector.broadcast %1 : vector<16x1xf32> to vector<16x2048xf32>
    %13 = arith.addf %11, %12 : vector<16x2048xf32>
    %cst_10 = arith.constant 0.000000e+00 : f32
    %14 = vector.broadcast %cst_10 : f32 to vector<16x2048xf32>
    %15 = arith.maximumf %13, %14 : vector<16x2048xf32>
    %16 = arith.maximumf %8, %15 : vector<16x2048xf32>
    %c2 = arith.constant 2 : index
    %c0_11 = arith.constant 0 : index
    %c0_12 = arith.constant 0 : index
    %17 = vector.load %arg1[%c2, %c0_11, %c0_12] : memref<4x32x2048xbf16, #tpu.memory_space<vmem>>, vector<1x32x2048xbf16>
    %18 = vector.shape_cast %17 : vector<1x32x2048xbf16> to vector<32x2048xbf16>
    %cst_13 = arith.constant dense<0.000000e+00> : vector<16x2048xf32>
    %19 = tpu.matmul %0, %18, %cst_13 {dimension_numbers = #tpu.dot_dimension_numbers<[1], [0], [0], [1], [0, 0, 1, 1], [], []>} : vector<16x32xbf16>, vector<32x2048xbf16>, vector<16x2048xf32> -> vector<16x2048xf32>
    %20 = vector.broadcast %1 : vector<16x1xf32> to vector<16x2048xf32>
    %21 = arith.addf %19, %20 : vector<16x2048xf32>
    %cst_14 = arith.constant 0.000000e+00 : f32
    %22 = vector.broadcast %cst_14 : f32 to vector<16x2048xf32>
    %23 = arith.maximumf %21, %22 : vector<16x2048xf32>
    %c3 = arith.constant 3 : index
    %c0_15 = arith.constant 0 : index
    %c0_16 = arith.constant 0 : index
    %24 = vector.load %arg1[%c3, %c0_15, %c0_16] : memref<4x32x2048xbf16, #tpu.memory_space<vmem>>, vector<1x32x2048xbf16>
    %25 = vector.shape_cast %24 : vector<1x32x2048xbf16> to vector<32x2048xbf16>
    %cst_17 = arith.constant dense<0.000000e+00> : vector<16x2048xf32>
    %26 = tpu.matmul %0, %25, %cst_17 {dimension_numbers = #tpu.dot_dimension_numbers<[1], [0], [0], [1], [0, 0, 1, 1], [], []>} : vector<16x32xbf16>, vector<32x2048xbf16>, vector<16x2048xf32> -> vector<16x2048xf32>
    %27 = vector.broadcast %1 : vector<16x1xf32> to vector<16x2048xf32>
    %28 = arith.addf %26, %27 : vector<16x2048xf32>
    %cst_18 = arith.constant 0.000000e+00 : f32
    %29 = vector.broadcast %cst_18 : f32 to vector<16x2048xf32>
    %30 = arith.maximumf %28, %29 : vector<16x2048xf32>
    %31 = arith.maximumf %23, %30 : vector<16x2048xf32>
    %32 = arith.maximumf %16, %31 : vector<16x2048xf32>
    %33 = arith.truncf %32 : vector<16x2048xf32> to vector<16x2048xbf16>
    %c0_19 = arith.constant 0 : index
    %c0_20 = arith.constant 0 : index
    %34 = vector.load %arg4[%c0_19, %c0_20] : memref<16x2048xbf16, #tpu.memory_space<vmem>>, vector<16x2048xbf16>
    tpu.vector_store %arg4[%c0_19, %c0_20], %33 {strides = array<i32>} : memref<16x2048xbf16, #tpu.memory_space<vmem>>, vector<16x2048xbf16>,
    return
  }
  func.func @transform_0(%arg0: i32) -> (i32, i32, i32) {
    %c0_i32 = arith.constant 0 : i32
    %c0_i32_0 = arith.constant 0 : i32
    %c0_i32_1 = arith.constant 0 : i32
    return %c0_i32, %c0_i32_0, %arg0 : i32, i32, i32
  }
  func.func @transform_1(%arg0: i32) -> (i32, i32) {
    %c0_i32 = arith.constant 0 : i32
    %c0_i32_0 = arith.constant 0 : i32
    %c0_i32_1 = arith.constant 0 : i32
    return %c0_i32, %c0_i32_0 : i32, i32
  }
  func.func @transform_2(%arg0: i32) -> (i32, i32) {
    %c0_i32 = arith.constant 0 : i32
    %c0_i32_0 = arith.constant 0 : i32
    %c0_i32_1 = arith.constant 0 : i32
    return %c0_i32, %c0_i32_0 : i32, i32
  }
  func.func @transform_3(%arg0: i32) -> (i32, i32) {
    %c0_i32 = arith.constant 0 : i32
    %c0_i32_0 = arith.constant 0 : i32
    return %c0_i32, %arg0 : i32, i32
  }
}

module attributes {stable_mosaic.version = 11 : i64} {
  func.func @_conv_relu_pool_kernel(%arg0: i32, %arg1: memref<4x144x128xbf16, #tpu.memory_space<vmem>>, %arg2: memref<32x144xbf16, #tpu.memory_space<vmem>>, %arg3: memref<32x1xf32, #tpu.memory_space<vmem>>, %arg4: memref<32x128xbf16, #tpu.memory_space<vmem>>) attributes {dimension_semantics = [#tpu.dimension_semantics<parallel>], iteration_bounds = array<i64: 3>, scalar_prefetch = 0 : i64, scratch_operands = 0 : i64, tpu.core_type = #tpu.core_type<tc>, window_params = [{transform_indices = @transform_0, window_bounds = array<i64: 4, 144, 128>}, {pipeline_mode = #tpu.pipeline_mode<synchronous>, transform_indices = @transform_1, window_bounds = array<i64: 32, 144>}, {pipeline_mode = #tpu.pipeline_mode<synchronous>, transform_indices = @transform_2, window_bounds = array<i64: 32, 1>}, {transform_indices = @transform_3, window_bounds = array<i64: 32, 128>}]} {
    %c0 = arith.constant 0 : index
    %c0_0 = arith.constant 0 : index
    %0 = vector.load %arg2[%c0, %c0_0] : memref<32x144xbf16, #tpu.memory_space<vmem>>, vector<32x144xbf16>
    %c0_1 = arith.constant 0 : index
    %c0_2 = arith.constant 0 : index
    %1 = vector.load %arg3[%c0_1, %c0_2] : memref<32x1xf32, #tpu.memory_space<vmem>>, vector<32x1xf32>
    %c0_3 = arith.constant 0 : index
    %c0_4 = arith.constant 0 : index
    %c0_5 = arith.constant 0 : index
    %2 = vector.load %arg1[%c0_3, %c0_4, %c0_5] : memref<4x144x128xbf16, #tpu.memory_space<vmem>>, vector<1x144x128xbf16>
    %3 = vector.shape_cast %2 : vector<1x144x128xbf16> to vector<144x128xbf16>
    %cst = arith.constant dense<0.000000e+00> : vector<32x128xf32>
    %4 = tpu.matmul %0, %3, %cst {dimension_numbers = #tpu.dot_dimension_numbers<[1], [0], [0], [1], [0, 0, 1, 1], [], []>} : vector<32x144xbf16>, vector<144x128xbf16>, vector<32x128xf32> -> vector<32x128xf32>
    %5 = vector.broadcast %1 : vector<32x1xf32> to vector<32x128xf32>
    %6 = arith.addf %4, %5 : vector<32x128xf32>
    %cst_6 = arith.constant 0.000000e+00 : f32
    %7 = vector.broadcast %cst_6 : f32 to vector<32x128xf32>
    %8 = arith.maximumf %6, %7 : vector<32x128xf32>
    %c1 = arith.constant 1 : index
    %c0_7 = arith.constant 0 : index
    %c0_8 = arith.constant 0 : index
    %9 = vector.load %arg1[%c1, %c0_7, %c0_8] : memref<4x144x128xbf16, #tpu.memory_space<vmem>>, vector<1x144x128xbf16>
    %10 = vector.shape_cast %9 : vector<1x144x128xbf16> to vector<144x128xbf16>
    %cst_9 = arith.constant dense<0.000000e+00> : vector<32x128xf32>
    %11 = tpu.matmul %0, %10, %cst_9 {dimension_numbers = #tpu.dot_dimension_numbers<[1], [0], [0], [1], [0, 0, 1, 1], [], []>} : vector<32x144xbf16>, vector<144x128xbf16>, vector<32x128xf32> -> vector<32x128xf32>
    %12 = vector.broadcast %1 : vector<32x1xf32> to vector<32x128xf32>
    %13 = arith.addf %11, %12 : vector<32x128xf32>
    %cst_10 = arith.constant 0.000000e+00 : f32
    %14 = vector.broadcast %cst_10 : f32 to vector<32x128xf32>
    %15 = arith.maximumf %13, %14 : vector<32x128xf32>
    %16 = arith.maximumf %8, %15 : vector<32x128xf32>
    %c2 = arith.constant 2 : index
    %c0_11 = arith.constant 0 : index
    %c0_12 = arith.constant 0 : index
    %17 = vector.load %arg1[%c2, %c0_11, %c0_12] : memref<4x144x128xbf16, #tpu.memory_space<vmem>>, vector<1x144x128xbf16>
    %18 = vector.shape_cast %17 : vector<1x144x128xbf16> to vector<144x128xbf16>
    %cst_13 = arith.constant dense<0.000000e+00> : vector<32x128xf32>
    %19 = tpu.matmul %0, %18, %cst_13 {dimension_numbers = #tpu.dot_dimension_numbers<[1], [0], [0], [1], [0, 0, 1, 1], [], []>} : vector<32x144xbf16>, vector<144x128xbf16>, vector<32x128xf32> -> vector<32x128xf32>
    %20 = vector.broadcast %1 : vector<32x1xf32> to vector<32x128xf32>
    %21 = arith.addf %19, %20 : vector<32x128xf32>
    %cst_14 = arith.constant 0.000000e+00 : f32
    %22 = vector.broadcast %cst_14 : f32 to vector<32x128xf32>
    %23 = arith.maximumf %21, %22 : vector<32x128xf32>
    %c3 = arith.constant 3 : index
    %c0_15 = arith.constant 0 : index
    %c0_16 = arith.constant 0 : index
    %24 = vector.load %arg1[%c3, %c0_15, %c0_16] : memref<4x144x128xbf16, #tpu.memory_space<vmem>>, vector<1x144x128xbf16>
    %25 = vector.shape_cast %24 : vector<1x144x128xbf16> to vector<144x128xbf16>
    %cst_17 = arith.constant dense<0.000000e+00> : vector<32x128xf32>
    %26 = tpu.matmul %0, %25, %cst_17 {dimension_numbers = #tpu.dot_dimension_numbers<[1], [0], [0], [1], [0, 0, 1, 1], [], []>} : vector<32x144xbf16>, vector<144x128xbf16>, vector<32x128xf32> -> vector<32x128xf32>
    %27 = vector.broadcast %1 : vector<32x1xf32> to vector<32x128xf32>
    %28 = arith.addf %26, %27 : vector<32x128xf32>
    %cst_18 = arith.constant 0.000000e+00 : f32
    %29 = vector.broadcast %cst_18 : f32 to vector<32x128xf32>
    %30 = arith.maximumf %28, %29 : vector<32x128xf32>
    %31 = arith.maximumf %23, %30 : vector<32x128xf32>
    %32 = arith.maximumf %16, %31 : vector<32x128xf32>
    %33 = arith.truncf %32 : vector<32x128xf32> to vector<32x128xbf16>
    %c0_19 = arith.constant 0 : index
    %c0_20 = arith.constant 0 : index
    %34 = vector.load %arg4[%c0_19, %c0_20] : memref<32x128xbf16, #tpu.memory_space<vmem>>, vector<32x128xbf16>
    tpu.vector_store %arg4[%c0_19, %c0_20], %33 {strides = array<i32>} : memref<32x128xbf16, #tpu.memory_space<vmem>>, vector<32x128xbf16>,
    return
  }
  func.func @transform_0(%arg0: i32) -> (i32, i32, i32) {
    %c0_i32 = arith.constant 0 : i32
    %c0_i32_0 = arith.constant 0 : i32
    %c0_i32_1 = arith.constant 0 : i32
    return %c0_i32, %c0_i32_0, %arg0 : i32, i32, i32
  }
  func.func @transform_1(%arg0: i32) -> (i32, i32) {
    %c0_i32 = arith.constant 0 : i32
    %c0_i32_0 = arith.constant 0 : i32
    %c0_i32_1 = arith.constant 0 : i32
    return %c0_i32, %c0_i32_0 : i32, i32
  }
  func.func @transform_2(%arg0: i32) -> (i32, i32) {
    %c0_i32 = arith.constant 0 : i32
    %c0_i32_0 = arith.constant 0 : i32
    %c0_i32_1 = arith.constant 0 : i32
    return %c0_i32, %c0_i32_0 : i32, i32
  }
  func.func @transform_3(%arg0: i32) -> (i32, i32) {
    %c0_i32 = arith.constant 0 : i32
    %c0_i32_0 = arith.constant 0 : i32
    return %c0_i32, %arg0 : i32, i32
  }
}

module attributes {stable_mosaic.version = 11 : i64} {
  func.func @_conv_relu_pool_kernel(%arg0: i32, %arg1: memref<4x288x128xbf16, #tpu.memory_space<vmem>>, %arg2: memref<64x288xbf16, #tpu.memory_space<vmem>>, %arg3: memref<64x1xf32, #tpu.memory_space<vmem>>, %arg4: memref<64x128xbf16, #tpu.memory_space<vmem>>) attributes {dimension_semantics = [#tpu.dimension_semantics<parallel>], iteration_bounds = array<i64: 1>, scalar_prefetch = 0 : i64, scratch_operands = 0 : i64, tpu.core_type = #tpu.core_type<tc>, window_params = [{transform_indices = @transform_0, window_bounds = array<i64: 4, 288, 128>}, {pipeline_mode = #tpu.pipeline_mode<synchronous>, transform_indices = @transform_1, window_bounds = array<i64: 64, 288>}, {pipeline_mode = #tpu.pipeline_mode<synchronous>, transform_indices = @transform_2, window_bounds = array<i64: 64, 1>}, {transform_indices = @transform_3, window_bounds = array<i64: 64, 128>}]} {
    %c0 = arith.constant 0 : index
    %c0_0 = arith.constant 0 : index
    %0 = vector.load %arg2[%c0, %c0_0] : memref<64x288xbf16, #tpu.memory_space<vmem>>, vector<64x288xbf16>
    %c0_1 = arith.constant 0 : index
    %c0_2 = arith.constant 0 : index
    %1 = vector.load %arg3[%c0_1, %c0_2] : memref<64x1xf32, #tpu.memory_space<vmem>>, vector<64x1xf32>
    %c0_3 = arith.constant 0 : index
    %c0_4 = arith.constant 0 : index
    %c0_5 = arith.constant 0 : index
    %2 = vector.load %arg1[%c0_3, %c0_4, %c0_5] : memref<4x288x128xbf16, #tpu.memory_space<vmem>>, vector<1x288x128xbf16>
    %3 = vector.shape_cast %2 : vector<1x288x128xbf16> to vector<288x128xbf16>
    %cst = arith.constant dense<0.000000e+00> : vector<64x128xf32>
    %4 = tpu.matmul %0, %3, %cst {dimension_numbers = #tpu.dot_dimension_numbers<[1], [0], [0], [1], [0, 0, 1, 1], [], []>} : vector<64x288xbf16>, vector<288x128xbf16>, vector<64x128xf32> -> vector<64x128xf32>
    %5 = vector.broadcast %1 : vector<64x1xf32> to vector<64x128xf32>
    %6 = arith.addf %4, %5 : vector<64x128xf32>
    %cst_6 = arith.constant 0.000000e+00 : f32
    %7 = vector.broadcast %cst_6 : f32 to vector<64x128xf32>
    %8 = arith.maximumf %6, %7 : vector<64x128xf32>
    %c1 = arith.constant 1 : index
    %c0_7 = arith.constant 0 : index
    %c0_8 = arith.constant 0 : index
    %9 = vector.load %arg1[%c1, %c0_7, %c0_8] : memref<4x288x128xbf16, #tpu.memory_space<vmem>>, vector<1x288x128xbf16>
    %10 = vector.shape_cast %9 : vector<1x288x128xbf16> to vector<288x128xbf16>
    %cst_9 = arith.constant dense<0.000000e+00> : vector<64x128xf32>
    %11 = tpu.matmul %0, %10, %cst_9 {dimension_numbers = #tpu.dot_dimension_numbers<[1], [0], [0], [1], [0, 0, 1, 1], [], []>} : vector<64x288xbf16>, vector<288x128xbf16>, vector<64x128xf32> -> vector<64x128xf32>
    %12 = vector.broadcast %1 : vector<64x1xf32> to vector<64x128xf32>
    %13 = arith.addf %11, %12 : vector<64x128xf32>
    %cst_10 = arith.constant 0.000000e+00 : f32
    %14 = vector.broadcast %cst_10 : f32 to vector<64x128xf32>
    %15 = arith.maximumf %13, %14 : vector<64x128xf32>
    %16 = arith.maximumf %8, %15 : vector<64x128xf32>
    %c2 = arith.constant 2 : index
    %c0_11 = arith.constant 0 : index
    %c0_12 = arith.constant 0 : index
    %17 = vector.load %arg1[%c2, %c0_11, %c0_12] : memref<4x288x128xbf16, #tpu.memory_space<vmem>>, vector<1x288x128xbf16>
    %18 = vector.shape_cast %17 : vector<1x288x128xbf16> to vector<288x128xbf16>
    %cst_13 = arith.constant dense<0.000000e+00> : vector<64x128xf32>
    %19 = tpu.matmul %0, %18, %cst_13 {dimension_numbers = #tpu.dot_dimension_numbers<[1], [0], [0], [1], [0, 0, 1, 1], [], []>} : vector<64x288xbf16>, vector<288x128xbf16>, vector<64x128xf32> -> vector<64x128xf32>
    %20 = vector.broadcast %1 : vector<64x1xf32> to vector<64x128xf32>
    %21 = arith.addf %19, %20 : vector<64x128xf32>
    %cst_14 = arith.constant 0.000000e+00 : f32
    %22 = vector.broadcast %cst_14 : f32 to vector<64x128xf32>
    %23 = arith.maximumf %21, %22 : vector<64x128xf32>
    %c3 = arith.constant 3 : index
    %c0_15 = arith.constant 0 : index
    %c0_16 = arith.constant 0 : index
    %24 = vector.load %arg1[%c3, %c0_15, %c0_16] : memref<4x288x128xbf16, #tpu.memory_space<vmem>>, vector<1x288x128xbf16>
    %25 = vector.shape_cast %24 : vector<1x288x128xbf16> to vector<288x128xbf16>
    %cst_17 = arith.constant dense<0.000000e+00> : vector<64x128xf32>
    %26 = tpu.matmul %0, %25, %cst_17 {dimension_numbers = #tpu.dot_dimension_numbers<[1], [0], [0], [1], [0, 0, 1, 1], [], []>} : vector<64x288xbf16>, vector<288x128xbf16>, vector<64x128xf32> -> vector<64x128xf32>
    %27 = vector.broadcast %1 : vector<64x1xf32> to vector<64x128xf32>
    %28 = arith.addf %26, %27 : vector<64x128xf32>
    %cst_18 = arith.constant 0.000000e+00 : f32
    %29 = vector.broadcast %cst_18 : f32 to vector<64x128xf32>
    %30 = arith.maximumf %28, %29 : vector<64x128xf32>
    %31 = arith.maximumf %23, %30 : vector<64x128xf32>
    %32 = arith.maximumf %16, %31 : vector<64x128xf32>
    %33 = arith.truncf %32 : vector<64x128xf32> to vector<64x128xbf16>
    %c0_19 = arith.constant 0 : index
    %c0_20 = arith.constant 0 : index
    %34 = vector.load %arg4[%c0_19, %c0_20] : memref<64x128xbf16, #tpu.memory_space<vmem>>, vector<64x128xbf16>
    tpu.vector_store %arg4[%c0_19, %c0_20], %33 {strides = array<i32>} : memref<64x128xbf16, #tpu.memory_space<vmem>>, vector<64x128xbf16>,
    return
  }
  func.func @transform_0(%arg0: i32) -> (i32, i32, i32) {
    %c0_i32 = arith.constant 0 : i32
    %c0_i32_0 = arith.constant 0 : i32
    %c0_i32_1 = arith.constant 0 : i32
    return %c0_i32, %c0_i32_0, %arg0 : i32, i32, i32
  }
  func.func @transform_1(%arg0: i32) -> (i32, i32) {
    %c0_i32 = arith.constant 0 : i32
    %c0_i32_0 = arith.constant 0 : i32
    %c0_i32_1 = arith.constant 0 : i32
    return %c0_i32, %c0_i32_0 : i32, i32
  }
  func.func @transform_2(%arg0: i32) -> (i32, i32) {
    %c0_i32 = arith.constant 0 : i32
    %c0_i32_0 = arith.constant 0 : i32
    %c0_i32_1 = arith.constant 0 : i32
    return %c0_i32, %c0_i32_0 : i32, i32
  }
  func.func @transform_3(%arg0: i32) -> (i32, i32) {
    %c0_i32 = arith.constant 0 : i32
    %c0_i32_0 = arith.constant 0 : i32
    return %c0_i32, %arg0 : i32, i32
  }
}

module attributes {stable_mosaic.version = 11 : i64} {
  func.func @_fc_head_kernel(%arg0: i32, %arg1: memref<2x576xbf16, #tpu.memory_space<vmem>>, %arg2: memref<576x10xbf16, #tpu.memory_space<vmem>>, %arg3: memref<1x10xf32, #tpu.memory_space<vmem>>, %arg4: memref<10x1xbf16, #tpu.memory_space<vmem>>, %arg5: memref<1x1xf32, #tpu.memory_space<vmem>>, %arg6: memref<2x1xf32, #tpu.memory_space<vmem>>) attributes {dimension_semantics = [#tpu.dimension_semantics<arbitrary>], iteration_bounds = array<i64: 1>, scalar_prefetch = 0 : i64, scratch_operands = 0 : i64, tpu.core_type = #tpu.core_type<tc>, window_params = [{pipeline_mode = #tpu.pipeline_mode<synchronous>, transform_indices = @transform_0, window_bounds = array<i64: 2, 576>}, {pipeline_mode = #tpu.pipeline_mode<synchronous>, transform_indices = @transform_1, window_bounds = array<i64: 576, 10>}, {pipeline_mode = #tpu.pipeline_mode<synchronous>, transform_indices = @transform_2, window_bounds = array<i64: 1, 10>}, {pipeline_mode = #tpu.pipeline_mode<synchronous>, transform_indices = @transform_3, window_bounds = array<i64: 10, 1>}, {pipeline_mode = #tpu.pipeline_mode<synchronous>, transform_indices = @transform_4, window_bounds = array<i64: 1, 1>}, {pipeline_mode = #tpu.pipeline_mode<synchronous>, transform_indices = @transform_5, window_bounds = array<i64: 2, 1>}]} {
    %c0 = arith.constant 0 : index
    %c0_0 = arith.constant 0 : index
    %0 = vector.load %arg1[%c0, %c0_0] : memref<2x576xbf16, #tpu.memory_space<vmem>>, vector<2x576xbf16>
    %c0_1 = arith.constant 0 : index
    %c0_2 = arith.constant 0 : index
    %1 = vector.load %arg2[%c0_1, %c0_2] : memref<576x10xbf16, #tpu.memory_space<vmem>>, vector<576x10xbf16>
    %cst = arith.constant dense<0.000000e+00> : vector<2x10xf32>
    %2 = tpu.matmul %0, %1, %cst {dimension_numbers = #tpu.dot_dimension_numbers<[1], [0], [0], [1], [0, 0, 1, 1], [], []>} : vector<2x576xbf16>, vector<576x10xbf16>, vector<2x10xf32> -> vector<2x10xf32>
    %c0_3 = arith.constant 0 : index
    %c0_4 = arith.constant 0 : index
    %3 = vector.load %arg3[%c0_3, %c0_4] : memref<1x10xf32, #tpu.memory_space<vmem>>, vector<1x10xf32>
    %4 = vector.broadcast %3 : vector<1x10xf32> to vector<2x10xf32>
    %5 = arith.addf %2, %4 : vector<2x10xf32>
    %cst_5 = arith.constant 0.000000e+00 : f32
    %6 = vector.broadcast %cst_5 : f32 to vector<2x10xf32>
    %7 = arith.maximumf %5, %6 : vector<2x10xf32>
    %8 = arith.truncf %7 : vector<2x10xf32> to vector<2x10xbf16>
    %c0_6 = arith.constant 0 : index
    %c0_7 = arith.constant 0 : index
    %9 = vector.load %arg4[%c0_6, %c0_7] : memref<10x1xbf16, #tpu.memory_space<vmem>>, vector<10x1xbf16>
    %cst_8 = arith.constant dense<0.000000e+00> : vector<2x1xf32>
    %10 = tpu.matmul %8, %9, %cst_8 {dimension_numbers = #tpu.dot_dimension_numbers<[1], [0], [0], [1], [0, 0, 1, 1], [], []>} : vector<2x10xbf16>, vector<10x1xbf16>, vector<2x1xf32> -> vector<2x1xf32>
    %c0_9 = arith.constant 0 : index
    %c0_10 = arith.constant 0 : index
    %11 = vector.load %arg5[%c0_9, %c0_10] : memref<1x1xf32, #tpu.memory_space<vmem>>, vector<1x1xf32>
    %12 = vector.broadcast %11 : vector<1x1xf32> to vector<2x1xf32>
    %13 = arith.addf %10, %12 : vector<2x1xf32>
    %cst_11 = arith.constant 0.000000e+00 : f32
    %14 = vector.broadcast %cst_11 : f32 to vector<2x1xf32>
    %15 = arith.subf %14, %13 : vector<2x1xf32>
    %16 = math.exp %15 : vector<2x1xf32>
    %cst_12 = arith.constant 1.000000e+00 : f32
    %17 = vector.broadcast %cst_12 : f32 to vector<2x1xf32>
    %18 = arith.addf %17, %16 : vector<2x1xf32>
    %19 = tpu.reciprocal %18 : vector<2x1xf32> -> vector<2x1xf32>
    %c0_13 = arith.constant 0 : index
    %c0_14 = arith.constant 0 : index
    %20 = vector.load %arg6[%c0_13, %c0_14] : memref<2x1xf32, #tpu.memory_space<vmem>>, vector<2x1xf32>
    tpu.vector_store %arg6[%c0_13, %c0_14], %19 {strides = array<i32>} : memref<2x1xf32, #tpu.memory_space<vmem>>, vector<2x1xf32>,
    return
  }
  func.func @transform_0(%arg0: i32) -> (i32, i32) {
    %c0_i32 = arith.constant 0 : i32
    %c0_i32_0 = arith.constant 0 : i32
    %c0_i32_1 = arith.constant 0 : i32
    return %c0_i32, %c0_i32_0 : i32, i32
  }
  func.func @transform_1(%arg0: i32) -> (i32, i32) {
    %c0_i32 = arith.constant 0 : i32
    %c0_i32_0 = arith.constant 0 : i32
    %c0_i32_1 = arith.constant 0 : i32
    return %c0_i32, %c0_i32_0 : i32, i32
  }
  func.func @transform_2(%arg0: i32) -> (i32, i32) {
    %c0_i32 = arith.constant 0 : i32
    %c0_i32_0 = arith.constant 0 : i32
    %c0_i32_1 = arith.constant 0 : i32
    return %c0_i32, %c0_i32_0 : i32, i32
  }
  func.func @transform_3(%arg0: i32) -> (i32, i32) {
    %c0_i32 = arith.constant 0 : i32
    %c0_i32_0 = arith.constant 0 : i32
    %c0_i32_1 = arith.constant 0 : i32
    return %c0_i32, %c0_i32_0 : i32, i32
  }
  func.func @transform_4(%arg0: i32) -> (i32, i32) {
    %c0_i32 = arith.constant 0 : i32
    %c0_i32_0 = arith.constant 0 : i32
    %c0_i32_1 = arith.constant 0 : i32
    return %c0_i32, %c0_i32_0 : i32, i32
  }
  func.func @transform_5(%arg0: i32) -> (i32, i32) {
    %c0_i32 = arith.constant 0 : i32
    %c0_i32_0 = arith.constant 0 : i32
    %c0_i32_1 = arith.constant 0 : i32
    return %c0_i32, %c0_i32_0 : i32, i32
  }
}

</mosaic_0001>

<bundles_post_ra>
// kernel: cnn_forward.4
= control target key start
LH: loop header
LB: loop body
LE: loop exit
PB: predicated region body
PF: predicated region fallthrough
CT: control target
= control target key end

     0   :  { %s3439_s12 = smov 0   ;;  %s3441_s13 = smov 0   ;;  %s4574_s0 = inlined_call_operand.vmem [shape: bf16[4,32,6144], index: 0, kind: input, shape index: {}]   ;;  %s4575_s1 = inlined_call_operand.vmem [shape: bf16[16,32], index: 1, kind: input, shape index: {}]   ;;  %s4576_s2 = inlined_call_operand.vmem [shape: f32[16,1], index: 2, kind: input, shape index: {}]   ;;  %s4577_s3 = inlined_call_operand.vmem [shape: bf16[16,6144], index: 3, kind: output, shape index: {}]  }
   0x1   :  { %s3443_s14 = smov 0  }
   0x2 LB: > { %s3061_s15 = sadd.s32 4294967295, %s3416_s14   ;;  %s3456_s16 = sadd.s32 1, %s3416_s14   ;;  %s3416_s14 = sphi %s3443_s14, %s4664_s14   ;;  %s3412_s13 = sphi %s3441_s13, %s4663_s13   ;;  %s3408_s12 = sphi %s3439_s12, %s4662_s12  }
   0x3   : > { %s17_s17 = ssub.s32 %s3416_s14, %s3456_s16  ;;  %s20_s18 = sadd.s32 1, %s3412_s13 }
   0x4   : > { %p18_p0 = scmp.eq.s32.totalorder %s17_s17, 0  ;;  %p27_p1 = scmp.ne.s32.totalorder %s3412_s13, %s3408_s12 }
   0x5   : > { %p28_p2 = scmp.eq.s32.totalorder %s3416_s14, 0  ;;  %p99_p3 = scmp.eq.s32.totalorder %s3061_s15, 2 }
   0x6   : > { %s3467_s19 = scalar_select %p18_p0, %s3412_s13, %s20_s18  }
   0x7   : > { %p29_p4 = por %p28_p2, %p27_p1  ;;  %p3469_p5 = por %p99_p3, %p27_p1 }
   0x8   : > { %p3064_p6 = scmp.ge.s32.totalorder %s3416_s14, 3 }
   0xa   : > { %127 = sbr.rel (%p3064_p6) target bundleno = 85 (0x55), region = 24 }
  0x11   : > { %130 = sbr.rel (!%p29_p4) target bundleno = 85 (0x55), region = 28  ;;  %s132_s21 = sand.u32 (%p29_p4), 1, %s3412_s13  }
  0x12   : > { %s3349_s22 = sshll.u32 (%p29_p4), %s3416_s14, 6  ;;  %s3065_s23 = sshll.u32 (%p29_p4), %s132_s21, 10 }
  0x13   : > { %s3479_s26 = scalar_lea.vmem (%p29_p4), %s4574_s0, %s3349_s22  ;;  %s3484_s27 = scalar_lea.vmem (%p29_p4), [#allocation2], %s3065_s23 }
  0x14   : > { %v150_v0 = vld [vmem:[%s3479_s26] sm:$0xff] (%p29_p4)  ;;  %v152_v1 = vld [vmem:[%s3479_s26 + $0x8] sm:$0xff] (%p29_p4)  ;;  %v154_v2 = vld [vmem:[%s3479_s26 + $0x10] sm:$0xff] (%p29_p4) }
  0x15   : > { %151 = vst [vmem:[%s3484_s27] sm:$0xff] (%p29_p4), %v150_v0  ;;  %153 = vst [vmem:[%s3484_s27 + $0x8] sm:$0xff] (%p29_p4), %v152_v1  ;;  %v156_v3 = vld [vmem:[%s3479_s26 + $0x18] sm:$0xff] (%p29_p4)  ;;  %v158_v4 = vld [vmem:[%s3479_s26 + $0x20] sm:$0xff] (%p29_p4) }
  0x16   : > { %155 = vst [vmem:[%s3484_s27 + $0x10] sm:$0xff] (%p29_p4), %v154_v2  ;;  %v160_v5 = vld [vmem:[%s3479_s26 + $0x28] sm:$0xff] (%p29_p4)  ;;  %157 = vst [vmem:[%s3484_s27 + $0x18] sm:$0xff] (%p29_p4), %v156_v3  ;;  %v162_v6 = vld [vmem:[%s3479_s26 + $0x30] sm:$0xff] (%p29_p4) }
  0x17   : > { %159 = vst [vmem:[%s3484_s27 + $0x20] sm:$0xff] (%p29_p4), %v158_v4  ;;  %161 = vst [vmem:[%s3484_s27 + $0x28] sm:$0xff] (%p29_p4), %v160_v5  ;;  %v164_v7 = vld [vmem:[%s3479_s26 + $0x38] sm:$0xff] (%p29_p4)  ;;  %v166_v8 = vld [vmem:[%s3479_s26 + $0xc0] sm:$0xff] (%p29_p4) }
  0x18   : > { %163 = vst [vmem:[%s3484_s27 + $0x30] sm:$0xff] %v162_v6  ;;  %165 = vst [vmem:[%s3484_s27 + $0x38] sm:$0xff] %v164_v7  ;;  %v168_v9 = vld [vmem:[%s3479_s26 + $0xc8] sm:$0xff]  ;;  %v170_v10 = vld [vmem:[%s3479_s26 + $0xd0] sm:$0xff] }
  0x19   : > { %167 = vst [vmem:[%s3484_s27 + $0x40] sm:$0xff] %v166_v8  ;;  %v172_v11 = vld [vmem:[%s3479_s26 + $0xd8] sm:$0xff]  ;;  %169 = vst [vmem:[%s3484_s27 + $0x48] sm:$0xff] %v168_v9  ;;  %v174_v12 = vld [vmem:[%s3479_s26 + $0xe0] sm:$0xff] }
  0x1a   : > { %171 = vst [vmem:[%s3484_s27 + $0x50] sm:$0xff] %v170_v10  ;;  %173 = vst [vmem:[%s3484_s27 + $0x58] sm:$0xff] %v172_v11  ;;  %v176_v13 = vld [vmem:[%s3479_s26 + $0xe8] sm:$0xff]  ;;  %v178_v14 = vld [vmem:[%s3479_s26 + $0xf0] sm:$0xff] }
  0x1b   : > { %175 = vst [vmem:[%s3484_s27 + $0x60] sm:$0xff] %v174_v12  ;;  %177 = vst [vmem:[%s3484_s27 + $0x68] sm:$0xff] %v176_v13  ;;  %v180_v15 = vld [vmem:[%s3479_s26 + $0xf8] sm:$0xff]  ;;  %v182_v16 = vld [vmem:[%s3479_s26 + $0x180] sm:$0xff] }
  0x1c   : > { %179 = vst [vmem:[%s3484_s27 + $0x70] sm:$0xff] %v178_v14  ;;  %v184_v17 = vld [vmem:[%s3479_s26 + $0x188] sm:$0xff]  ;;  %181 = vst [vmem:[%s3484_s27 + $0x78] sm:$0xff] %v180_v15  ;;  %v186_v18 = vld [vmem:[%s3479_s26 + $0x190] sm:$0xff] }
  0x1d   : > { %183 = vst [vmem:[%s3484_s27 + $0x80] sm:$0xff] %v182_v16  ;;  %185 = vst [vmem:[%s3484_s27 + $0x88] sm:$0xff] %v184_v17  ;;  %v188_v19 = vld [vmem:[%s3479_s26 + $0x198] sm:$0xff]  ;;  %v190_v20 = vld [vmem:[%s3479_s26 + $0x1a0] sm:$0xff] }
  0x1e   : > { %187 = vst [vmem:[%s3484_s27 + $0x90] sm:$0xff] %v186_v18  ;;  %189 = vst [vmem:[%s3484_s27 + $0x98] sm:$0xff] %v188_v19  ;;  %v192_v21 = vld [vmem:[%s3479_s26 + $0x1a8] sm:$0xff]  ;;  %v194_v22 = vld [vmem:[%s3479_s26 + $0x1b0] sm:$0xff] }
  0x1f   : > { %191 = vst [vmem:[%s3484_s27 + $0xa0] sm:$0xff] %v190_v20  ;;  %v196_v23 = vld [vmem:[%s3479_s26 + $0x1b8] sm:$0xff]  ;;  %193 = vst [vmem:[%s3484_s27 + $0xa8] sm:$0xff] %v192_v21  ;;  %v198_v24 = vld [vmem:[%s3479_s26 + $0x240] sm:$0xff] }
  0x20   : > { %195 = vst [vmem:[%s3484_s27 + $0xb0] sm:$0xff] %v194_v22  ;;  %197 = vst [vmem:[%s3484_s27 + $0xb8] sm:$0xff] %v196_v23  ;;  %v200_v25 = vld [vmem:[%s3479_s26 + $0x248] sm:$0xff]  ;;  %v202_v26 = vld [vmem:[%s3479_s26 + $0x250] sm:$0xff] }
  0x21   : > { %199 = vst [vmem:[%s3484_s27 + $0xc0] sm:$0xff] %v198_v24  ;;  %201 = vst [vmem:[%s3484_s27 + $0xc8] sm:$0xff] %v200_v25  ;;  %v204_v27 = vld [vmem:[%s3479_s26 + $0x258] sm:$0xff]  ;;  %v206_v28 = vld [vmem:[%s3479_s26 + $0x260] sm:$0xff] }
  0x22   : > { %203 = vst [vmem:[%s3484_s27 + $0xd0] sm:$0xff] %v202_v26  ;;  %v208_v29 = vld [vmem:[%s3479_s26 + $0x268] sm:$0xff]  ;;  %205 = vst [vmem:[%s3484_s27 + $0xd8] sm:$0xff] %v204_v27  ;;  %v210_v30 = vld [vmem:[%s3479_s26 + $0x270] sm:$0xff] }
  0x23   : > { %207 = vst [vmem:[%s3484_s27 + $0xe0] sm:$0xff] %v206_v28  ;;  %209 = vst [vmem:[%s3484_s27 + $0xe8] sm:$0xff] %v208_v29  ;;  %v212_v31 = vld [vmem:[%s3479_s26 + $0x278] sm:$0xff]  ;;  %v214_v32 = vld [vmem:[%s3479_s26 + $0x300] sm:$0xff] }
  0x24   : > { %211 = vst [vmem:[%s3484_s27 + $0xf0] sm:$0xff] %v210_v30  ;;  %213 = vst [vmem:[%s3484_s27 + $0xf8] sm:$0xff] %v212_v31  ;;  %v216_v33 = vld [vmem:[%s3479_s26 + $0x308] sm:$0xff]  ;;  %v218_v34 = vld [vmem:[%s3479_s26 + $0x310] sm:$0xff] }
  0x25   : > { %215 = vst [vmem:[%s3484_s27 + $0x100] sm:$0xff] %v214_v32  ;;  %v220_v35 = vld [vmem:[%s3479_s26 + $0x318] sm:$0xff]  ;;  %217 = vst [vmem:[%s3484_s27 + $0x108] sm:$0xff] %v216_v33  ;;  %v222_v36 = vld [vmem:[%s3479_s26 + $0x320] sm:$0xff] }
  0x26   : > { %219 = vst [vmem:[%s3484_s27 + $0x110] sm:$0xff] %v218_v34  ;;  %221 = vst [vmem:[%s3484_s27 + $0x118] sm:$0xff] %v220_v35  ;;  %v224_v37 = vld [vmem:[%s3479_s26 + $0x328] sm:$0xff]  ;;  %v226_v38 = vld [vmem:[%s3479_s26 + $0x330] sm:$0xff] }
  0x27   : > { %223 = vst [vmem:[%s3484_s27 + $0x120] sm:$0xff] %v222_v36  ;;  %225 = vst [vmem:[%s3484_s27 + $0x128] sm:$0xff] %v224_v37  ;;  %v228_v39 = vld [vmem:[%s3479_s26 + $0x338] sm:$0xff]  ;;  %v230_v40 = vld [vmem:[%s3479_s26 + $0x3c0] sm:$0xff] }
  0x28   : > { %227 = vst [vmem:[%s3484_s27 + $0x130] sm:$0xff] %v226_v38  ;;  %v232_v41 = vld [vmem:[%s3479_s26 + $0x3c8] sm:$0xff]  ;;  %229 = vst [vmem:[%s3484_s27 + $0x138] sm:$0xff] %v228_v39  ;;  %v234_v42 = vld [vmem:[%s3479_s26 + $0x3d0] sm:$0xff] }
  0x29   : > { %231 = vst [vmem:[%s3484_s27 + $0x140] sm:$0xff] %v230_v40  ;;  %233 = vst [vmem:[%s3484_s27 + $0x148] sm:$0xff] %v232_v41  ;;  %v236_v43 = vld [vmem:[%s3479_s26 + $0x3d8] sm:$0xff]  ;;  %v238_v44 = vld [vmem:[%s3479_s26 + $0x3e0] sm:$0xff] }
  0x2a   : > { %235 = vst [vmem:[%s3484_s27 + $0x150] sm:$0xff] %v234_v42  ;;  %237 = vst [vmem:[%s3484_s27 + $0x158] sm:$0xff] %v236_v43  ;;  %v240_v45 = vld [vmem:[%s3479_s26 + $0x3e8] sm:$0xff]  ;;  %v242_v46 = vld [vmem:[%s3479_s26 + $0x3f0] sm:$0xff] }
  0x2b   : > { %239 = vst [vmem:[%s3484_s27 + $0x160] sm:$0xff] %v238_v44  ;;  %v244_v47 = vld [vmem:[%s3479_s26 + $0x3f8] sm:$0xff]  ;;  %241 = vst [vmem:[%s3484_s27 + $0x168] sm:$0xff] %v240_v45  ;;  %v246_v48 = vld [vmem:[%s3479_s26 + $0x480] sm:$0xff] }
  0x2c   : > { %243 = vst [vmem:[%s3484_s27 + $0x170] sm:$0xff] %v242_v46  ;;  %245 = vst [vmem:[%s3484_s27 + $0x178] sm:$0xff] %v244_v47  ;;  %v248_v49 = vld [vmem:[%s3479_s26 + $0x488] sm:$0xff]  ;;  %v250_v50 = vld [vmem:[%s3479_s26 + $0x490] sm:$0xff] }
  0x2d   : > { %247 = vst [vmem:[%s3484_s27 + $0x180] sm:$0xff] %v246_v48  ;;  %249 = vst [vmem:[%s3484_s27 + $0x188] sm:$0xff] %v248_v49  ;;  %v252_v51 = vld [vmem:[%s3479_s26 + $0x498] sm:$0xff]  ;;  %v254_v52 = vld [vmem:[%s3479_s26 + $0x4a0] sm:$0xff] }
  0x2e   : > { %251 = vst [vmem:[%s3484_s27 + $0x190] sm:$0xff] %v250_v50  ;;  %v256_v53 = vld [vmem:[%s3479_s26 + $0x4a8] sm:$0xff]  ;;  %253 = vst [vmem:[%s3484_s27 + $0x198] sm:$0xff] %v252_v51  ;;  %v258_v54 = vld [vmem:[%s3479_s26 + $0x4b0] sm:$0xff] }
  0x2f   : > { %255 = vst [vmem:[%s3484_s27 + $0x1a0] sm:$0xff] %v254_v52  ;;  %257 = vst [vmem:[%s3484_s27 + $0x1a8] sm:$0xff] %v256_v53  ;;  %v260_v55 = vld [vmem:[%s3479_s26 + $0x4b8] sm:$0xff]  ;;  %v262_v56 = vld [vmem:[%s3479_s26 + $0x540] sm:$0xff] }
  0x30   : > { %259 = vst [vmem:[%s3484_s27 + $0x1b0] sm:$0xff] %v258_v54  ;;  %261 = vst [vmem:[%s3484_s27 + $0x1b8] sm:$0xff] %v260_v55  ;;  %v264_v57 = vld [vmem:[%s3479_s26 + $0x548] sm:$0xff]  ;;  %v266_v58 = vld [vmem:[%s3479_s26 + $0x550] sm:$0xff] }
  0x31   : > { %263 = vst [vmem:[%s3484_s27 + $0x1c0] sm:$0xff] %v262_v56  ;;  %v268_v59 = vld [vmem:[%s3479_s26 + $0x558] sm:$0xff]  ;;  %265 = vst [vmem:[%s3484_s27 + $0x1c8] sm:$0xff] %v264_v57  ;;  %v270_v60 = vld [vmem:[%s3479_s26 + $0x560] sm:$0xff] }
  0x32   : > { %267 = vst [vmem:[%s3484_s27 + $0x1d0] sm:$0xff] %v266_v58  ;;  %269 = vst [vmem:[%s3484_s27 + $0x1d8] sm:$0xff] %v268_v59  ;;  %v272_v61 = vld [vmem:[%s3479_s26 + $0x568] sm:$0xff]  ;;  %v274_v62 = vld [vmem:[%s3479_s26 + $0x570] sm:$0xff] }
  0x33   : > { %271 = vst [vmem:[%s3484_s27 + $0x1e0] sm:$0xff] %v270_v60  ;;  %273 = vst [vmem:[%s3484_s27 + $0x1e8] sm:$0xff] %v272_v61  ;;  %v276_v63 = vld [vmem:[%s3479_s26 + $0x578] sm:$0xff]  ;;  %v278_v0 = vld [vmem:[%s3479_s26 + $0x600] sm:$0xff] }
  0x34   : > { %275 = vst [vmem:[%s3484_s27 + $0x1f0] sm:$0xff] %v274_v62  ;;  %v280_v1 = vld [vmem:[%s3479_s26 + $0x608] sm:$0xff]  ;;  %277 = vst [vmem:[%s3484_s27 + $0x1f8] sm:$0xff] %v276_v63  ;;  %v282_v2 = vld [vmem:[%s3479_s26 + $0x610] sm:$0xff] }
  0x35   : > { %279 = vst [vmem:[%s3484_s27 + $0x200] sm:$0xff] %v278_v0  ;;  %281 = vst [vmem:[%s3484_s27 + $0x208] sm:$0xff] %v280_v1  ;;  %v284_v3 = vld [vmem:[%s3479_s26 + $0x618] sm:$0xff]  ;;  %v286_v4 = vld [vmem:[%s3479_s26 + $0x620] sm:$0xff] }
  0x36   : > { %283 = vst [vmem:[%s3484_s27 + $0x210] sm:$0xff] %v282_v2  ;;  %285 = vst [vmem:[%s3484_s27 + $0x218] sm:$0xff] %v284_v3  ;;  %v288_v5 = vld [vmem:[%s3479_s26 + $0x628] sm:$0xff]  ;;  %v290_v6 = vld [vmem:[%s3479_s26 + $0x630] sm:$0xff] }
  0x37   : > { %287 = vst [vmem:[%s3484_s27 + $0x220] sm:$0xff] %v286_v4  ;;  %v292_v7 = vld [vmem:[%s3479_s26 + $0x638] sm:$0xff]  ;;  %289 = vst [vmem:[%s3484_s27 + $0x228] sm:$0xff] %v288_v5  ;;  %v294_v8 = vld [vmem:[%s3479_s26 + $0x6c0] sm:$0xff] }
  0x38   : > { %291 = vst [vmem:[%s3484_s27 + $0x230] sm:$0xff] %v290_v6  ;;  %293 = vst [vmem:[%s3484_s27 + $0x238] sm:$0xff] %v292_v7  ;;  %v296_v9 = vld [vmem:[%s3479_s26 + $0x6c8] sm:$0xff]  ;;  %v298_v10 = vld [vmem:[%s3479_s26 + $0x6d0] sm:$0xff] }
  0x39   : > { %295 = vst [vmem:[%s3484_s27 + $0x240] sm:$0xff] %v294_v8  ;;  %297 = vst [vmem:[%s3484_s27 + $0x248] sm:$0xff] %v296_v9  ;;  %v300_v11 = vld [vmem:[%s3479_s26 + $0x6d8] sm:$0xff]  ;;  %v302_v12 = vld [vmem:[%s3479_s26 + $0x6e0] sm:$0xff] }
  0x3a   : > { %299 = vst [vmem:[%s3484_s27 + $0x250] sm:$0xff] %v298_v10  ;;  %v304_v13 = vld [vmem:[%s3479_s26 + $0x6e8] sm:$0xff]  ;;  %301 = vst [vmem:[%s3484_s27 + $0x258] sm:$0xff] %v300_v11  ;;  %v306_v14 = vld [vmem:[%s3479_s26 + $0x6f0] sm:$0xff] }
  0x3b   : > { %303 = vst [vmem:[%s3484_s27 + $0x260] sm:$0xff] %v302_v12  ;;  %305 = vst [vmem:[%s3484_s27 + $0x268] sm:$0xff] %v304_v13  ;;  %v308_v15 = vld [vmem:[%s3479_s26 + $0x6f8] sm:$0xff]  ;;  %v310_v16 = vld [vmem:[%s3479_s26 + $0x780] sm:$0xff] }
  0x3c   : > { %307 = vst [vmem:[%s3484_s27 + $0x270] sm:$0xff] %v306_v14  ;;  %309 = vst [vmem:[%s3484_s27 + $0x278] sm:$0xff] %v308_v15  ;;  %v312_v17 = vld [vmem:[%s3479_s26 + $0x788] sm:$0xff]  ;;  %v314_v18 = vld [vmem:[%s3479_s26 + $0x790] sm:$0xff] }
  0x3d   : > { %311 = vst [vmem:[%s3484_s27 + $0x280] sm:$0xff] %v310_v16  ;;  %v316_v19 = vld [vmem:[%s3479_s26 + $0x798] sm:$0xff]  ;;  %313 = vst [vmem:[%s3484_s27 + $0x288] sm:$0xff] %v312_v17  ;;  %v318_v20 = vld [vmem:[%s3479_s26 + $0x7a0] sm:$0xff] }
  0x3e   : > { %315 = vst [vmem:[%s3484_s27 + $0x290] sm:$0xff] %v314_v18  ;;  %317 = vst [vmem:[%s3484_s27 + $0x298] sm:$0xff] %v316_v19  ;;  %v320_v21 = vld [vmem:[%s3479_s26 + $0x7a8] sm:$0xff]  ;;  %v322_v22 = vld [vmem:[%s3479_s26 + $0x7b0] sm:$0xff] }
  0x3f   : > { %319 = vst [vmem:[%s3484_s27 + $0x2a0] sm:$0xff] %v318_v20  ;;  %321 = vst [vmem:[%s3484_s27 + $0x2a8] sm:$0xff] %v320_v21  ;;  %v324_v23 = vld [vmem:[%s3479_s26 + $0x7b8] sm:$0xff]  ;;  %v326_v24 = vld [vmem:[%s3479_s26 + $0x840] sm:$0xff] }
  0x40   : > { %323 = vst [vmem:[%s3484_s27 + $0x2b0] sm:$0xff] %v322_v22  ;;  %v328_v25 = vld [vmem:[%s3479_s26 + $0x848] sm:$0xff]  ;;  %325 = vst [vmem:[%s3484_s27 + $0x2b8] sm:$0xff] %v324_v23  ;;  %v330_v26 = vld [vmem:[%s3479_s26 + $0x850] sm:$0xff] }
  0x41   : > { %327 = vst [vmem:[%s3484_s27 + $0x2c0] sm:$0xff] %v326_v24  ;;  %329 = vst [vmem:[%s3484_s27 + $0x2c8] sm:$0xff] %v328_v25  ;;  %v332_v27 = vld [vmem:[%s3479_s26 + $0x858] sm:$0xff]  ;;  %v334_v28 = vld [vmem:[%s3479_s26 + $0x860] sm:$0xff] }
  0x42   : > { %331 = vst [vmem:[%s3484_s27 + $0x2d0] sm:$0xff] %v330_v26  ;;  %333 = vst [vmem:[%s3484_s27 + $0x2d8] sm:$0xff] %v332_v27  ;;  %v336_v29 = vld [vmem:[%s3479_s26 + $0x868] sm:$0xff]  ;;  %v338_v30 = vld [vmem:[%s3479_s26 + $0x870] sm:$0xff] }
  0x43   : > { %335 = vst [vmem:[%s3484_s27 + $0x2e0] sm:$0xff] %v334_v28  ;;  %v340_v31 = vld [vmem:[%s3479_s26 + $0x878] sm:$0xff]  ;;  %337 = vst [vmem:[%s3484_s27 + $0x2e8] sm:$0xff] %v336_v29  ;;  %v342_v32 = vld [vmem:[%s3479_s26 + $0x900] sm:$0xff] }
  0x44   : > { %339 = vst [vmem:[%s3484_s27 + $0x2f0] sm:$0xff] %v338_v30  ;;  %341 = vst [vmem:[%s3484_s27 + $0x2f8] sm:$0xff] %v340_v31  ;;  %v344_v33 = vld [vmem:[%s3479_s26 + $0x908] sm:$0xff]  ;;  %v346_v34 = vld [vmem:[%s3479_s26 + $0x910] sm:$0xff] }
  0x45   : > { %343 = vst [vmem:[%s3484_s27 + $0x300] sm:$0xff] %v342_v32  ;;  %345 = vst [vmem:[%s3484_s27 + $0x308] sm:$0xff] %v344_v33  ;;  %v348_v35 = vld [vmem:[%s3479_s26 + $0x918] sm:$0xff]  ;;  %v350_v36 = vld [vmem:[%s3479_s26 + $0x920] sm:$0xff] }
  0x46   : > { %347 = vst [vmem:[%s3484_s27 + $0x310] sm:$0xff] %v346_v34  ;;  %v352_v37 = vld [vmem:[%s3479_s26 + $0x928] sm:$0xff]  ;;  %349 = vst [vmem:[%s3484_s27 + $0x318] sm:$0xff] %v348_v35  ;;  %v354_v38 = vld [vmem:[%s3479_s26 + $0x930] sm:$0xff] }
  0x47   : > { %351 = vst [vmem:[%s3484_s27 + $0x320] sm:$0xff] %v350_v36  ;;  %353 = vst [vmem:[%s3484_s27 + $0x328] sm:$0xff] %v352_v37  ;;  %v356_v39 = vld [vmem:[%s3479_s26 + $0x938] sm:$0xff]  ;;  %v358_v40 = vld [vmem:[%s3479_s26 + $0x9c0] sm:$0xff] }
  0x48   : > { %355 = vst [vmem:[%s3484_s27 + $0x330] sm:$0xff] %v354_v38  ;;  %357 = vst [vmem:[%s3484_s27 + $0x338] sm:$0xff] %v356_v39  ;;  %v360_v41 = vld [vmem:[%s3479_s26 + $0x9c8] sm:$0xff]  ;;  %v362_v42 = vld [vmem:[%s3479_s26 + $0x9d0] sm:$0xff] }
  0x49   : > { %359 = vst [vmem:[%s3484_s27 + $0x340] sm:$0xff] %v358_v40  ;;  %v364_v43 = vld [vmem:[%s3479_s26 + $0x9d8] sm:$0xff]  ;;  %361 = vst [vmem:[%s3484_s27 + $0x348] sm:$0xff] %v360_v41  ;;  %v366_v44 = vld [vmem:[%s3479_s26 + $0x9e0] sm:$0xff] }
  0x4a   : > { %363 = vst [vmem:[%s3484_s27 + $0x350] sm:$0xff] %v362_v42  ;;  %365 = vst [vmem:[%s3484_s27 + $0x358] sm:$0xff] %v364_v43  ;;  %v368_v45 = vld [vmem:[%s3479_s26 + $0x9e8] sm:$0xff]  ;;  %v370_v46 = vld [vmem:[%s3479_s26 + $0x9f0] sm:$0xff] }
  0x4b   : > { %367 = vst [vmem:[%s3484_s27 + $0x360] sm:$0xff] %v366_v44  ;;  %369 = vst [vmem:[%s3484_s27 + $0x368] sm:$0xff] %v368_v45  ;;  %v372_v47 = vld [vmem:[%s3479_s26 + $0x9f8] sm:$0xff]  ;;  %v374_v48 = vld [vmem:[%s3479_s26 + $0xa80] sm:$0xff] }
  0x4c   : > { %371 = vst [vmem:[%s3484_s27 + $0x370] sm:$0xff] %v370_v46  ;;  %v376_v49 = vld [vmem:[%s3479_s26 + $0xa88] sm:$0xff]  ;;  %373 = vst [vmem:[%s3484_s27 + $0x378] sm:$0xff] %v372_v47  ;;  %v378_v50 = vld [vmem:[%s3479_s26 + $0xa90] sm:$0xff] }
  0x4d   : > { %375 = vst [vmem:[%s3484_s27 + $0x380] sm:$0xff] %v374_v48  ;;  %377 = vst [vmem:[%s3484_s27 + $0x388] sm:$0xff] %v376_v49  ;;  %v380_v51 = vld [vmem:[%s3479_s26 + $0xa98] sm:$0xff]  ;;  %v382_v52 = vld [vmem:[%s3479_s26 + $0xaa0] sm:$0xff] }
  0x4e   : > { %379 = vst [vmem:[%s3484_s27 + $0x390] sm:$0xff] %v378_v50  ;;  %381 = vst [vmem:[%s3484_s27 + $0x398] sm:$0xff] %v380_v51  ;;  %v384_v53 = vld [vmem:[%s3479_s26 + $0xaa8] sm:$0xff]  ;;  %v386_v54 = vld [vmem:[%s3479_s26 + $0xab0] sm:$0xff] }
  0x4f   : > { %383 = vst [vmem:[%s3484_s27 + $0x3a0] sm:$0xff] %v382_v52  ;;  %v388_v55 = vld [vmem:[%s3479_s26 + $0xab8] sm:$0xff]  ;;  %385 = vst [vmem:[%s3484_s27 + $0x3a8] sm:$0xff] %v384_v53  ;;  %v390_v56 = vld [vmem:[%s3479_s26 + $0xb40] sm:$0xff] }
  0x50   : > { %387 = vst [vmem:[%s3484_s27 + $0x3b0] sm:$0xff] %v386_v54  ;;  %389 = vst [vmem:[%s3484_s27 + $0x3b8] sm:$0xff] %v388_v55  ;;  %v392_v57 = vld [vmem:[%s3479_s26 + $0xb48] sm:$0xff]  ;;  %v394_v58 = vld [vmem:[%s3479_s26 + $0xb50] sm:$0xff] }
  0x51   : > { %391 = vst [vmem:[%s3484_s27 + $0x3c0] sm:$0xff] %v390_v56  ;;  %393 = vst [vmem:[%s3484_s27 + $0x3c8] sm:$0xff] %v392_v57  ;;  %v396_v59 = vld [vmem:[%s3479_s26 + $0xb58] sm:$0xff]  ;;  %v398_v60 = vld [vmem:[%s3479_s26 + $0xb60] sm:$0xff] }
  0x52   : > { %395 = vst [vmem:[%s3484_s27 + $0x3d0] sm:$0xff] %v394_v58  ;;  %v400_v61 = vld [vmem:[%s3479_s26 + $0xb68] sm:$0xff]  ;;  %397 = vst [vmem:[%s3484_s27 + $0x3d8] sm:$0xff] %v396_v59  ;;  %v402_v62 = vld [vmem:[%s3479_s26 + $0xb70] sm:$0xff] }
  0x53   : > { %399 = vst [vmem:[%s3484_s27 + $0x3e0] sm:$0xff] %v398_v60  ;;  %401 = vst [vmem:[%s3484_s27 + $0x3e8] sm:$0xff] %v400_v61  ;;  %v404_v63 = vld [vmem:[%s3479_s26 + $0xb78] sm:$0xff] }
  0x54   : > { %403 = vst [vmem:[%s3484_s27 + $0x3f0] sm:$0xff] %v402_v62  ;;  %405 = vst [vmem:[%s3484_s27 + $0x3f8] sm:$0xff] %v404_v63 }
  0x55 PF: > { %p3068_p7 = scmp.ge.s32.totalorder %s3416_s14, 1  ;;  %p410_p8 = scmp.lt.s32.totalorder %s3416_s14, 4 }
  0x57   : > { %p411_p9 = pnand %p3068_p7, %p410_p8 }
  0x59   : > { %414 = sbr.rel (%p411_p9) target bundleno = 477 (0x1dd), region = 51 }
  0x60   : > { %s417_s28 = sand.u32 1, %s3408_s12   ;;  %v3418_v0 = vmov 0   ;;  %v444_v1 = vld [vmem:[%s4576_s2] sm:$0xff]  ;;  %v445_v21 = vld [vmem:[%s4576_s2 + $0x8] sm:$0xff]  ;;  %vm653_vm0 = vcmask 261120   ;;  %s3366_s12 = sshll.u32 (%p3469_p5), %s3061_s15, 6 }
  0x61   : > { %s3069_s29 = sshll.u32 %s417_s28, 10  ;;  %689 = vmatprep.mubr.bf16.mxu0 %v3418_v0  ;;  %732 = vmatprep.mubr.bf16.mxu1 %v3418_v0  ;;  %v3772_v27 = vld [vmem:[%s4575_s1] sm:$0xff]   ;;  %s4406_s10 = sshll.u32 %s417_s28, 7 }
  0x62   : > { %3392 = vset.pattern.permute.xlu0 %v3418_v0  ;;  %s3750_s5 = scalar_lea.vmem [#allocation2], %s3069_s29  ;;  %s4432_s11 = scalar_lea.vmem [#allocation3], %s4406_s10 }
  0x63   : > { %v446_v2 = vld [vmem:[%s3750_s5] sm:$0xff]  ;;  %v447_v4 = vld [vmem:[%s3750_s5 + $0x8] sm:$0xff]  ;;  %480 = vperm.xlu0 %3392, %v444_v1   ;;  %v448_v15 = vld [vmem:[%s3750_s5 + $0x10] sm:$0xff]  ;;  %s2957_s20 = scalar_lea.vmem (%p3469_p5), %s4577_s3, %s3366_s12 }
  0x64   : > { %v454_v3 = vld [vmem:[%s3750_s5 + $0x40] sm:$0xff]  ;;  %v455_v6 = vld [vmem:[%s3750_s5 + $0x48] sm:$0xff]  ;;  %v456_v17 = vld [vmem:[%s3750_s5 + $0x50] sm:$0xff] }
  0x65   : > { %v3073_v5 = vcombine.high %v446_v2, %v454_v3  ;;  %v3072_v7 = vcombine.low %v446_v2, %v454_v3  ;;  %v462_v8 = vld [vmem:[%s3750_s5 + $0x80] sm:$0xff]  ;;  %v3075_v10 = vcombine.high %v447_v4, %v455_v6  ;;  %v3074_v11 = vcombine.low %v447_v4, %v455_v6  ;;  %v463_v13 = vld [vmem:[%s3750_s5 + $0x88] sm:$0xff]  ;;  %v449_v18 = vld [vmem:[%s3750_s5 + $0x18] sm:$0xff] }
  0x66   : > { %v470_v9 = vld [vmem:[%s3750_s5 + $0xc0] sm:$0xff]  ;;  %v471_v14 = vld [vmem:[%s3750_s5 + $0xc8] sm:$0xff]  ;;  %v457_v19 = vld [vmem:[%s3750_s5 + $0x58] sm:$0xff]  ;;  %v3077_v23 = vcombine.high %v448_v15, %v456_v17  ;;  %v3076_v30 = vcombine.low %v448_v15, %v456_v17 }
  0x67   : > { %v3089_v12 = vcombine.high %v462_v8, %v470_v9  ;;  %657 = vmatprep.subr.bf16.mxu0 %v3073_v5  ;;  %v3091_v16 = vcombine.high %v463_v13, %v471_v14  ;;  %700 = vmatprep.subr.bf16.mxu1 %v3075_v10  ;;  %v3088_v20 = vcombine.low %v462_v8, %v470_v9  ;;  %v464_v25 = vld [vmem:[%s3750_s5 + $0x90] sm:$0xff]  ;;  %v465_v28 = vld [vmem:[%s3750_s5 + $0x98] sm:$0xff]  ;;  %v450_v34 = vld [vmem:[%s3750_s5 + $0x20] sm:$0xff] }
  0x68   : > { %658 = vmatpush1.bf16.msra.mxu0 %v3072_v7  ;;  %701 = vmatpush1.bf16.msra.mxu1 %v3074_v11  ;;  %v3090_v22 = vcombine.low %v463_v13, %v471_v14  ;;  %v3079_v24 = vcombine.high %v449_v18, %v457_v19  ;;  %v472_v26 = vld [vmem:[%s3750_s5 + $0xd0] sm:$0xff]  ;;  %v473_v29 = vld [vmem:[%s3750_s5 + $0xd8] sm:$0xff]  ;;  %v3078_v31 = vcombine.low %v449_v18, %v457_v19  ;;  %v458_v35 = vld [vmem:[%s3750_s5 + $0x60] sm:$0xff] }
  0x69   : > { %659 = vmatprep.subr.bf16.mxu0 %v3089_v12  ;;  %702 = vmatprep.subr.bf16.mxu1 %v3091_v16  ;;  %v3093_v32 = vcombine.high %v464_v25, %v472_v26  ;;  %v3095_v33 = vcombine.high %v465_v28, %v473_v29  ;;  %v451_v36 = vld [vmem:[%s3750_s5 + $0x28] sm:$0xff]  ;;  %v3092_v38 = vcombine.low %v464_v25, %v472_v26  ;;  %v466_v42 = vld [vmem:[%s3750_s5 + $0xa0] sm:$0xff]  ;;  %v452_v50 = vld [vmem:[%s3750_s5 + $0x30] sm:$0xff] }
  0x6a   : > { %485 = vperm.xlu0 %3392, %v445_v21   ;;  %v459_v37 = vld [vmem:[%s3750_s5 + $0x68] sm:$0xff]  ;;  %v3094_v39 = vcombine.low %v465_v28, %v473_v29  ;;  %v3081_v40 = vcombine.high %v450_v34, %v458_v35  ;;  %v474_v43 = vld [vmem:[%s3750_s5 + $0xe0] sm:$0xff]  ;;  %v3080_v46 = vcombine.low %v450_v34, %v458_v35  ;;  %v460_v51 = vld [vmem:[%s3750_s5 + $0x70] sm:$0xff] }
  0x6b   : > { %v3083_v41 = vcombine.high %v451_v36, %v459_v37  ;;  %v467_v44 = vld [vmem:[%s3750_s5 + $0xa8] sm:$0xff]  ;;  %v3082_v47 = vcombine.low %v451_v36, %v459_v37  ;;  %v3097_v48 = vcombine.high %v466_v42, %v474_v43  ;;  %v453_v52 = vld [vmem:[%s3750_s5 + $0x38] sm:$0xff]  ;;  %v3096_v54 = vcombine.low %v466_v42, %v474_v43  ;;  %v468_v58 = vld [vmem:[%s3750_s5 + $0xb0] sm:$0xff] }
  0x6c   : > { %660 = vmatpush1.bf16.msra.mxu0 %v3088_v20  ;;  %703 = vmatpush1.bf16.msra.mxu1 %v3090_v22  ;;  %v475_v45 = vld [vmem:[%s3750_s5 + $0xe8] sm:$0xff]  ;;  %v461_v53 = vld [vmem:[%s3750_s5 + $0x78] sm:$0xff]  ;;  %v3085_v56 = vcombine.high %v452_v50, %v460_v51  ;;  %v476_v59 = vld [vmem:[%s3750_s5 + $0xf0] sm:$0xff]  ;;  %v3084_v62 = vcombine.low %v452_v50, %v460_v51 }
  0x6d   : > { %743 = vmatprep.subr.bf16.mxu0 %v3077_v23  ;;  %786 = vmatprep.subr.bf16.mxu1 %v3079_v24  ;;  %v3099_v49 = vcombine.high %v467_v44, %v475_v45  ;;  %v3098_v55 = vcombine.low %v467_v44, %v475_v45  ;;  %v3087_v57 = vcombine.high %v453_v52, %v461_v53  ;;  %v469_v60 = vld [vmem:[%s3750_s5 + $0xb8] sm:$0xff]  ;;  %v3112_v3 = vld [vmem:[%s3750_s5 + $0x100] sm:$0xff]  ;;  %v3113_v5 = vld [vmem:[%s3750_s5 + $0x108] sm:$0xff] }
  0x6e   : > { %v477_v61 = vld [vmem:[%s3750_s5 + $0xf8] sm:$0xff]  ;;  %v3086_v63 = vcombine.low %v453_v52, %v461_v53  ;;  %v3101_v1 = vcombine.high %v468_v58, %v476_v59  ;;  %v3120_v4 = vld [vmem:[%s3750_s5 + $0x140] sm:$0xff]  ;;  %v3121_v6 = vld [vmem:[%s3750_s5 + $0x148] sm:$0xff]  ;;  %v3100_v7 = vcombine.low %v468_v58, %v476_v59 }
  0x6f   : > { %3104 = vmatmul.mubr.msk.bf16.vlgmr.msra.gmra.mrb[0].mxu0 %vm653_vm0, %v3772_v27  ;;  %3105 = vmatmul.mubr.msk.bf16.vlgmr.msra.gmra.mrb[0].mxu1 %vm653_vm0, %v3772_v27  ;;  %v3103_v2 = vcombine.high %v469_v60, %v477_v61  ;;  %v3102_v8 = vcombine.low %v469_v60, %v477_v61  ;;  %v3145_v9 = vcombine.high %v3112_v3, %v3120_v4  ;;  %v3128_v11 = vld [vmem:[%s3750_s5 + $0x180] sm:$0xff]  ;;  %v3129_v13 = vld [vmem:[%s3750_s5 + $0x188] sm:$0xff]  ;;  %v3114_v19 = vld [vmem:[%s3750_s5 + $0x110] sm:$0xff] }
  0x70   : > { %744 = vmatpush1.bf16.msra.mxu0 %v3076_v30  ;;  %787 = vmatpush1.bf16.msra.mxu1 %v3078_v31  ;;  %v3147_v10 = vcombine.high %v3113_v5, %v3121_v6  ;;  %v3136_v12 = vld [vmem:[%s3750_s5 + $0x1c0] sm:$0xff]  ;;  %v3137_v14 = vld [vmem:[%s3750_s5 + $0x1c8] sm:$0xff]  ;;  %v3144_v15 = vcombine.low %v3112_v3, %v3120_v4  ;;  %v3146_v16 = vcombine.low %v3113_v5, %v3121_v6  ;;  %v3122_v20 = vld [vmem:[%s3750_s5 + $0x150] sm:$0xff] }
  0x71   : > { %745 = vmatprep.subr.bf16.mxu0 %v3093_v32  ;;  %788 = vmatprep.subr.bf16.mxu1 %v3095_v33  ;;  %v3161_v17 = vcombine.high %v3128_v11, %v3136_v12  ;;  %v3163_v18 = vcombine.high %v3129_v13, %v3137_v14  ;;  %v3115_v21 = vld [vmem:[%s3750_s5 + $0x118] sm:$0xff]  ;;  %v3160_v23 = vcombine.low %v3128_v11, %v3136_v12  ;;  %v3130_v28 = vld [vmem:[%s3750_s5 + $0x190] sm:$0xff]  ;;  %v3116_v36 = vld [vmem:[%s3750_s5 + $0x120] sm:$0xff] }
  0x72   : > { %775 = vmatprep.mubr.bf16.mxu0 %v3418_v0  ;;  %818 = vmatprep.mubr.bf16.mxu1 %v3418_v0  ;;  %v3123_v22 = vld [vmem:[%s3750_s5 + $0x158] sm:$0xff]  ;;  %v3162_v24 = vcombine.low %v3129_v13, %v3137_v14  ;;  %v3149_v25 = vcombine.high %v3114_v19, %v3122_v20  ;;  %v3138_v29 = vld [vmem:[%s3750_s5 + $0x1d0] sm:$0xff]  ;;  %v3148_v32 = vcombine.low %v3114_v19, %v3122_v20  ;;  %v3124_v37 = vld [vmem:[%s3750_s5 + $0x160] sm:$0xff] }
  0x73   : > { %v3151_v26 = vcombine.high %v3115_v21, %v3123_v22  ;;  %v3131_v30 = vld [vmem:[%s3750_s5 + $0x198] sm:$0xff]  ;;  %v3150_v33 = vcombine.low %v3115_v21, %v3123_v22  ;;  %v3165_v34 = vcombine.high %v3130_v28, %v3138_v29  ;;  %v3153_v42 = vcombine.high %v3116_v36, %v3124_v37  ;;  %v3132_v44 = vld [vmem:[%s3750_s5 + $0x1a0] sm:$0xff]  ;;  %v3118_v52 = vld [vmem:[%s3750_s5 + $0x130] sm:$0xff] }
  0x74   : > { %746 = vmatpush1.bf16.msra.mxu0 %v3092_v38  ;;  %789 = vmatpush1.bf16.msra.mxu1 %v3094_v39  ;;  %v3139_v31 = vld [vmem:[%s3750_s5 + $0x1d8] sm:$0xff]  ;;  %v3117_v38 = vld [vmem:[%s3750_s5 + $0x128] sm:$0xff]  ;;  %v3140_v45 = vld [vmem:[%s3750_s5 + $0x1e0] sm:$0xff] }
  0x75   : > { %829 = vmatprep.subr.bf16.mxu0 %v3081_v40  ;;  %872 = vmatprep.subr.bf16.mxu1 %v3083_v41  ;;  %v3167_v35 = vcombine.high %v3131_v30, %v3139_v31  ;;  %v3125_v39 = vld [vmem:[%s3750_s5 + $0x168] sm:$0xff]  ;;  %v3164_v40 = vcombine.low %v3130_v28, %v3138_v29  ;;  %v3166_v41 = vcombine.low %v3131_v30, %v3139_v31  ;;  %v3126_v53 = vld [vmem:[%s3750_s5 + $0x170] sm:$0xff]  ;;  %v3184_v5 = vld [vmem:[%s3750_s5 + $0x200] sm:$0xff] }
  0x76   : > { %v3155_v43 = vcombine.high %v3117_v38, %v3125_v39  ;;  %v3169_v50 = vcombine.high %v3132_v44, %v3140_v45  ;;  %v3157_v58 = vcombine.high %v3118_v52, %v3126_v53  ;;  %v3134_v60 = vld [vmem:[%s3750_s5 + $0x1b0] sm:$0xff]  ;;  %v3192_v6 = vld [vmem:[%s3750_s5 + $0x240] sm:$0xff] }
  0x77   : > { %3106 = vmatmul.mubr.msk.bf16.vlgmr.msra.gmra.mrb[4].mxu0 %vm653_vm0, %v3772_v27  ;;  %3107 = vmatmul.mubr.msk.bf16.vlgmr.msra.gmra.mrb[4].mxu1 %vm653_vm0, %v3772_v27  ;;  %v3142_v61 = vld [vmem:[%s3750_s5 + $0x1f0] sm:$0xff]  ;;  %v3217_v11 = vcombine.high %v3184_v5, %v3192_v6  ;;  %v3200_v13 = vld [vmem:[%s3750_s5 + $0x280] sm:$0xff] }
  0x78   : > { %830 = vmatpush1.bf16.msra.mxu0 %v3080_v46  ;;  %873 = vmatpush1.bf16.msra.mxu1 %v3082_v47  ;;  %v3133_v46 = vld [vmem:[%s3750_s5 + $0x1a8] sm:$0xff]  ;;  %v3173_v3 = vcombine.high %v3134_v60, %v3142_v61  ;;  %v3208_v14 = vld [vmem:[%s3750_s5 + $0x2c0] sm:$0xff]  ;;  %v3186_v21 = vld [vmem:[%s3750_s5 + $0x210] sm:$0xff] }
  0x79   : > { %831 = vmatprep.subr.bf16.mxu0 %v3097_v48  ;;  %874 = vmatprep.subr.bf16.mxu1 %v3099_v49  ;;  %v3141_v47 = vld [vmem:[%s3750_s5 + $0x1e8] sm:$0xff]  ;;  %v3152_v48 = vcombine.low %v3116_v36, %v3124_v37  ;;  %v3154_v49 = vcombine.low %v3117_v38, %v3125_v39  ;;  %v3233_v19 = vcombine.high %v3200_v13, %v3208_v14  ;;  %v3194_v22 = vld [vmem:[%s3750_s5 + $0x250] sm:$0xff]  ;;  %v3188_v38 = vld [vmem:[%s3750_s5 + $0x220] sm:$0xff] }
  0x7a   : > { %861 = vmatprep.mubr.bf16.mxu0 %v3418_v0  ;;  %904 = vmatprep.mubr.bf16.mxu1 %v3418_v0  ;;  %v3171_v51 = vcombine.high %v3133_v46, %v3141_v47  ;;  %v3221_v28 = vcombine.high %v3186_v21, %v3194_v22  ;;  %v3202_v30 = vld [vmem:[%s3750_s5 + $0x290] sm:$0xff]  ;;  %v3196_v39 = vld [vmem:[%s3750_s5 + $0x260] sm:$0xff] }
  0x7b   : > { %v3210_v31 = vld [vmem:[%s3750_s5 + $0x2d0] sm:$0xff] }
  0x7c   : > { %832 = vmatpush1.bf16.msra.mxu0 %v3096_v54  ;;  %875 = vmatpush1.bf16.msra.mxu1 %v3098_v55  ;;  %v3119_v54 = vld [vmem:[%s3750_s5 + $0x138] sm:$0xff]  ;;  %v3237_v36 = vcombine.high %v3202_v30, %v3210_v31 }
  0x7d   : > { %915 = vmatprep.subr.bf16.mxu0 %v3085_v56  ;;  %958 = vmatprep.subr.bf16.mxu1 %v3087_v57  ;;  %v3127_v55 = vld [vmem:[%s3750_s5 + $0x178] sm:$0xff]  ;;  %v3168_v56 = vcombine.low %v3132_v44, %v3140_v45  ;;  %v3170_v57 = vcombine.low %v3133_v46, %v3141_v47  ;;  %v3225_v44 = vcombine.high %v3188_v38, %v3196_v39  ;;  %v3204_v46 = vld [vmem:[%s3750_s5 + $0x2a0] sm:$0xff] }
  0x7e   : > { %v3159_v59 = vcombine.high %v3119_v54, %v3127_v55  ;;  %v3212_v47 = vld [vmem:[%s3750_s5 + $0x2e0] sm:$0xff] }
  0x7f   : > { %3108 = vmatmul.mubr.msk.bf16.vlgmr.msra.gmra.mrb[8].mxu0 %vm653_vm0, %v3772_v27  ;;  %3109 = vmatmul.mubr.msk.bf16.vlgmr.msra.gmra.mrb[8].mxu1 %vm653_vm0, %v3772_v27 }
  0x80   : > { %916 = vmatpush1.bf16.msra.mxu0 %v3084_v62  ;;  %959 = vmatpush1.bf16.msra.mxu1 %v3086_v63  ;;  %v3135_v62 = vld [vmem:[%s3750_s5 + $0x1b8] sm:$0xff] }
  0x81   : > { %917 = vmatprep.subr.bf16.mxu0 %v3101_v1  ;;  %960 = vmatprep.subr.bf16.mxu1 %v3103_v2  ;;  %v3143_v63 = vld [vmem:[%s3750_s5 + $0x1f8] sm:$0xff]  ;;  %v3156_v1 = vcombine.low %v3118_v52, %v3126_v53  ;;  %v3158_v2 = vcombine.low %v3119_v54, %v3127_v55  ;;  %v3241_v52 = vcombine.high %v3204_v46, %v3212_v47  ;;  %v3190_v54 = vld [vmem:[%s3750_s5 + $0x230] sm:$0xff] }
  0x82   : > { %947 = vmatprep.mubr.bf16.mxu0 %v3418_v0  ;;  %990 = vmatprep.mubr.bf16.mxu1 %v3418_v0  ;;  %v3175_v4 = vcombine.high %v3135_v62, %v3143_v63  ;;  %v3198_v55 = vld [vmem:[%s3750_s5 + $0x270] sm:$0xff] }
  0x84   : > { %918 = vmatpush1.bf16.msra.mxu0 %v3100_v7  ;;  %961 = vmatpush1.bf16.msra.mxu1 %v3102_v8  ;;  %v3185_v7 = vld [vmem:[%s3750_s5 + $0x208] sm:$0xff] }
  0x85   : > { %1226 = vmatprep.subr.bf16.mxu0 %v3145_v9  ;;  %1269 = vmatprep.subr.bf16.mxu1 %v3147_v10  ;;  %v3193_v8 = vld [vmem:[%s3750_s5 + $0x248] sm:$0xff]  ;;  %v3172_v9 = vcombine.low %v3134_v60, %v3142_v61  ;;  %v3174_v10 = vcombine.low %v3135_v62, %v3143_v63  ;;  %v3229_v60 = vcombine.high %v3190_v54, %v3198_v55  ;;  %v3206_v62 = vld [vmem:[%s3750_s5 + $0x2b0] sm:$0xff] }
  0x86   : > { %v3219_v12 = vcombine.high %v3185_v7, %v3193_v8  ;;  %v3214_v63 = vld [vmem:[%s3750_s5 + $0x2f0] sm:$0xff] }
  0x87   : > { %3110 = vmatmul.mubr.msk.bf16.vlgmr.msra.gmra.mrb[12].mxu0 %vm653_vm0, %v3772_v27  ;;  %3111 = vmatmul.mubr.msk.bf16.vlgmr.msra.gmra.mrb[12].mxu1 %vm653_vm0, %v3772_v27 }
  0x88   : > { %1227 = vmatpush1.bf16.msra.mxu0 %v3144_v15  ;;  %1270 = vmatpush1.bf16.msra.mxu1 %v3146_v16  ;;  %v3201_v15 = vld [vmem:[%s3750_s5 + $0x288] sm:$0xff] }
  0x89   : > { %1228 = vmatprep.subr.bf16.mxu0 %v3161_v17  ;;  %1271 = vmatprep.subr.bf16.mxu1 %v3163_v18  ;;  %v3209_v16 = vld [vmem:[%s3750_s5 + $0x2c8] sm:$0xff]  ;;  %v3216_v17 = vcombine.low %v3184_v5, %v3192_v6  ;;  %v3218_v18 = vcombine.low %v3185_v7, %v3193_v8  ;;  %v3245_v5 = vcombine.high %v3206_v62, %v3214_v63  ;;  %v3256_v7 = vld [vmem:[%s3750_s5 + $0x300] sm:$0xff] }
  0x8a   : > { %1258 = vmatprep.mubr.bf16.mxu0 %v3418_v0  ;;  %1301 = vmatprep.mubr.bf16.mxu1 %v3418_v0  ;;  %v3235_v20 = vcombine.high %v3201_v15, %v3209_v16  ;;  %v3264_v8 = vld [vmem:[%s3750_s5 + $0x340] sm:$0xff] }
  0x8c   : > { %1229 = vmatpush1.bf16.msra.mxu0 %v3160_v23  ;;  %1272 = vmatpush1.bf16.msra.mxu1 %v3162_v24  ;;  %v3187_v23 = vld [vmem:[%s3750_s5 + $0x218] sm:$0xff] }
  0x8d   : > { %1312 = vmatprep.subr.bf16.mxu0 %v3149_v25  ;;  %1355 = vmatprep.subr.bf16.mxu1 %v3151_v26  ;;  %v3195_v24 = vld [vmem:[%s3750_s5 + $0x258] sm:$0xff]  ;;  %v3232_v25 = vcombine.low %v3200_v13, %v3208_v14  ;;  %v3234_v26 = vcombine.low %v3201_v15, %v3209_v16  ;;  %v3289_v13 = vcombine.high %v3256_v7, %v3264_v8  ;;  %v3272_v15 = vld [vmem:[%s3750_s5 + $0x380] sm:$0xff] }
  0x8e   : > { %v3223_v29 = vcombine.high %v3187_v23, %v3195_v24  ;;  %v3280_v16 = vld [vmem:[%s3750_s5 + $0x3c0] sm:$0xff] }
  0x8f   : > { %3176 = vmatmul.mubr.msk.bf16.vlgmr.msra.gmra.mrb[16].mxu0 %vm653_vm0, %v3772_v27  ;;  %3177 = vmatmul.mubr.msk.bf16.vlgmr.msra.gmra.mrb[16].mxu1 %vm653_vm0, %v3772_v27 }
  0x90   : > { %1313 = vmatpush1.bf16.msra.mxu0 %v3148_v32  ;;  %1356 = vmatpush1.bf16.msra.mxu1 %v3150_v33  ;;  %v3203_v32 = vld [vmem:[%s3750_s5 + $0x298] sm:$0xff] }
  0x91   : > { %1314 = vmatprep.subr.bf16.mxu0 %v3165_v34  ;;  %1357 = vmatprep.subr.bf16.mxu1 %v3167_v35  ;;  %v3211_v33 = vld [vmem:[%s3750_s5 + $0x2d8] sm:$0xff]  ;;  %v3220_v34 = vcombine.low %v3186_v21, %v3194_v22  ;;  %v3222_v35 = vcombine.low %v3187_v23, %v3195_v24  ;;  %v3305_v21 = vcombine.high %v3272_v15, %v3280_v16  ;;  %v3258_v23 = vld [vmem:[%s3750_s5 + $0x310] sm:$0xff] }
  0x92   : > { %1344 = vmatprep.mubr.bf16.mxu0 %v3418_v0  ;;  %1387 = vmatprep.mubr.bf16.mxu1 %v3418_v0  ;;  %v3239_v37 = vcombine.high %v3203_v32, %v3211_v33  ;;  %v3266_v24 = vld [vmem:[%s3750_s5 + $0x350] sm:$0xff] }
  0x94   : > { %1315 = vmatpush1.bf16.msra.mxu0 %v3164_v40  ;;  %1358 = vmatpush1.bf16.msra.mxu1 %v3166_v41  ;;  %v3189_v40 = vld [vmem:[%s3750_s5 + $0x228] sm:$0xff] }
  0x95   : > { %1398 = vmatprep.subr.bf16.mxu0 %v3153_v42  ;;  %1441 = vmatprep.subr.bf16.mxu1 %v3155_v43  ;;  %v3197_v41 = vld [vmem:[%s3750_s5 + $0x268] sm:$0xff]  ;;  %v3236_v42 = vcombine.low %v3202_v30, %v3210_v31  ;;  %v3238_v43 = vcombine.low %v3203_v32, %v3211_v33  ;;  %v3293_v30 = vcombine.high %v3258_v23, %v3266_v24  ;;  %v3274_v32 = vld [vmem:[%s3750_s5 + $0x390] sm:$0xff] }
  0x96   : > { %v3227_v45 = vcombine.high %v3189_v40, %v3197_v41  ;;  %v3282_v33 = vld [vmem:[%s3750_s5 + $0x3d0] sm:$0xff] }
  0x97   : > { %3178 = vmatmul.mubr.msk.bf16.vlgmr.msra.gmra.mrb[20].mxu0 %vm653_vm0, %v3772_v27  ;;  %3179 = vmatmul.mubr.msk.bf16.vlgmr.msra.gmra.mrb[20].mxu1 %vm653_vm0, %v3772_v27 }
  0x98   : > { %1399 = vmatpush1.bf16.msra.mxu0 %v3152_v48  ;;  %1442 = vmatpush1.bf16.msra.mxu1 %v3154_v49  ;;  %v3205_v48 = vld [vmem:[%s3750_s5 + $0x2a8] sm:$0xff] }
  0x99   : > { %1400 = vmatprep.subr.bf16.mxu0 %v3169_v50  ;;  %1443 = vmatprep.subr.bf16.mxu1 %v3171_v51  ;;  %v3213_v49 = vld [vmem:[%s3750_s5 + $0x2e8] sm:$0xff]  ;;  %v3224_v50 = vcombine.low %v3188_v38, %v3196_v39  ;;  %v3226_v51 = vcombine.low %v3189_v40, %v3197_v41  ;;  %v3309_v38 = vcombine.high %v3274_v32, %v3282_v33  ;;  %v3260_v40 = vld [vmem:[%s3750_s5 + $0x320] sm:$0xff] }
  0x9a   : > { %1430 = vmatprep.mubr.bf16.mxu0 %v3418_v0  ;;  %1473 = vmatprep.mubr.bf16.mxu1 %v3418_v0  ;;  %v3243_v53 = vcombine.high %v3205_v48, %v3213_v49  ;;  %v3268_v41 = vld [vmem:[%s3750_s5 + $0x360] sm:$0xff] }
  0x9c   : > { %1401 = vmatpush1.bf16.msra.mxu0 %v3168_v56  ;;  %1444 = vmatpush1.bf16.msra.mxu1 %v3170_v57  ;;  %v3191_v56 = vld [vmem:[%s3750_s5 + $0x238] sm:$0xff] }
  0x9d   : > { %1484 = vmatprep.subr.bf16.mxu0 %v3157_v58  ;;  %1527 = vmatprep.subr.bf16.mxu1 %v3159_v59  ;;  %v3199_v57 = vld [vmem:[%s3750_s5 + $0x278] sm:$0xff]  ;;  %v3240_v58 = vcombine.low %v3204_v46, %v3212_v47  ;;  %v3242_v59 = vcombine.low %v3205_v48, %v3213_v49  ;;  %v3297_v46 = vcombine.high %v3260_v40, %v3268_v41  ;;  %v3276_v48 = vld [vmem:[%s3750_s5 + $0x3a0] sm:$0xff] }
  0x9e   : > { %v3231_v61 = vcombine.high %v3191_v56, %v3199_v57  ;;  %v3284_v49 = vld [vmem:[%s3750_s5 + $0x3e0] sm:$0xff] }
  0x9f   : > { %3180 = vmatmul.mubr.msk.bf16.vlgmr.msra.gmra.mrb[24].mxu0 %vm653_vm0, %v3772_v27  ;;  %3181 = vmatmul.mubr.msk.bf16.vlgmr.msra.gmra.mrb[24].mxu1 %vm653_vm0, %v3772_v27 }
  0xa0   : > { %1485 = vmatpush1.bf16.msra.mxu0 %v3156_v1  ;;  %1528 = vmatpush1.bf16.msra.mxu1 %v3158_v2  ;;  %v3207_v1 = vld [vmem:[%s3750_s5 + $0x2b8] sm:$0xff] }
  0xa1   : > { %1486 = vmatprep.subr.bf16.mxu0 %v3173_v3  ;;  %1529 = vmatprep.subr.bf16.mxu1 %v3175_v4  ;;  %v3215_v2 = vld [vmem:[%s3750_s5 + $0x2f8] sm:$0xff]  ;;  %v3228_v3 = vcombine.low %v3190_v54, %v3198_v55  ;;  %v3230_v4 = vcombine.low %v3191_v56, %v3199_v57  ;;  %v3313_v54 = vcombine.high %v3276_v48, %v3284_v49  ;;  %v3262_v56 = vld [vmem:[%s3750_s5 + $0x330] sm:$0xff] }
  0xa2   : > { %1516 = vmatprep.mubr.bf16.mxu0 %v3418_v0  ;;  %1559 = vmatprep.mubr.bf16.mxu1 %v3418_v0  ;;  %v3247_v6 = vcombine.high %v3207_v1, %v3215_v2  ;;  %v3270_v57 = vld [vmem:[%s3750_s5 + $0x370] sm:$0xff] }
  0xa4   : > { %1487 = vmatpush1.bf16.msra.mxu0 %v3172_v9  ;;  %1530 = vmatpush1.bf16.msra.mxu1 %v3174_v10  ;;  %v3257_v9 = vld [vmem:[%s3750_s5 + $0x308] sm:$0xff] }
  0xa5   : > { %1827 = vmatprep.subr.bf16.mxu0 %v3217_v11  ;;  %1870 = vmatprep.subr.bf16.mxu1 %v3219_v12  ;;  %v3265_v10 = vld [vmem:[%s3750_s5 + $0x348] sm:$0xff]  ;;  %v3244_v11 = vcombine.low %v3206_v62, %v3214_v63  ;;  %v3246_v12 = vcombine.low %v3207_v1, %v3215_v2  ;;  %v3301_v62 = vcombine.high %v3262_v56, %v3270_v57  ;;  %v3278_v1 = vld [vmem:[%s3750_s5 + $0x3b0] sm:$0xff] }
  0xa6   : > { %v3291_v14 = vcombine.high %v3257_v9, %v3265_v10  ;;  %v3286_v2 = vld [vmem:[%s3750_s5 + $0x3f0] sm:$0xff] }
  0xa7   : > { %3182 = vmatmul.mubr.msk.bf16.vlgmr.msra.gmra.mrb[28].mxu0 %vm653_vm0, %v3772_v27  ;;  %3183 = vmatmul.mubr.msk.bf16.vlgmr.msra.gmra.mrb[28].mxu1 %vm653_vm0, %v3772_v27 }
  0xa8   : > { %1828 = vmatpush1.bf16.msra.mxu0 %v3216_v17  ;;  %1871 = vmatpush1.bf16.msra.mxu1 %v3218_v18  ;;  %v3273_v17 = vld [vmem:[%s3750_s5 + $0x388] sm:$0xff] }
  0xa9   : > { %1829 = vmatprep.subr.bf16.mxu0 %v3233_v19  ;;  %1872 = vmatprep.subr.bf16.mxu1 %v3235_v20  ;;  %v3281_v18 = vld [vmem:[%s3750_s5 + $0x3c8] sm:$0xff]  ;;  %v3288_v19 = vcombine.low %v3256_v7, %v3264_v8  ;;  %v3290_v20 = vcombine.low %v3257_v9, %v3265_v10  ;;  %v3317_v7 = vcombine.high %v3278_v1, %v3286_v2 }
  0xaa   : > { %1859 = vmatprep.mubr.bf16.mxu0 %v3418_v0  ;;  %1902 = vmatprep.mubr.bf16.mxu1 %v3418_v0  ;;  %v3307_v22 = vcombine.high %v3273_v17, %v3281_v18  ;;  %v3316_v9 = vcombine.low %v3278_v1, %v3286_v2 }
  0xac   : > { %1830 = vmatpush1.bf16.msra.mxu0 %v3232_v25  ;;  %1873 = vmatpush1.bf16.msra.mxu1 %v3234_v26  ;;  %v3259_v25 = vld [vmem:[%s3750_s5 + $0x318] sm:$0xff] }
  0xad   : > { %1913 = vmatprep.subr.bf16.mxu0 %v3221_v28  ;;  %1956 = vmatprep.subr.bf16.mxu1 %v3223_v29  ;;  %v3267_v26 = vld [vmem:[%s3750_s5 + $0x358] sm:$0xff]  ;;  %v3304_v28 = vcombine.low %v3272_v15, %v3280_v16  ;;  %v3306_v29 = vcombine.low %v3273_v17, %v3281_v18 }
  0xae   : > { %v3295_v31 = vcombine.high %v3259_v25, %v3267_v26 }
  0xaf   : > { %3248 = vmatmul.mubr.msk.bf16.vlgmr.msra.gmra.mrb[32].mxu0 %vm653_vm0, %v3772_v27  ;;  %3249 = vmatmul.mubr.msk.bf16.vlgmr.msra.gmra.mrb[32].mxu1 %vm653_vm0, %v3772_v27 }
  0xb0   : > { %1914 = vmatpush1.bf16.msra.mxu0 %v3220_v34  ;;  %1957 = vmatpush1.bf16.msra.mxu1 %v3222_v35  ;;  %v3275_v34 = vld [vmem:[%s3750_s5 + $0x398] sm:$0xff] }
  0xb1   : > { %1915 = vmatprep.subr.bf16.mxu0 %v3237_v36  ;;  %1958 = vmatprep.subr.bf16.mxu1 %v3239_v37  ;;  %v3283_v35 = vld [vmem:[%s3750_s5 + $0x3d8] sm:$0xff]  ;;  %v3292_v36 = vcombine.low %v3258_v23, %v3266_v24  ;;  %v3294_v37 = vcombine.low %v3259_v25, %v3267_v26 }
  0xb2   : > { %1945 = vmatprep.mubr.bf16.mxu0 %v3418_v0  ;;  %1988 = vmatprep.mubr.bf16.mxu1 %v3418_v0  ;;  %v3311_v39 = vcombine.high %v3275_v34, %v3283_v35 }
  0xb4   : > { %1916 = vmatpush1.bf16.msra.mxu0 %v3236_v42  ;;  %1959 = vmatpush1.bf16.msra.mxu1 %v3238_v43  ;;  %v3261_v42 = vld [vmem:[%s3750_s5 + $0x328] sm:$0xff] }
  0xb5   : > { %1999 = vmatprep.subr.bf16.mxu0 %v3225_v44  ;;  %2042 = vmatprep.subr.bf16.mxu1 %v3227_v45  ;;  %v3269_v43 = vld [vmem:[%s3750_s5 + $0x368] sm:$0xff]  ;;  %v3308_v44 = vcombine.low %v3274_v32, %v3282_v33  ;;  %v3310_v45 = vcombine.low %v3275_v34, %v3283_v35 }
  0xb6   : > { %v3299_v47 = vcombine.high %v3261_v42, %v3269_v43 }
  0xb7   : > { %3250 = vmatmul.mubr.msk.bf16.vlgmr.msra.gmra.mrb[36].mxu0 %vm653_vm0, %v3772_v27  ;;  %3251 = vmatmul.mubr.msk.bf16.vlgmr.msra.gmra.mrb[36].mxu1 %vm653_vm0, %v3772_v27 }
  0xb8   : > { %2000 = vmatpush1.bf16.msra.mxu0 %v3224_v50  ;;  %2043 = vmatpush1.bf16.msra.mxu1 %v3226_v51  ;;  %v3277_v50 = vld [vmem:[%s3750_s5 + $0x3a8] sm:$0xff] }
  0xb9   : > { %2001 = vmatprep.subr.bf16.mxu0 %v3241_v52  ;;  %2044 = vmatprep.subr.bf16.mxu1 %v3243_v53  ;;  %v3285_v51 = vld [vmem:[%s3750_s5 + $0x3e8] sm:$0xff]  ;;  %v3296_v52 = vcombine.low %v3260_v40, %v3268_v41  ;;  %v3298_v53 = vcombine.low %v3261_v42, %v3269_v43 }
  0xba   : > { %2031 = vmatprep.mubr.bf16.mxu0 %v3418_v0  ;;  %2074 = vmatprep.mubr.bf16.mxu1 %v3418_v0  ;;  %v3315_v55 = vcombine.high %v3277_v50, %v3285_v51 }
  0xbc   : > { %2002 = vmatpush1.bf16.msra.mxu0 %v3240_v58  ;;  %2045 = vmatpush1.bf16.msra.mxu1 %v3242_v59  ;;  %v3263_v58 = vld [vmem:[%s3750_s5 + $0x338] sm:$0xff] }
  0xbd   : > { %2085 = vmatprep.subr.bf16.mxu0 %v3229_v60  ;;  %2128 = vmatprep.subr.bf16.mxu1 %v3231_v61  ;;  %v3271_v59 = vld [vmem:[%s3750_s5 + $0x378] sm:$0xff]  ;;  %v3312_v60 = vcombine.low %v3276_v48, %v3284_v49  ;;  %v3314_v61 = vcombine.low %v3277_v50, %v3285_v51 }
  0xbe   : > { %v3303_v63 = vcombine.high %v3263_v58, %v3271_v59 }
  0xbf   : > { %3252 = vmatmul.mubr.msk.bf16.vlgmr.msra.gmra.mrb[40].mxu0 %vm653_vm0, %v3772_v27  ;;  %3253 = vmatmul.mubr.msk.bf16.vlgmr.msra.gmra.mrb[40].mxu1 %vm653_vm0, %v3772_v27 }
  0xc0   : > { %2086 = vmatpush1.bf16.msra.mxu0 %v3228_v3  ;;  %2129 = vmatpush1.bf16.msra.mxu1 %v3230_v4  ;;  %v3279_v3 = vld [vmem:[%s3750_s5 + $0x3b8] sm:$0xff] }
  0xc1   : > { %2087 = vmatprep.subr.bf16.mxu0 %v3245_v5  ;;  %2130 = vmatprep.subr.bf16.mxu1 %v3247_v6  ;;  %v3287_v4 = vld [vmem:[%s3750_s5 + $0x3f8] sm:$0xff]  ;;  %v3300_v5 = vcombine.low %v3262_v56, %v3270_v57  ;;  %v3302_v6 = vcombine.low %v3263_v58, %v3271_v59 }
  0xc2   : > { %2117 = vmatprep.mubr.bf16.mxu0 %v3418_v0  ;;  %2160 = vmatprep.mubr.bf16.mxu1 %v3418_v0  ;;  %v3319_v8 = vcombine.high %v3279_v3, %v3287_v4  ;;  %v3318_v10 = vcombine.low %v3279_v3, %v3287_v4 }
  0xc4   : > { %2088 = vmatpush1.bf16.msra.mxu0 %v3244_v11  ;;  %2131 = vmatpush1.bf16.msra.mxu1 %v3246_v12 }
  0xc5   : > { %2396 = vmatprep.subr.bf16.mxu0 %v3289_v13  ;;  %2439 = vmatprep.subr.bf16.mxu1 %v3291_v14 }
  0xc7   : > { %3254 = vmatmul.mubr.msk.bf16.vlgmr.msra.gmra.mrb[44].mxu0 %vm653_vm0, %v3772_v27  ;;  %3255 = vmatmul.mubr.msk.bf16.vlgmr.msra.gmra.mrb[44].mxu1 %vm653_vm0, %v3772_v27 }
  0xc8   : > { %2397 = vmatpush1.bf16.msra.mxu0 %v3288_v19  ;;  %2440 = vmatpush1.bf16.msra.mxu1 %v3290_v20 }
  0xc9   : > { %2398 = vmatprep.subr.bf16.mxu0 %v3305_v21  ;;  %2441 = vmatprep.subr.bf16.mxu1 %v3307_v22 }
  0xca   : > { %2428 = vmatprep.mubr.bf16.mxu0 %v3418_v0  ;;  %2471 = vmatprep.mubr.bf16.mxu1 %v3418_v0 }
  0xcc   : > { %2399 = vmatpush1.bf16.msra.mxu0 %v3304_v28  ;;  %2442 = vmatpush1.bf16.msra.mxu1 %v3306_v29 }
  0xcd   : > { %2482 = vmatprep.subr.bf16.mxu0 %v3293_v30  ;;  %2525 = vmatprep.subr.bf16.mxu1 %v3295_v31 }
  0xcf   : > { %3320 = vmatmul.mubr.msk.bf16.vlgmr.msra.gmra.mrb[48].mxu0 %vm653_vm0, %v3772_v27  ;;  %3321 = vmatmul.mubr.msk.bf16.vlgmr.msra.gmra.mrb[48].mxu1 %vm653_vm0, %v3772_v27 }
  0xd0   : > { %2483 = vmatpush1.bf16.msra.mxu0 %v3292_v36  ;;  %2526 = vmatpush1.bf16.msra.mxu1 %v3294_v37 }
  0xd1   : > { %2484 = vmatprep.subr.bf16.mxu0 %v3309_v38  ;;  %2527 = vmatprep.subr.bf16.mxu1 %v3311_v39 }
  0xd2   : > { %2514 = vmatprep.mubr.bf16.mxu0 %v3418_v0  ;;  %2557 = vmatprep.mubr.bf16.mxu1 %v3418_v0 }
  0xd4   : > { %2485 = vmatpush1.bf16.msra.mxu0 %v3308_v44  ;;  %2528 = vmatpush1.bf16.msra.mxu1 %v3310_v45 }
  0xd5   : > { %2568 = vmatprep.subr.bf16.mxu0 %v3297_v46  ;;  %2611 = vmatprep.subr.bf16.mxu1 %v3299_v47 }
  0xd7   : > { %3322 = vmatmul.mubr.msk.bf16.vlgmr.msra.gmra.mrb[52].mxu0 %vm653_vm0, %v3772_v27  ;;  %3323 = vmatmul.mubr.msk.bf16.vlgmr.msra.gmra.mrb[52].mxu1 %vm653_vm0, %v3772_v27 }
  0xd8   : > { %2569 = vmatpush1.bf16.msra.mxu0 %v3296_v52  ;;  %2612 = vmatpush1.bf16.msra.mxu1 %v3298_v53 }
  0xd9   : > { %2570 = vmatprep.subr.bf16.mxu0 %v3313_v54  ;;  %2613 = vmatprep.subr.bf16.mxu1 %v3315_v55 }
  0xda   : > { %2600 = vmatprep.mubr.bf16.mxu0 %v3418_v0  ;;  %2643 = vmatprep.mubr.bf16.mxu1 %v3418_v0 }
  0xdc   : > { %2571 = vmatpush1.bf16.msra.mxu0 %v3312_v60  ;;  %2614 = vmatpush1.bf16.msra.mxu1 %v3314_v61 }
  0xdd   : > { %2654 = vmatprep.subr.bf16.mxu0 %v3301_v62  ;;  %2697 = vmatprep.subr.bf16.mxu1 %v3303_v63 }
  0xdf   : > { %3324 = vmatmul.mubr.msk.bf16.vlgmr.msra.gmra.mrb[56].mxu0 %vm653_vm0, %v3772_v27  ;;  %3325 = vmatmul.mubr.msk.bf16.vlgmr.msra.gmra.mrb[56].mxu1 %vm653_vm0, %v3772_v27 }
  0xe0   : > { %2655 = vmatpush1.bf16.msra.mxu0 %v3300_v5  ;;  %2698 = vmatpush1.bf16.msra.mxu1 %v3302_v6 }
  0xe1   : > { %2656 = vmatprep.subr.bf16.mxu0 %v3317_v7  ;;  %2699 = vmatprep.subr.bf16.mxu1 %v3319_v8 }
  0xe2   : > { %2686 = vmatprep.mubr.bf16.mxu0 %v3418_v0  ;;  %2729 = vmatprep.mubr.bf16.mxu1 %v3418_v0  ;;  %v3982_v26 = vpop.permute.xlu0 %480 }
  0xe4   : > { %2657 = vmatpush1.bf16.msra.mxu0 %v3316_v9  ;;  %2700 = vmatpush1.bf16.msra.mxu1 %v3318_v10 }
  0xe7   : > { %3326 = vmatmul.mubr.msk.bf16.vlgmr.msra.gmra.mrb[60].mxu0 %vm653_vm0, %v3772_v27  ;;  %3327 = vmatmul.mubr.msk.bf16.vlgmr.msra.gmra.mrb[60].mxu1 %vm653_vm0, %v3772_v27 }
  0xe9   : > { %v3991_v36 = vpop.permute.xlu0 %485 }
 0x142   : > { %v691_v11 = vpop.f32.mrb[0].mxu0  ;;  %v734_v12 = vpop.f32.mrb[0].mxu1 }
 0x143   : > { %v693_v13 = vpop.f32.mrb[1].mxu0  ;;  %v736_v14 = vpop.f32.mrb[1].mxu1  ;;  %v3989_v35 = vadd.f32 %v691_v11, %v3982_v26  ;;  %v3997_v39 = vadd.f32 %v734_v12, %v3982_v26 }
 0x144   : > { %v695_v15 = vpop.f32.mrb[2].mxu0  ;;  %v738_v16 = vpop.f32.mrb[2].mxu1  ;;  %v4000_v40 = vadd.f32 %v693_v13, %v3982_v26  ;;  %v4003_v41 = vadd.f32 %v736_v14, %v3982_v26 }
 0x145   : > { %v697_v17 = vpop.f32.mrb[3].mxu0  ;;  %v740_v18 = vpop.f32.mrb[3].mxu1  ;;  %v1001_v38 = vmax.f32 %v3989_v35, 0.0  ;;  %v4010_v44 = vadd.f32 %v695_v15, %v3991_v36  ;;  %v4013_v45 = vadd.f32 %v738_v16, %v3991_v36  ;;  %v1003_v61 = vmax.f32 %v3997_v39, 0.0 }
 0x146   : > { %v4016_v46 = vadd.f32 %v697_v17, %v3991_v36  ;;  %v4019_v47 = vadd.f32 %v740_v18, %v3991_v36  ;;  %v1002_v62 = vmax.f32 %v4000_v40, 0.0  ;;  %v1004_v63 = vmax.f32 %v4003_v41, 0.0 }
 0x147   : > { %v1017_v2 = vmax.f32 %v4010_v44, 0.0  ;;  %v1019_v3 = vmax.f32 %v4013_v45, 0.0 }
 0x148   : > { %v1018_v4 = vmax.f32 %v4016_v46, 0.0  ;;  %v1020_v5 = vmax.f32 %v4019_v47, 0.0 }
 0x14a   : > { %v777_v19 = vpop.f32.mrb[4].mxu0  ;;  %v820_v20 = vpop.f32.mrb[4].mxu1 }
 0x14b   : > { %v779_v21 = vpop.f32.mrb[5].mxu0  ;;  %v822_v0 = vpop.f32.mrb[5].mxu1  ;;  %v4026_v50 = vadd.f32 %v777_v19, %v3982_v26  ;;  %v4029_v51 = vadd.f32 %v820_v20, %v3982_v26 }
 0x14c   : > { %v781_v22 = vpop.f32.mrb[6].mxu0  ;;  %v824_v23 = vpop.f32.mrb[6].mxu1  ;;  %v4032_v52 = vadd.f32 %v779_v21, %v3982_v26  ;;  %v4035_v53 = vadd.f32 %v822_v0, %v3982_v26 }
 0x14d   : > { %v783_v24 = vpop.f32.mrb[7].mxu0  ;;  %v826_v25 = vpop.f32.mrb[7].mxu1  ;;  %v4042_v56 = vadd.f32 %v781_v22, %v3991_v36  ;;  %v4045_v57 = vadd.f32 %v824_v23, %v3991_v36  ;;  %v1005_v6 = vmax.f32 %v4026_v50, 0.0  ;;  %v1007_v7 = vmax.f32 %v4029_v51, 0.0 }
 0x14e   : > { %v4048_v58 = vadd.f32 %v783_v24, %v3991_v36  ;;  %v4051_v59 = vadd.f32 %v826_v25, %v3991_v36  ;;  %v1006_v8 = vmax.f32 %v4032_v52, 0.0  ;;  %v1008_v9 = vmax.f32 %v4035_v53, 0.0 }
 0x14f   : > { %v1021_v10 = vmax.f32 %v4042_v56, 0.0  ;;  %v1023_v11 = vmax.f32 %v4045_v57, 0.0 }
 0x150   : > { %v1022_v12 = vmax.f32 %v4048_v58, 0.0  ;;  %v1024_v13 = vmax.f32 %v4051_v59, 0.0 }
 0x152   : > { %v863_v28 = vpop.f32.mrb[8].mxu0  ;;  %v906_v27 = vpop.f32.mrb[8].mxu1 }
 0x153   : > { %v865_v29 = vpop.f32.mrb[9].mxu0  ;;  %v908_v30 = vpop.f32.mrb[9].mxu1  ;;  %v4059_v1 = vadd.f32 %v863_v28, %v3982_v26  ;;  %v4075_v16 = vadd.f32 %v906_v27, %v3982_v26 }
 0x154   : > { %v867_v31 = vpop.f32.mrb[10].mxu0  ;;  %v910_v32 = vpop.f32.mrb[10].mxu1  ;;  %v4078_v17 = vadd.f32 %v865_v29, %v3982_v26  ;;  %v4082_v21 = vadd.f32 %v908_v30, %v3982_v26 }
 0x155   : > { %v3984_v33 = vpop.f32.mrb[11].mxu0  ;;  %v3986_v34 = vpop.f32.mrb[11].mxu1  ;;  %v1009_v15 = vmax.f32 %v4059_v1, 0.0  ;;  %v4085_v0 = vadd.f32 %v867_v31, %v3991_v36  ;;  %v4090_v28 = vadd.f32 %v910_v32, %v3991_v36 }
 0x156   : > { %v1010_v35 = vmax.f32 %v4078_v17, 0.0 }
 0x15a   : > { %v3993_v37 = vpop.f32.mrb[12].mxu0  ;;  %v4005_v42 = vpop.f32.mrb[12].mxu1 }
 0x15b   : > { %v4007_v43 = vpop.f32.mrb[13].mxu0  ;;  %v4021_v48 = vpop.f32.mrb[13].mxu1  ;;  %v4164_v52 = vadd.f32 %v4005_v42, %v3982_v26 }
 0x15c   : > { %v4023_v49 = vpop.f32.mrb[14].mxu0  ;;  %v4037_v54 = vpop.f32.mrb[14].mxu1  ;;  %v4186_v58 = vadd.f32 %v4021_v48, %v3982_v26 }
 0x15d   : > { %v4039_v55 = vpop.f32.mrb[15].mxu0  ;;  %v4053_v60 = vpop.f32.mrb[15].mxu1 }
 0x162   : > { %v1260_v14 = vpop.f32.mrb[16].mxu0  ;;  %v1303_v19 = vpop.f32.mrb[16].mxu1 }
 0x163   : > { %v1261_v18 = vadd.f32 %v1260_v14, %v3982_v26  ;;  %v1262_v20 = vpop.f32.mrb[17].mxu0  ;;  %v1304_v22 = vadd.f32 %v1303_v19, %v3982_v26  ;;  %v1305_v24 = vpop.f32.mrb[17].mxu1 }
 0x164   : > { %v1263_v23 = vadd.f32 %v1262_v20, %v3982_v26  ;;  %v1264_v25 = vpop.f32.mrb[18].mxu0  ;;  %v1306_v29 = vadd.f32 %v1305_v24, %v3982_v26  ;;  %v1307_v40 = vpop.f32.mrb[18].mxu1 }
 0x165   : > { %v1570_v27 = vmax.f32 %v1261_v18, 0.0  ;;  %v1265_v39 = vadd.f32 %v1264_v25, %v3991_v36  ;;  %v1266_v30 = vpop.f32.mrb[19].mxu0  ;;  %v1572_v41 = vmax.f32 %v1304_v22, 0.0  ;;  %v1308_v31 = vadd.f32 %v1307_v40, %v3991_v36  ;;  %v1309_v46 = vpop.f32.mrb[19].mxu1 }
 0x166   : > { %v1571_v44 = vmax.f32 %v1263_v23, 0.0  ;;  %v1267_v45 = vadd.f32 %v1266_v30, %v3991_v36  ;;  %v1573_v32 = vmax.f32 %v1306_v29, 0.0  ;;  %v1310_v18 = vadd.f32 %v1309_v46, %v3991_v36 }
 0x167   : > { %v4098_v47 = vmax.f32 %v1001_v38, %v1570_v27  ;;  %v1586_v14 = vmax.f32 %v1265_v39, 0.0  ;;  %v4101_v19 = vmax.f32 %v1003_v61, %v1572_v41  ;;  %v1588_v24 = vmax.f32 %v1308_v31, 0.0 }
 0x168   : > { %v4103_v20 = vmax.f32 %v1002_v62, %v1571_v44  ;;  %v1587_v22 = vmax.f32 %v1267_v45, 0.0  ;;  %v1011_v23 = vmax.f32 %v4075_v16, 0.0  ;;  %v4106_v25 = vmax.f32 %v1004_v63, %v1573_v32 }
 0x169   : > { %v4108_v40 = vmax.f32 %v1017_v2, %v1586_v14  ;;  %v1589_v30 = vmax.f32 %v1310_v18, 0.0  ;;  %v4113_v38 = vadd.f32 %v3984_v33, %v3991_v36  ;;  %v4115_v27 = vmax.f32 %v1019_v3, %v1588_v24 }
 0x16a   : > { %v4117_v61 = vmax.f32 %v1018_v4, %v1587_v22  ;;  %v1346_v62 = vpop.f32.mrb[20].mxu0  ;;  %v1012_v29 = vmax.f32 %v4082_v21, 0.0  ;;  %v1389_v41 = vpop.f32.mrb[20].mxu1  ;;  %v4127_v33 = vadd.f32 %v3986_v34, %v3991_v36  ;;  %v1016_v21 = vmax.f32 %v4186_v58, 0.0 }
 0x16b   : > { %v4121_v63 = vmax.f32 %v1020_v5, %v1589_v30  ;;  %v1347_v2 = vadd.f32 %v1346_v62, %v3982_v26  ;;  %v1348_v44 = vpop.f32.mrb[21].mxu0  ;;  %v1390_v3 = vadd.f32 %v1389_v41, %v3982_v26  ;;  %v1391_v45 = vpop.f32.mrb[21].mxu1  ;;  %v4133_v5 = vadd.f32 %v3993_v37, %v3982_v26 }
 0x16c   : > { %v1349_v4 = vadd.f32 %v1348_v44, %v3982_v26  ;;  %v1350_v46 = vpop.f32.mrb[22].mxu0  ;;  %v1392_v14 = vadd.f32 %v1391_v45, %v3982_v26  ;;  %v1393_v24 = vpop.f32.mrb[22].mxu1  ;;  %v1028_v51 = vmax.f32 %v4127_v33, 0.0 }
 0x16d   : > { %v1574_v32 = vmax.f32 %v1347_v2, 0.0  ;;  %v1351_v18 = vadd.f32 %v1350_v46, %v3991_v36  ;;  %v1352_v22 = vpop.f32.mrb[23].mxu0  ;;  %v1576_v30 = vmax.f32 %v1390_v3, 0.0  ;;  %v1394_v62 = vadd.f32 %v1393_v24, %v3991_v36  ;;  %v1395_v44 = vpop.f32.mrb[23].mxu1 }
 0x16e   : > { %v1575_v34 = vmax.f32 %v1349_v4, 0.0  ;;  %v1353_v41 = vadd.f32 %v1352_v22, %v3991_v36  ;;  %v1577_v37 = vmax.f32 %v1392_v14, 0.0  ;;  %v1396_v2 = vadd.f32 %v1395_v44, %v3991_v36 }
 0x16f   : > { %v4141_v31 = vmax.f32 %v1005_v6, %v1574_v32  ;;  %v1590_v39 = vmax.f32 %v1351_v18, 0.0  ;;  %v4146_v45 = vmax.f32 %v1007_v7, %v1576_v30  ;;  %v1592_v4 = vmax.f32 %v1394_v62, 0.0 }
 0x170   : > { %v4150_v3 = vmax.f32 %v1006_v8, %v1575_v34  ;;  %v1591_v46 = vmax.f32 %v1353_v41, 0.0  ;;  %v1026_v24 = vmax.f32 %v4113_v38, 0.0  ;;  %v4155_v50 = vmax.f32 %v1008_v9, %v1577_v37 }
 0x171   : > { %v4159_v6 = vmax.f32 %v1021_v10, %v1590_v39  ;;  %v1593_v32 = vmax.f32 %v1396_v2, 0.0  ;;  %v4168_v7 = vmax.f32 %v1023_v11, %v1592_v4  ;;  %v1013_v56 = vmax.f32 %v4133_v5, 0.0 }
 0x172   : > { %v4172_v53 = vmax.f32 %v1022_v12, %v1591_v46  ;;  %v1432_v8 = vpop.f32.mrb[24].mxu0  ;;  %v4177_v9 = vadd.f32 %v4007_v43, %v3982_v26  ;;  %v1475_v57 = vpop.f32.mrb[24].mxu1  ;;  %v4190_v12 = vadd.f32 %v4023_v49, %v3991_v36 }
 0x173   : > { %v4181_v10 = vmax.f32 %v1024_v13, %v1593_v32  ;;  %v1433_v42 = vadd.f32 %v1432_v8, %v3982_v26  ;;  %v1434_v11 = vpop.f32.mrb[25].mxu0  ;;  %v1476_v38 = vadd.f32 %v1475_v57, %v3982_v26  ;;  %v1477_v39 = vpop.f32.mrb[25].mxu1  ;;  %v4196_v13 = vadd.f32 %v4037_v54, %v3991_v36 }
 0x174   : > { %v1435_v43 = vadd.f32 %v1434_v11, %v3982_v26  ;;  %v1436_v59 = vpop.f32.mrb[26].mxu0  ;;  %v1478_v14 = vadd.f32 %v1477_v39, %v3982_v26  ;;  %v1479_v18 = vpop.f32.mrb[26].mxu1  ;;  %v1014_v17 = vmax.f32 %v4177_v9, 0.0 }
 0x175   : > { %v1578_v33 = vmax.f32 %v1433_v42, 0.0  ;;  %v1437_v48 = vadd.f32 %v1436_v59, %v3991_v36  ;;  %v1438_v22 = vpop.f32.mrb[27].mxu0  ;;  %v1580_v30 = vmax.f32 %v1476_v38, 0.0  ;;  %v1480_v34 = vadd.f32 %v1479_v18, %v3991_v36  ;;  %v1481_v41 = vpop.f32.mrb[27].mxu1 }
 0x176   : > { %v1579_v49 = vmax.f32 %v1435_v43, 0.0  ;;  %v1439_v62 = vadd.f32 %v1438_v22, %v3991_v36  ;;  %v1581_v54 = vmax.f32 %v1478_v14, 0.0  ;;  %v1482_v2 = vadd.f32 %v1481_v41, %v3991_v36 }
 0x177   : > { %v4204_v44 = vmax.f32 %v1009_v15, %v1578_v33  ;;  %v1594_v37 = vmax.f32 %v1437_v48, 0.0  ;;  %v4209_v4 = vmax.f32 %v1011_v23, %v1580_v30  ;;  %v1596_v32 = vmax.f32 %v1480_v34, 0.0 }
 0x178   : > { %v4213_v46 = vmax.f32 %v1010_v35, %v1579_v49  ;;  %v1595_v8 = vmax.f32 %v1439_v62, 0.0  ;;  %v956_v42 = vadd.f32 %v4039_v55, %v3991_v36  ;;  %v4219_v1 = vmax.f32 %v1012_v29, %v1581_v54 }
 0x179   : > { %v4587_v15 = vmax.f32 %v4085_v0, 0.0  ;;  %v1597_v16 = vmax.f32 %v1482_v2, 0.0  ;;  %v1015_v23 = vmax.f32 %v4164_v52, 0.0  ;;  %v4589_v35 = vmax.f32 %v4090_v28, 0.0 }
 0x17a   : > { %4586 = vst [vmem:[#allocation4_spill] sm:$0xff] %v4219_v1  ;;  %v4231_v38 = vmax.f32 %v1026_v24, %v1595_v8  ;;  %v1518_v55 = vpop.f32.mrb[28].mxu0  ;;  %v1029_v29 = vmax.f32 %v4190_v12, 0.0  ;;  %v1561_v39 = vpop.f32.mrb[28].mxu1  ;;  %v1031_v52 = vmax.f32 %v4196_v13, 0.0  ;;  %v999_v28 = vadd.f32 %v4053_v60, %v3991_v36 }
 0x17b   : > { %v4223_v57 = vmax.f32 %v4587_v15, %v1594_v37  ;;  %v4229_v11 = vmax.f32 %v4589_v35, %v1596_v32  ;;  %v4235_v43 = vmax.f32 %v1028_v51, %v1597_v16  ;;  %v1519_v0 = vadd.f32 %v1518_v55, %v3982_v26  ;;  %v1520_v59 = vpop.f32.mrb[29].mxu0  ;;  %v1563_v33 = vpop.f32.mrb[29].mxu1 }
 0x17c   : > { %4591 = vst [vmem:[#allocation7_spill] sm:$0xff] %v4231_v38  ;;  %v1562_v9 = vadd.f32 %v1561_v39, %v3982_v26  ;;  %v1521_v24 = vadd.f32 %v1520_v59, %v3982_v26  ;;  %v1522_v14 = vpop.f32.mrb[30].mxu0  ;;  %v1030_v58 = vmax.f32 %v956_v42, 0.0  ;;  %v1564_v51 = vadd.f32 %v1563_v33, %v3982_v26  ;;  %v1565_v18 = vpop.f32.mrb[30].mxu1 }
 0x17d   : > { %4588 = vst [vmem:[#allocation5_spill] sm:$0xff] %v4223_v57  ;;  %4590 = vst [vmem:[#allocation6_spill] sm:$0xff] %v4229_v11  ;;  %v1582_v48 = vmax.f32 %v1519_v0, 0.0  ;;  %v1523_v12 = vadd.f32 %v1522_v14, %v3991_v36  ;;  %v1524_v22 = vpop.f32.mrb[31].mxu0  ;;  %v1566_v13 = vadd.f32 %v1565_v18, %v3991_v36  ;;  %v1567_v34 = vpop.f32.mrb[31].mxu1  ;;  %v1032_v15 = vmax.f32 %v999_v28, 0.0 }
 0x17e   : > { %4592 = vst [vmem:[#allocation8_spill] sm:$0xff] %v4235_v43  ;;  %v1584_v30 = vmax.f32 %v1562_v9, 0.0  ;;  %v1583_v49 = vmax.f32 %v1521_v24, 0.0  ;;  %v1525_v60 = vadd.f32 %v1524_v22, %v3991_v36  ;;  %v1585_v41 = vmax.f32 %v1564_v51, 0.0 }
 0x17f   : > { %v4249_v62 = vmax.f32 %v1013_v56, %v1582_v48  ;;  %v1598_v54 = vmax.f32 %v1523_v12, 0.0  ;;  %v1568_v37 = vadd.f32 %v1567_v34, %v3991_v36  ;;  %v1600_v8 = vmax.f32 %v1566_v13, 0.0 }
 0x180   : > { %v4252_v2 = vmax.f32 %v1015_v23, %v1584_v30  ;;  %v4254_v32 = vmax.f32 %v1014_v17, %v1583_v49  ;;  %v1599_v42 = vmax.f32 %v1525_v60, 0.0  ;;  %v4256_v16 = vmax.f32 %v1016_v21, %v1585_v41 }
 0x181   : > { %4593 = vst [vmem:[#allocation9_spill] sm:$0xff] %v4249_v62  ;;  %v4258_v35 = vmax.f32 %v1029_v29, %v1598_v54  ;;  %v1601_v55 = vmax.f32 %v1568_v37, 0.0  ;;  %v4260_v0 = vmax.f32 %v1031_v52, %v1600_v8 }
 0x182   : > { %4594 = vst [vmem:[#allocation10_spill] sm:$0xff] %v4252_v2  ;;  %4595 = vst [vmem:[#allocation11_spill] sm:$0xff] %v4254_v32  ;;  %v4262_v5 = vmax.f32 %v1030_v58, %v1599_v42  ;;  %v1861_v56 = vpop.f32.mrb[32].mxu0  ;;  %v1904_v59 = vpop.f32.mrb[32].mxu1 }
 0x183   : > { %4596 = vst [vmem:[#allocation12_spill] sm:$0xff] %v4256_v16  ;;  %4597 = vst [vmem:[#allocation13_spill] sm:$0xff] %v4258_v35  ;;  %v4264_v39 = vmax.f32 %v1032_v15, %v1601_v55  ;;  %v1863_v23 = vpop.f32.mrb[33].mxu0  ;;  %v1906_v9 = vpop.f32.mrb[33].mxu1  ;;  %v4267_v49 = vadd.f32 %v1861_v56, %v3982_v26  ;;  %v4270_v13 = vadd.f32 %v1904_v59, %v3982_v26 }
 0x184   : > { %4598 = vst [vmem:[#allocation14_spill] sm:$0xff] %v4260_v0  ;;  %4599 = vst [vmem:[#allocation15_spill] sm:$0xff] %v4262_v5  ;;  %v1865_v17 = vpop.f32.mrb[34].mxu0  ;;  %v1908_v24 = vpop.f32.mrb[34].mxu1  ;;  %v4273_v60 = vadd.f32 %v1863_v23, %v3982_v26  ;;  %v4276_v54 = vadd.f32 %v1906_v9, %v3982_v26 }
 0x185   : > { %4600 = vst [vmem:[#allocation16_spill] sm:$0xff] %v4264_v39  ;;  %v1867_v33 = vpop.f32.mrb[35].mxu0  ;;  %v1910_v14 = vpop.f32.mrb[35].mxu1  ;;  %v4279_v37 = vadd.f32 %v1865_v17, %v3991_v36  ;;  %v4282_v8 = vadd.f32 %v1908_v24, %v3991_v36 }
 0x186   : > { %v4285_v55 = vadd.f32 %v1867_v33, %v3991_v36  ;;  %v4288_v56 = vadd.f32 %v1910_v14, %v3991_v36 }
 0x18a   : > { %v1947_v28 = vpop.f32.mrb[36].mxu0  ;;  %v1990_v21 = vpop.f32.mrb[36].mxu1 }
 0x18b   : > { %v1949_v48 = vpop.f32.mrb[37].mxu0  ;;  %v1992_v29 = vpop.f32.mrb[37].mxu1  ;;  %v4291_v59 = vadd.f32 %v1947_v28, %v3982_v26  ;;  %v4294_v23 = vadd.f32 %v1990_v21, %v3982_v26 }
 0x18c   : > { %v1951_v51 = vpop.f32.mrb[38].mxu0  ;;  %v1994_v12 = vpop.f32.mrb[38].mxu1  ;;  %v4297_v17 = vadd.f32 %v1949_v48, %v3982_v26  ;;  %v4300_v24 = vadd.f32 %v1992_v29, %v3982_v26 }
 0x18d   : > { %v1953_v52 = vpop.f32.mrb[39].mxu0  ;;  %v1996_v18 = vpop.f32.mrb[39].mxu1  ;;  %v4306_v5 = vadd.f32 %v1951_v51, %v3991_v36  ;;  %v4312_v48 = vadd.f32 %v1994_v12, %v3991_v36 }
 0x18e   : > { %v4321_v21 = vadd.f32 %v1953_v52, %v3991_v36  ;;  %v4324_v0 = vadd.f32 %v1996_v18, %v3991_v36 }
 0x192   : > { %v2033_v58 = vpop.f32.mrb[40].mxu0  ;;  %v2076_v22 = vpop.f32.mrb[40].mxu1 }
 0x193   : > { %v2035_v30 = vpop.f32.mrb[41].mxu0  ;;  %v2078_v34 = vpop.f32.mrb[41].mxu1  ;;  %v4328_v39 = vadd.f32 %v2033_v58, %v3982_v26  ;;  %v4331_v14 = vadd.f32 %v2076_v22, %v3982_v26 }
 0x194   : > { %v2037_v41 = vpop.f32.mrb[42].mxu0  ;;  %v2080_v42 = vpop.f32.mrb[42].mxu1  ;;  %v4334_v51 = vadd.f32 %v2035_v30, %v3982_v26  ;;  %v4338_v18 = vadd.f32 %v2078_v34, %v3982_v26 }
 0x195   : > { %v2039_v15 = vpop.f32.mrb[43].mxu0  ;;  %v2082_v9 = vpop.f32.mrb[43].mxu1  ;;  %v4341_v32 = vadd.f32 %v2037_v41, %v3991_v36  ;;  %v4344_v29 = vadd.f32 %v2080_v42, %v3991_v36 }
 0x196   : > { %v4347_v22 = vadd.f32 %v2039_v15, %v3991_v36  ;;  %v4350_v30 = vadd.f32 %v2082_v9, %v3991_v36 }
 0x198   : > { %4601 = vst [vmem:[#allocation17_spill] sm:$0xff] %v4350_v30 }
 0x19a   : > { %v2119_v35 = vpop.f32.mrb[44].mxu0  ;;  %v2162_v12 = vpop.f32.mrb[44].mxu1 }
 0x19b   : > { %v2121_v16 = vpop.f32.mrb[45].mxu0  ;;  %v2164_v28 = vpop.f32.mrb[45].mxu1  ;;  %v4353_v62 = vadd.f32 %v2119_v35, %v3982_v26  ;;  %v4356_v34 = vadd.f32 %v2162_v12, %v3982_v26 }
 0x19c   : > { %v2123_v33 = vpop.f32.mrb[46].mxu0  ;;  %v2166_v58 = vpop.f32.mrb[46].mxu1  ;;  %v4361_v43 = vadd.f32 %v2121_v16, %v3982_v26  ;;  %v4364_v15 = vadd.f32 %v2164_v28, %v3982_v26 }
 0x19d   : > { %v2125_v2 = vpop.f32.mrb[47].mxu0  ;;  %4602 = vst [vmem:[#allocation18_spill] sm:$0xff] %v4353_v62  ;;  %4603 = vst [vmem:[#allocation19_spill] sm:$0xff] %v4356_v34  ;;  %v2168_v52 = vpop.f32.mrb[47].mxu1  ;;  %v4370_v12 = vadd.f32 %v2123_v33, %v3991_v36  ;;  %v4376_v16 = vadd.f32 %v2166_v58, %v3991_v36 }
 0x19e   : > { %4604 = vst [vmem:[#allocation20_spill] sm:$0xff] %v4361_v43  ;;  %4605 = vst [vmem:[#allocation21_spill] sm:$0xff] %v4364_v15  ;;  %v4385_v41 = vadd.f32 %v2125_v2, %v3991_v36  ;;  %v4390_v9 = vadd.f32 %v2168_v52, %v3991_v36 }
 0x19f   : > { %4606 = vst [vmem:[#allocation22_spill] sm:$0xff] %v4370_v12  ;;  %4607 = vst [vmem:[#allocation23_spill] sm:$0xff] %v4376_v16 }
 0x1a0   : > { %4608 = vst [vmem:[#allocation24_spill] sm:$0xff] %v4385_v41  ;;  %4609 = vst [vmem:[#allocation25_spill] sm:$0xff] %v4390_v9 }
 0x1a2   : > { %v2430_v57 = vpop.f32.mrb[48].mxu0  ;;  %v2473_v58 = vpop.f32.mrb[48].mxu1 }
 0x1a3   : > { %v2431_v42 = vadd.f32 %v2430_v57, %v3982_v26  ;;  %v2432_v1 = vpop.f32.mrb[49].mxu0  ;;  %v2474_v38 = vadd.f32 %v2473_v58, %v3982_v26  ;;  %v2475_v34 = vpop.f32.mrb[49].mxu1 }
 0x1a4   : > { %v2433_v35 = vadd.f32 %v2432_v1, %v3982_v26  ;;  %v2434_v33 = vpop.f32.mrb[50].mxu0  ;;  %v2476_v41 = vadd.f32 %v2475_v34, %v3982_v26  ;;  %v2477_v15 = vpop.f32.mrb[50].mxu1  ;;  %v4610_v1 = vmax.f32 %v4267_v49, 0.0  ;;  %v4611_v34 = vmax.f32 %v4270_v13, 0.0 }
 0x1a5   : > { %v2740_v2 = vmax.f32 %v2431_v42, 0.0  ;;  %v2435_v57 = vadd.f32 %v2434_v33, %v3991_v36  ;;  %v2436_v43 = vpop.f32.mrb[51].mxu0  ;;  %v2742_v28 = vmax.f32 %v2474_v38, 0.0  ;;  %v2478_v52 = vadd.f32 %v2477_v15, %v3991_v36  ;;  %v2479_v9 = vpop.f32.mrb[51].mxu1 }
 0x1a6   : > { %v2741_v12 = vmax.f32 %v2433_v35, 0.0  ;;  %v2437_v58 = vadd.f32 %v2436_v43, %v3991_v36  ;;  %v2743_v30 = vmax.f32 %v2476_v41, 0.0  ;;  %v2480_v42 = vadd.f32 %v2479_v9, %v3991_v36 }
 0x1a7   : > { %v2772_v62 = vmax.f32 %v4610_v1, %v2740_v2  ;;  %v2756_v11 = vmax.f32 %v2435_v57, 0.0  ;;  %v2774_v16 = vmax.f32 %v4611_v34, %v2742_v28  ;;  %v4612_v38 = vmax.f32 %v4273_v60, 0.0 }
 0x1a8   : > { %v2758_v15 = vmax.f32 %v2478_v52, 0.0  ;;  %v2757_v33 = vmax.f32 %v2437_v58, 0.0  ;;  %v4613_v49 = vmax.f32 %v4276_v54, 0.0  ;;  %v4614_v41 = vmax.f32 %v4279_v37, 0.0 }
 0x1a9   : > { %v2773_v35 = vmax.f32 %v4612_v38, %v2741_v12  ;;  %v2804_v43 = vmax.f32 %v4098_v47, %v2772_v62  ;;  %v2759_v9 = vmax.f32 %v2480_v42, 0.0  ;;  %v2806_v13 = vmax.f32 %v4101_v19, %v2774_v16 }
 0x1aa   : > { %v2775_v2 = vmax.f32 %v4613_v49, %v2743_v30  ;;  %v2788_v57 = vmax.f32 %v4614_v41, %v2756_v11  ;;  %v4615_v1 = vmax.f32 %v4282_v8, 0.0  ;;  %v4616_v60 = vmax.f32 %v4285_v55, 0.0  ;;  %v2516_v52 = vpop.f32.mrb[52].mxu0  ;;  %v2559_v19 = vpop.f32.mrb[52].mxu1 }
 0x1ab   : > { %v2805_v28 = vmax.f32 %v4103_v20, %v2773_v35  ;;  %v4617_v54 = vmax.f32 %v4288_v56, 0.0  ;;  %v2517_v11 = vadd.f32 %v2516_v52, %v3982_v26  ;;  %v2518_v30 = vpop.f32.mrb[53].mxu0  ;;  %v2560_v55 = vadd.f32 %v2559_v19, %v3982_v26  ;;  %v2561_v58 = vpop.f32.mrb[53].mxu1 }
 0x1ac   : > { %v2790_v34 = vmax.f32 %v4615_v1, %v2758_v15  ;;  %v2789_v12 = vmax.f32 %v4616_v60, %v2757_v33  ;;  %v2807_v47 = vmax.f32 %v4106_v25, %v2775_v2  ;;  %v2820_v62 = vmax.f32 %v4108_v40, %v2788_v57  ;;  %v2520_v42 = vpop.f32.mrb[54].mxu0  ;;  %v2563_v35 = vpop.f32.mrb[54].mxu1 }
 0x1ad   : > { %v2791_v37 = vmax.f32 %v4617_v54, %v2759_v9  ;;  %v3350_v20 = vpack.c.bf16 %v2805_v28, %v2804_v43  ;;  %v2744_v38 = vmax.f32 %v2517_v11, 0.0  ;;  %v2519_v56 = vadd.f32 %v2518_v30, %v3982_v26  ;;  %v2522_v15 = vpop.f32.mrb[55].mxu0  ;;  %v2565_v49 = vpop.f32.mrb[55].mxu1 }
 0x1ae   : > { %v2822_v8 = vmax.f32 %v4115_v27, %v2790_v34  ;;  %v2821_v16 = vmax.f32 %v4117_v61, %v2789_v12  ;;  %v3351_v25 = vpack.c.bf16 %v2807_v47, %v2806_v13  ;;  %v2746_v61 = vmax.f32 %v2560_v55, 0.0 }
 0x1af   : > { %v2823_v40 = vmax.f32 %v4121_v63, %v2791_v37  ;;  %2932 = vst [vmem:[%s4432_s11] sm:$0xff] %v3350_v20  ;;  %v2562_v33 = vadd.f32 %v2561_v58, %v3982_v26  ;;  %v2521_v43 = vadd.f32 %v2520_v42, %v3991_v36  ;;  %v4618_v2 = vmax.f32 %v4291_v59, 0.0 }
 0x1b0   : > { %v3358_v27 = vpack.c.bf16 %v2821_v16, %v2820_v62  ;;  %2933 = vst [vmem:[%s4432_s11 + $0x8] sm:$0xff] %v3351_v25  ;;  %v2745_v57 = vmax.f32 %v2519_v56, 0.0  ;;  %v2564_v9 = vadd.f32 %v2563_v35, %v3991_v36  ;;  %v4619_v13 = vmax.f32 %v4294_v23, 0.0 }
 0x1b1   : > { %v3359_v63 = vpack.c.bf16 %v2823_v40, %v2822_v8  ;;  %v2776_v41 = vmax.f32 %v4618_v2, %v2744_v38  ;;  %v2747_v1 = vmax.f32 %v2562_v33, 0.0  ;;  %v2760_v34 = vmax.f32 %v2521_v43, 0.0 }
 0x1b2   : > { %2940 = vst [vmem:[%s4432_s11 + $0x40] sm:$0xff] %v3358_v27  ;;  %v2778_v28 = vmax.f32 %v4619_v13, %v2746_v61  ;;  %v2523_v60 = vadd.f32 %v2522_v15, %v3991_v36  ;;  %v4620_v52 = vmax.f32 %v4297_v17, 0.0  ;;  %v2762_v62 = vmax.f32 %v2564_v9, 0.0  ;;  %v2602_v20 = vpop.f32.mrb[56].mxu0  ;;  %v2645_v58 = vpop.f32.mrb[56].mxu1 }
 0x1b3   : > { %2941 = vst [vmem:[%s4432_s11 + $0x48] sm:$0xff] %v3359_v63  ;;  %v2808_v12 = vmax.f32 %v4141_v31, %v2776_v41  ;;  %v2566_v59 = vadd.f32 %v2565_v49, %v3991_v36  ;;  %v4621_v37 = vmax.f32 %v4300_v24, 0.0  ;;  %v4622_v23 = vmax.f32 %v4306_v5, 0.0  ;;  %v2604_v42 = vpop.f32.mrb[57].mxu0  ;;  %v2647_v38 = vpop.f32.mrb[57].mxu1 }
 0x1b4   : > { %v2777_v47 = vmax.f32 %v4620_v52, %v2745_v57  ;;  %v2810_v54 = vmax.f32 %v4146_v45, %v2778_v28  ;;  %v2761_v30 = vmax.f32 %v2523_v60, 0.0  ;;  %v4623_v31 = vmax.f32 %v4312_v48, 0.0  ;;  %v2649_v61 = vpop.f32.mrb[58].mxu1 }
 0x1b5   : > { %v2779_v11 = vmax.f32 %v4621_v37, %v2747_v1  ;;  %v2792_v19 = vmax.f32 %v4622_v23, %v2760_v34  ;;  %v2763_v17 = vmax.f32 %v2566_v59, 0.0  ;;  %v2603_v55 = vadd.f32 %v2602_v20, %v3982_v26  ;;  %v2651_v49 = vpop.f32.mrb[59].mxu1 }
 0x1b6   : > { %v2809_v8 = vmax.f32 %v4150_v3, %v2777_v47  ;;  %v2794_v16 = vmax.f32 %v4623_v31, %v2762_v62  ;;  %v4624_v25 = vmax.f32 %v4321_v21, 0.0  ;;  %v2646_v40 = vadd.f32 %v2645_v58, %v3982_v26  ;;  %v2606_v3 = vpop.f32.mrb[58].mxu0 }
 0x1b7   : > { %v2811_v45 = vmax.f32 %v4155_v50, %v2779_v11  ;;  %v2824_v24 = vmax.f32 %v4159_v6, %v2792_v19  ;;  %v4625_v35 = vmax.f32 %v4324_v0, 0.0  ;;  %v2748_v27 = vmax.f32 %v2603_v55, 0.0  ;;  %v2608_v50 = vpop.f32.mrb[59].mxu0  ;;  %v4633_v55 = vld [vmem:[#allocation5_spill] sm:$0xff] }
 0x1b8   : > { %v2793_v5 = vmax.f32 %v4624_v25, %v2761_v30  ;;  %v3352_v56 = vpack.c.bf16 %v2809_v8, %v2808_v12  ;;  %v2826_v48 = vmax.f32 %v4168_v7, %v2794_v16  ;;  %v2750_v21 = vmax.f32 %v2646_v40, 0.0 }
 0x1b9   : > { %v2795_v15 = vmax.f32 %v4625_v35, %v2763_v17  ;;  %v3353_v33 = vpack.c.bf16 %v2811_v45, %v2810_v54  ;;  %v2605_v43 = vadd.f32 %v2604_v42, %v3982_v26  ;;  %v4626_v2 = vmax.f32 %v4328_v39, 0.0  ;;  %v4632_v17 = vld [vmem:[#allocation4_spill] sm:$0xff]  ;;  %v4636_v35 = vld [vmem:[#allocation17_spill] sm:$0xff] }
 0x1ba   : > { %v2825_v6 = vmax.f32 %v4172_v53, %v2793_v5  ;;  %2934 = vst [vmem:[%s4432_s11 + $0x10] sm:$0xff] %v3352_v56  ;;  %v2648_v0 = vadd.f32 %v2647_v38, %v3982_v26  ;;  %v2607_v41 = vadd.f32 %v2606_v3, %v3991_v36  ;;  %v4627_v53 = vmax.f32 %v4331_v14, 0.0  ;;  %v2688_v59 = vpop.f32.mrb[60].mxu0  ;;  %v2731_v19 = vpop.f32.mrb[60].mxu1 }
 0x1bb   : > { %v2827_v63 = vmax.f32 %v4181_v10, %v2795_v15  ;;  %v2780_v7 = vmax.f32 %v4626_v2, %v2748_v27  ;;  %2935 = vst [vmem:[%s4432_s11 + $0x18] sm:$0xff] %v3353_v33  ;;  %v2749_v13 = vmax.f32 %v2605_v43, 0.0  ;;  %v2650_v28 = vadd.f32 %v2649_v61, %v3991_v36  ;;  %v2733_v16 = vpop.f32.mrb[61].mxu1  ;;  %v4638_v61 = vld [vmem:[#allocation18_spill] sm:$0xff] }
 0x1bc   : > { %v3360_v57 = vpack.c.bf16 %v2825_v6, %v2824_v24  ;;  %v2782_v9 = vmax.f32 %v4627_v53, %v2750_v21  ;;  %v2751_v10 = vmax.f32 %v2648_v0, 0.0  ;;  %v2764_v60 = vmax.f32 %v2607_v41, 0.0  ;;  %v2735_v24 = vpop.f32.mrb[62].mxu1  ;;  %v4640_v21 = vld [vmem:[#allocation7_spill] sm:$0xff]  ;;  %v4643_v0 = vld [vmem:[#allocation8_spill] sm:$0xff] }
 0x1bd   : > { %v3361_v1 = vpack.c.bf16 %v2827_v63, %v2826_v48  ;;  %v2812_v34 = vmax.f32 %v4204_v44, %v2780_v7  ;;  %v4628_v12 = vmax.f32 %v4334_v51, 0.0  ;;  %v2766_v47 = vmax.f32 %v2650_v28, 0.0  ;;  %v2737_v56 = vpop.f32.mrb[63].mxu1 }
 0x1be   : > { %2942 = vst [vmem:[%s4432_s11 + $0x50] sm:$0xff] %v3360_v57  ;;  %v2814_v39 = vmax.f32 %v4209_v4, %v2782_v9  ;;  %v2609_v62 = vadd.f32 %v2608_v50, %v3991_v36  ;;  %v4629_v14 = vmax.f32 %v4338_v18, 0.0  ;;  %v4630_v37 = vmax.f32 %v4341_v32, 0.0  ;;  %v2690_v4 = vpop.f32.mrb[61].mxu0  ;;  %v4644_v57 = vld [vmem:[#allocation9_spill] sm:$0xff] }
 0x1bf   : > { %v2781_v52 = vmax.f32 %v4628_v12, %v2749_v13  ;;  %2943 = vst [vmem:[%s4432_s11 + $0x58] sm:$0xff] %v3361_v1  ;;  %v2652_v44 = vadd.f32 %v2651_v49, %v3991_v36  ;;  %v2689_v23 = vadd.f32 %v2688_v59, %v3982_v26  ;;  %v4631_v30 = vmax.f32 %v4344_v29, 0.0  ;;  %v2692_v18 = vpop.f32.mrb[62].mxu0  ;;  %v4641_v49 = vld [vmem:[#allocation19_spill] sm:$0xff]  ;;  %v4645_v1 = vld [vmem:[#allocation10_spill] sm:$0xff]  ;;  %v4646_v12 = vld [vmem:[#allocation20_spill] sm:$0xff] }
 0x1c0   : > { %v2783_v54 = vmax.f32 %v4629_v14, %v2751_v10  ;;  %v2796_v11 = vmax.f32 %v4630_v37, %v2764_v60  ;;  %v2765_v8 = vmax.f32 %v2609_v62, 0.0  ;;  %v2732_v31 = vadd.f32 %v2731_v19, %v3982_v26  ;;  %v2694_v25 = vpop.f32.mrb[63].mxu0  ;;  %v4648_v59 = vld [vmem:[#allocation21_spill] sm:$0xff]  ;;  %v4650_v37 = vld [vmem:[#allocation22_spill] sm:$0xff]  ;;  %v4652_v19 = vld [vmem:[#allocation24_spill] sm:$0xff] }
 0x1c1   : > { %v2813_v51 = vmax.f32 %v4213_v46, %v2781_v52  ;;  %v2798_v20 = vmax.f32 %v4631_v30, %v2766_v47  ;;  %v2767_v42 = vmax.f32 %v2652_v44, 0.0  ;;  %v2752_v45 = vmax.f32 %v2689_v23, 0.0  ;;  %v4634_v46 = vld [vmem:[#allocation6_spill] sm:$0xff] }
 0x1c2   : > { %v2815_v32 = vmax.f32 %v4632_v17, %v2783_v54  ;;  %v2828_v58 = vmax.f32 %v4633_v55, %v2796_v11  ;;  %v4635_v29 = vmax.f32 %v4347_v22, 0.0  ;;  %v2754_v3 = vmax.f32 %v2732_v31, 0.0 }
 0x1c3   : > { %v3354_v5 = vpack.c.bf16 %v2813_v51, %v2812_v34  ;;  %v2830_v40 = vmax.f32 %v4634_v46, %v2798_v20  ;;  %v4637_v15 = vmax.f32 %v4636_v35, 0.0  ;;  %v4639_v50 = vmax.f32 %v4638_v61, 0.0  ;;  %v4653_v51 = vld [vmem:[#allocation11_spill] sm:$0xff]  ;;  %v2974_v61 = vld [vmem:[%s4432_s11 + $0x10] sm:$0xff] (%p3469_p5) }
 0x1c4   : > { %v2797_v38 = vmax.f32 %v4635_v29, %v2765_v8  ;;  %v3355_v48 = vpack.c.bf16 %v2815_v32, %v2814_v39  ;;  %v2691_v6 = vadd.f32 %v2690_v4, %v3982_v26  ;;  %v4642_v63 = vmax.f32 %v4641_v49, 0.0  ;;  %v4654_v20 = vld [vmem:[#allocation23_spill] sm:$0xff]  ;;  %v4657_v32 = vld [vmem:[#allocation12_spill] sm:$0xff]  ;;  %2975 = vst [vmem:[%s2957_s20 + $0x10] sm:$0xff] (%p3469_p5), %v2974_v61 }
 0x1c5   : > { %v2799_v27 = vmax.f32 %v4637_v15, %v2767_v42  ;;  %v2784_v33 = vmax.f32 %v4639_v50, %v2752_v45  ;;  %2936 = vst [vmem:[%s4432_s11 + $0x20] sm:$0xff] %v3354_v5  ;;  %v2734_v22 = vadd.f32 %v2733_v16, %v3982_v26  ;;  %v2693_v7 = vadd.f32 %v2692_v18, %v3991_v36  ;;  %v4656_v18 = vld [vmem:[#allocation25_spill] sm:$0xff]  ;;  %v4660_v29 = vld [vmem:[#allocation15_spill] sm:$0xff]  ;;  %v2970_v15 = vld [vmem:[%s4432_s11] sm:$0xff] (%p3469_p5) }
 0x1c6   : > { %v2829_v43 = vmax.f32 %v4640_v21, %v2797_v38  ;;  %v2786_v2 = vmax.f32 %v4642_v63, %v2754_v3  ;;  %2937 = vst [vmem:[%s4432_s11 + $0x28] sm:$0xff] %v3355_v48  ;;  %v2753_v9 = vmax.f32 %v2691_v6, 0.0  ;;  %v2736_v13 = vadd.f32 %v2735_v24, %v3991_v36  ;;  %v4659_v24 = vld [vmem:[#allocation14_spill] sm:$0xff]  ;;  %v4661_v3 = vld [vmem:[#allocation16_spill] sm:$0xff]  ;;  %v2976_v50 = vld [vmem:[%s4432_s11 + $0x18] sm:$0xff] (%p3469_p5) }
 0x1c7   : > { %v2831_v41 = vmax.f32 %v4643_v0, %v2799_v27  ;;  %v2816_v53 = vmax.f32 %v4644_v57, %v2784_v33  ;;  %v2755_v10 = vmax.f32 %v2734_v22, 0.0  ;;  %v2768_v60 = vmax.f32 %v2693_v7, 0.0  ;;  %v2972_v27 = vld [vmem:[%s4432_s11 + $0x8] sm:$0xff] (%p3469_p5)  ;;  %2971 = vst [vmem:[%s2957_s20] sm:$0xff] (%p3469_p5), %v2970_v15  ;;  %2977 = vst [vmem:[%s2957_s20 + $0x18] sm:$0xff] (%p3469_p5), %v2976_v50  ;;  %v2986_v49 = vld [vmem:[%s4432_s11 + $0x40] sm:$0xff] (%p3469_p5) }
 0x1c8   : > { %v3362_v28 = vpack.c.bf16 %v2829_v43, %v2828_v58  ;;  %v2818_v34 = vmax.f32 %v4645_v1, %v2786_v2  ;;  %v4647_v52 = vmax.f32 %v4646_v12, 0.0  ;;  %v2770_v47 = vmax.f32 %v2736_v13, 0.0  ;;  %v4658_v58 = vld [vmem:[#allocation13_spill] sm:$0xff]  ;;  %2973 = vst [vmem:[%s2957_s20 + $0x8] sm:$0xff] (%p3469_p5), %v2972_v27  ;;  %2987 = vst [vmem:[%s2957_s20 + $0xc0] sm:$0xff] (%p3469_p5), %v2986_v49  ;;  %v2990_v2 = vld [vmem:[%s4432_s11 + $0x50] sm:$0xff] (%p3469_p5) }
 0x1c9   : > { %v3363_v39 = vpack.c.bf16 %v2831_v41, %v2830_v40  ;;  %v2695_v62 = vadd.f32 %v2694_v25, %v3991_v36  ;;  %v4649_v14 = vmax.f32 %v4648_v59, 0.0  ;;  %v4651_v11 = vmax.f32 %v4650_v37, 0.0  ;;  %v2988_v63 = vld [vmem:[%s4432_s11 + $0x48] sm:$0xff] (%p3469_p5)  ;;  %v2992_v22 = vld [vmem:[%s4432_s11 + $0x58] sm:$0xff] (%p3469_p5)  ;;  %2991 = vst [vmem:[%s2957_s20 + $0xd0] sm:$0xff] (%p3469_p5), %v2990_v2 }
 0x1ca   : > { %v2785_v26 = vmax.f32 %v4647_v52, %v2753_v9  ;;  %2944 = vst [vmem:[%s4432_s11 + $0x60] sm:$0xff] %v3362_v28  ;;  %v2738_v23 = vadd.f32 %v2737_v56, %v3991_v36  ;;  %v2200_v4 = vmax.f32 %v4652_v19, 0.0  ;;  %v4655_v8 = vmax.f32 %v4654_v20, 0.0  ;;  %2989 = vst [vmem:[%s2957_s20 + $0xc8] sm:$0xff] (%p3469_p5), %v2988_v63 }
 0x1cb   : > { %v2787_v54 = vmax.f32 %v4649_v14, %v2755_v10  ;;  %v2800_v44 = vmax.f32 %v4651_v11, %v2768_v60  ;;  %2945 = vst [vmem:[%s4432_s11 + $0x68] sm:$0xff] %v3363_v39  ;;  %v2769_v16 = vmax.f32 %v2695_v62, 0.0  ;;  %v2202_v17 = vmax.f32 %v4656_v18, 0.0  ;;  %2993 = vst [vmem:[%s2957_s20 + $0xd8] sm:$0xff] (%p3469_p5), %v2992_v22 }
 0x1cc   : > { %v2817_v30 = vmax.f32 %v4653_v51, %v2785_v26  ;;  %v2802_v31 = vmax.f32 %v4655_v8, %v2770_v47  ;;  %v2771_v45 = vmax.f32 %v2738_v23, 0.0  ;;  %v2978_v33 = vld [vmem:[%s4432_s11 + $0x20] sm:$0xff] (%p3469_p5) }
 0x1cd   : > { %v2819_v55 = vmax.f32 %v4657_v32, %v2787_v54  ;;  %v2832_v42 = vmax.f32 %v4658_v58, %v2800_v44  ;;  %v2801_v5 = vmax.f32 %v2200_v4, %v2769_v16  ;;  %v2980_v6 = vld [vmem:[%s4432_s11 + $0x28] sm:$0xff] (%p3469_p5)  ;;  %2979 = vst [vmem:[%s2957_s20 + $0x20] sm:$0xff] (%p3469_p5), %v2978_v33 }
 0x1ce   : > { %v3356_v36 = vpack.c.bf16 %v2817_v30, %v2816_v53  ;;  %v2834_v25 = vmax.f32 %v4659_v24, %v2802_v31  ;;  %v2803_v40 = vmax.f32 %v2202_v17, %v2771_v45  ;;  %2954 = sbr.rel (!%p3469_p5) target bundleno = 477 (0x1dd), region = 59  ;;  %2981 = vst [vmem:[%s2957_s20 + $0x28] sm:$0xff] (%p3469_p5), %v2980_v6 }
 0x1cf   : > { %v3357_v46 = vpack.c.bf16 %v2819_v55, %v2818_v34  ;;  %v2833_v38 = vmax.f32 %v4660_v29, %v2801_v5 }
 0x1d0   : > { %2938 = vst [vmem:[%s4432_s11 + $0x30] sm:$0xff] %v3356_v36  ;;  %v2835_v56 = vmax.f32 %v4661_v3, %v2803_v40 }
 0x1d1   : > { %2939 = vst [vmem:[%s4432_s11 + $0x38] sm:$0xff] %v3357_v46  ;;  %v3364_v48 = vpack.c.bf16 %v2833_v38, %v2832_v42  ;;  %v2994_v7 = vld [vmem:[%s4432_s11 + $0x60] sm:$0xff] (%p3469_p5) }
 0x1d2   : > { %v3365_v35 = vpack.c.bf16 %v2835_v56, %v2834_v25  ;;  %v2996_v0 = vld [vmem:[%s4432_s11 + $0x68] sm:$0xff] (%p3469_p5)  ;;  %2995 = vst [vmem:[%s2957_s20 + $0xe0] sm:$0xff] (%p3469_p5), %v2994_v7 }
 0x1d3   : > { %2946 = vst [vmem:[%s4432_s11 + $0x70] sm:$0xff] %v3364_v48  ;;  %2997 = vst [vmem:[%s2957_s20 + $0xe8] sm:$0xff] (%p3469_p5), %v2996_v0 }
 0x1d4   : > { %2947 = vst [vmem:[%s4432_s11 + $0x78] sm:$0xff] %v3365_v35 }
 0x1d7   : > { %v2982_v21 = vld [vmem:[%s4432_s11 + $0x30] sm:$0xff] }
 0x1d8   : > { %v2984_v43 = vld [vmem:[%s4432_s11 + $0x38] sm:$0xff]  ;;  %2983 = vst [vmem:[%s2957_s20 + $0x30] sm:$0xff] %v2982_v21 }
 0x1d9   : > { %2985 = vst [vmem:[%s2957_s20 + $0x38] sm:$0xff] %v2984_v43 }
 0x1da   : > { %v2998_v41 = vld [vmem:[%s4432_s11 + $0x70] sm:$0xff] }
 0x1db   : > { %2999 = vst [vmem:[%s2957_s20 + $0xf0] sm:$0xff] %v2998_v41  ;;  %v3000_v57 = vld [vmem:[%s4432_s11 + $0x78] sm:$0xff] }
 0x1dc   : > { %3001 = vst [vmem:[%s2957_s20 + $0xf8] sm:$0xff] %v3000_v57 }
 0x1dd PF: > { %p10_p10 = scmp.ge.s32.totalorder %s3456_s16, 5   ;;  %s4662_s12 = smov %s3412_s13 }
 0x1de   : > { %s4663_s13 = smov %s3467_s19  ;;  %s4664_s14 = smov %s3456_s16 }
 0x1df   :  { %12 = sbr.rel (!%p10_p10) target bundleno = 2 (0x2), region = 116 }

// kernel: cnn_forward.5
= control target key start
LH: loop header
LB: loop body
LE: loop exit
PB: predicated region body
PF: predicated region fallthrough
CT: control target
= control target key end

     0   :  { %s1443_s12 = smov 0   ;;  %s1445_s13 = smov 0   ;;  %s1787_s0 = inlined_call_operand.vmem [shape: bf16[4,144,384], index: 0, kind: input, shape index: {}]   ;;  %s1788_s1 = inlined_call_operand.vmem [shape: bf16[32,144], index: 1, kind: input, shape index: {}]   ;;  %s1789_s2 = inlined_call_operand.vmem [shape: f32[32,1], index: 2, kind: input, shape index: {}]   ;;  %s1790_s3 = inlined_call_operand.vmem [shape: bf16[32,384], index: 3, kind: output, shape index: {}]  }
   0x1   :  { %s1447_s14 = smov 0  }
   0x2 LB: > { %s1195_s15 = sadd.s32 4294967295, %s1420_s14   ;;  %s1460_s16 = sadd.s32 1, %s1420_s14   ;;  %s1420_s14 = sphi %s1447_s14, %s1794_s14   ;;  %s1416_s13 = sphi %s1445_s13, %s1793_s13   ;;  %s1412_s12 = sphi %s1443_s12, %s1792_s12  }
   0x3   : > { %s17_s17 = ssub.s32 %s1420_s14, %s1460_s16  ;;  %s20_s18 = sadd.s32 1, %s1416_s13 }
   0x4   : > { %p18_p0 = scmp.eq.s32.totalorder %s17_s17, 0  ;;  %p27_p1 = scmp.ne.s32.totalorder %s1416_s13, %s1412_s12 }
   0x5   : > { %p28_p2 = scmp.eq.s32.totalorder %s1420_s14, 0  ;;  %p99_p3 = scmp.eq.s32.totalorder %s1195_s15, 2 }
   0x6   : > { %s1471_s19 = scalar_select %p18_p0, %s1416_s13, %s20_s18  }
   0x7   : > { %p29_p4 = por %p28_p2, %p27_p1  ;;  %p1473_p5 = por %p99_p3, %p27_p1 }
   0x8   : > { %p1198_p6 = scmp.ge.s32.totalorder %s1420_s14, 3 }
   0xa   : > { %127 = sbr.rel (%p1198_p6) target bundleno = 69 (0x45), region = 24 }
  0x11   : > { %130 = sbr.rel (!%p29_p4) target bundleno = 69 (0x45), region = 28  ;;  %s132_s21 = sand.u32 (%p29_p4), 1, %s1416_s13  }
  0x12   : > { %s1199_s22 = sshll.u32 (%p29_p4), %s1420_s14, 2  ;;  %s1327_s23 = smul.u32 (%p29_p4), 288, %s132_s21 }
  0x13   : > { %s1483_s26 = scalar_lea.vmem (%p29_p4), %s1787_s0, %s1199_s22 }
  0x14   : > { %v152_v0 = vld [vmem:[%s1483_s26] sm:$0xf] (%p29_p4)  ;;  %v154_v1 = vld [vmem:[%s1483_s26 + $0xc] sm:$0xf] (%p29_p4)  ;;  %v156_v2 = vld [vmem:[%s1483_s26 + $0x18] sm:$0xf] (%p29_p4) }
  0x15   : > { %v158_v3 = vld [vmem:[%s1483_s26 + $0x24] sm:$0xf] (%p29_p4)  ;;  %v160_v4 = vld [vmem:[%s1483_s26 + $0x30] sm:$0xf] (%p29_p4)  ;;  %s1490_s27 = scalar_lea.vmem (%p29_p4), [#allocation2], %s1327_s23 }
  0x16   : > { %153 = vst [vmem:[%s1490_s27] sm:$0xf] (%p29_p4), %v152_v0  ;;  %155 = vst [vmem:[%s1490_s27 + $0x4] sm:$0xf] (%p29_p4), %v154_v1  ;;  %v162_v5 = vld [vmem:[%s1483_s26 + $0x3c] sm:$0xf] (%p29_p4) }
  0x17   : > { %157 = vst [vmem:[%s1490_s27 + $0x8] sm:$0xf] (%p29_p4), %v156_v2  ;;  %159 = vst [vmem:[%s1490_s27 + $0xc] sm:$0xf] (%p29_p4), %v158_v3  ;;  %v164_v6 = vld [vmem:[%s1483_s26 + $0x48] sm:$0xf] (%p29_p4) }
  0x18   : > { %161 = vst [vmem:[%s1490_s27 + $0x10] sm:$0xf] %v160_v4  ;;  %v166_v7 = vld [vmem:[%s1483_s26 + $0x54] sm:$0xf]  ;;  %163 = vst [vmem:[%s1490_s27 + $0x14] sm:$0xf] %v162_v5 }
  0x19   : > { %165 = vst [vmem:[%s1490_s27 + $0x18] sm:$0xf] %v164_v6  ;;  %167 = vst [vmem:[%s1490_s27 + $0x1c] sm:$0xf] %v166_v7  ;;  %v168_v8 = vld [vmem:[%s1483_s26 + $0x60] sm:$0xf] }
  0x1a   : > { %v170_v9 = vld [vmem:[%s1483_s26 + $0x6c] sm:$0xf]  ;;  %v172_v10 = vld [vmem:[%s1483_s26 + $0x78] sm:$0xf]  ;;  %169 = vst [vmem:[%s1490_s27 + $0x20] sm:$0xf] %v168_v8 }
  0x1b   : > { %171 = vst [vmem:[%s1490_s27 + $0x24] sm:$0xf] %v170_v9  ;;  %173 = vst [vmem:[%s1490_s27 + $0x28] sm:$0xf] %v172_v10  ;;  %v174_v11 = vld [vmem:[%s1483_s26 + $0x84] sm:$0xf] }
  0x1c   : > { %v176_v12 = vld [vmem:[%s1483_s26 + $0x90] sm:$0xf]  ;;  %v178_v13 = vld [vmem:[%s1483_s26 + $0x9c] sm:$0xf]  ;;  %175 = vst [vmem:[%s1490_s27 + $0x2c] sm:$0xf] %v174_v11 }
  0x1d   : > { %177 = vst [vmem:[%s1490_s27 + $0x30] sm:$0xf] %v176_v12  ;;  %179 = vst [vmem:[%s1490_s27 + $0x34] sm:$0xf] %v178_v13  ;;  %v180_v14 = vld [vmem:[%s1483_s26 + $0xa8] sm:$0xf] }
  0x1e   : > { %v182_v15 = vld [vmem:[%s1483_s26 + $0xb4] sm:$0xf]  ;;  %v184_v16 = vld [vmem:[%s1483_s26 + $0xc0] sm:$0xf]  ;;  %181 = vst [vmem:[%s1490_s27 + $0x38] sm:$0xf] %v180_v14 }
  0x1f   : > { %183 = vst [vmem:[%s1490_s27 + $0x3c] sm:$0xf] %v182_v15  ;;  %185 = vst [vmem:[%s1490_s27 + $0x40] sm:$0xf] %v184_v16  ;;  %v186_v17 = vld [vmem:[%s1483_s26 + $0xcc] sm:$0xf] }
  0x20   : > { %v188_v18 = vld [vmem:[%s1483_s26 + $0xd8] sm:$0xf]  ;;  %v190_v19 = vld [vmem:[%s1483_s26 + $0xe4] sm:$0xf]  ;;  %187 = vst [vmem:[%s1490_s27 + $0x44] sm:$0xf] %v186_v17 }
  0x21   : > { %189 = vst [vmem:[%s1490_s27 + $0x48] sm:$0xf] %v188_v18  ;;  %191 = vst [vmem:[%s1490_s27 + $0x4c] sm:$0xf] %v190_v19  ;;  %v192_v20 = vld [vmem:[%s1483_s26 + $0xf0] sm:$0xf] }
  0x22   : > { %v194_v21 = vld [vmem:[%s1483_s26 + $0xfc] sm:$0xf]  ;;  %v196_v22 = vld [vmem:[%s1483_s26 + $0x108] sm:$0xf]  ;;  %193 = vst [vmem:[%s1490_s27 + $0x50] sm:$0xf] %v192_v20 }
  0x23   : > { %195 = vst [vmem:[%s1490_s27 + $0x54] sm:$0xf] %v194_v21  ;;  %197 = vst [vmem:[%s1490_s27 + $0x58] sm:$0xf] %v196_v22  ;;  %v198_v23 = vld [vmem:[%s1483_s26 + $0x114] sm:$0xf] }
  0x24   : > { %v200_v24 = vld [vmem:[%s1483_s26 + $0x120] sm:$0xf]  ;;  %v202_v25 = vld [vmem:[%s1483_s26 + $0x12c] sm:$0xf]  ;;  %199 = vst [vmem:[%s1490_s27 + $0x5c] sm:$0xf] %v198_v23 }
  0x25   : > { %201 = vst [vmem:[%s1490_s27 + $0x60] sm:$0xf] %v200_v24  ;;  %203 = vst [vmem:[%s1490_s27 + $0x64] sm:$0xf] %v202_v25  ;;  %v204_v26 = vld [vmem:[%s1483_s26 + $0x138] sm:$0xf] }
  0x26   : > { %v206_v27 = vld [vmem:[%s1483_s26 + $0x144] sm:$0xf]  ;;  %v208_v28 = vld [vmem:[%s1483_s26 + $0x150] sm:$0xf]  ;;  %205 = vst [vmem:[%s1490_s27 + $0x68] sm:$0xf] %v204_v26 }
  0x27   : > { %207 = vst [vmem:[%s1490_s27 + $0x6c] sm:$0xf] %v206_v27  ;;  %209 = vst [vmem:[%s1490_s27 + $0x70] sm:$0xf] %v208_v28  ;;  %v210_v29 = vld [vmem:[%s1483_s26 + $0x15c] sm:$0xf] }
  0x28   : > { %v212_v30 = vld [vmem:[%s1483_s26 + $0x168] sm:$0xf]  ;;  %v214_v31 = vld [vmem:[%s1483_s26 + $0x174] sm:$0xf]  ;;  %211 = vst [vmem:[%s1490_s27 + $0x74] sm:$0xf] %v210_v29 }
  0x29   : > { %213 = vst [vmem:[%s1490_s27 + $0x78] sm:$0xf] %v212_v30  ;;  %215 = vst [vmem:[%s1490_s27 + $0x7c] sm:$0xf] %v214_v31  ;;  %v216_v32 = vld [vmem:[%s1483_s26 + $0x180] sm:$0xf] }
  0x2a   : > { %v218_v33 = vld [vmem:[%s1483_s26 + $0x18c] sm:$0xf]  ;;  %v220_v34 = vld [vmem:[%s1483_s26 + $0x198] sm:$0xf]  ;;  %217 = vst [vmem:[%s1490_s27 + $0x80] sm:$0xf] %v216_v32 }
  0x2b   : > { %219 = vst [vmem:[%s1490_s27 + $0x84] sm:$0xf] %v218_v33  ;;  %221 = vst [vmem:[%s1490_s27 + $0x88] sm:$0xf] %v220_v34  ;;  %v222_v35 = vld [vmem:[%s1483_s26 + $0x1a4] sm:$0xf] }
  0x2c   : > { %v224_v36 = vld [vmem:[%s1483_s26 + $0x1b0] sm:$0xf]  ;;  %v226_v37 = vld [vmem:[%s1483_s26 + $0x1bc] sm:$0xf]  ;;  %223 = vst [vmem:[%s1490_s27 + $0x8c] sm:$0xf] %v222_v35 }
  0x2d   : > { %225 = vst [vmem:[%s1490_s27 + $0x90] sm:$0xf] %v224_v36  ;;  %227 = vst [vmem:[%s1490_s27 + $0x94] sm:$0xf] %v226_v37  ;;  %v228_v38 = vld [vmem:[%s1483_s26 + $0x1c8] sm:$0xf] }
  0x2e   : > { %v230_v39 = vld [vmem:[%s1483_s26 + $0x1d4] sm:$0xf]  ;;  %v232_v40 = vld [vmem:[%s1483_s26 + $0x1e0] sm:$0xf]  ;;  %229 = vst [vmem:[%s1490_s27 + $0x98] sm:$0xf] %v228_v38 }
  0x2f   : > { %231 = vst [vmem:[%s1490_s27 + $0x9c] sm:$0xf] %v230_v39  ;;  %233 = vst [vmem:[%s1490_s27 + $0xa0] sm:$0xf] %v232_v40  ;;  %v234_v41 = vld [vmem:[%s1483_s26 + $0x1ec] sm:$0xf] }
  0x30   : > { %v236_v42 = vld [vmem:[%s1483_s26 + $0x1f8] sm:$0xf]  ;;  %v238_v43 = vld [vmem:[%s1483_s26 + $0x204] sm:$0xf]  ;;  %235 = vst [vmem:[%s1490_s27 + $0xa4] sm:$0xf] %v234_v41 }
  0x31   : > { %237 = vst [vmem:[%s1490_s27 + $0xa8] sm:$0xf] %v236_v42  ;;  %239 = vst [vmem:[%s1490_s27 + $0xac] sm:$0xf] %v238_v43  ;;  %v240_v44 = vld [vmem:[%s1483_s26 + $0x210] sm:$0xf] }
  0x32   : > { %v242_v45 = vld [vmem:[%s1483_s26 + $0x21c] sm:$0xf]  ;;  %v244_v46 = vld [vmem:[%s1483_s26 + $0x228] sm:$0xf]  ;;  %241 = vst [vmem:[%s1490_s27 + $0xb0] sm:$0xf] %v240_v44 }
  0x33   : > { %243 = vst [vmem:[%s1490_s27 + $0xb4] sm:$0xf] %v242_v45  ;;  %245 = vst [vmem:[%s1490_s27 + $0xb8] sm:$0xf] %v244_v46  ;;  %v246_v47 = vld [vmem:[%s1483_s26 + $0x234] sm:$0xf] }
  0x34   : > { %v248_v48 = vld [vmem:[%s1483_s26 + $0x240] sm:$0xf]  ;;  %v250_v49 = vld [vmem:[%s1483_s26 + $0x24c] sm:$0xf]  ;;  %247 = vst [vmem:[%s1490_s27 + $0xbc] sm:$0xf] %v246_v47 }
  0x35   : > { %249 = vst [vmem:[%s1490_s27 + $0xc0] sm:$0xf] %v248_v48  ;;  %251 = vst [vmem:[%s1490_s27 + $0xc4] sm:$0xf] %v250_v49  ;;  %v252_v50 = vld [vmem:[%s1483_s26 + $0x258] sm:$0xf] }
  0x36   : > { %v254_v51 = vld [vmem:[%s1483_s26 + $0x264] sm:$0xf]  ;;  %v256_v52 = vld [vmem:[%s1483_s26 + $0x270] sm:$0xf]  ;;  %253 = vst [vmem:[%s1490_s27 + $0xc8] sm:$0xf] %v252_v50 }
  0x37   : > { %255 = vst [vmem:[%s1490_s27 + $0xcc] sm:$0xf] %v254_v51  ;;  %257 = vst [vmem:[%s1490_s27 + $0xd0] sm:$0xf] %v256_v52  ;;  %v258_v53 = vld [vmem:[%s1483_s26 + $0x27c] sm:$0xf] }
  0x38   : > { %v260_v54 = vld [vmem:[%s1483_s26 + $0x288] sm:$0xf]  ;;  %v262_v55 = vld [vmem:[%s1483_s26 + $0x294] sm:$0xf]  ;;  %259 = vst [vmem:[%s1490_s27 + $0xd4] sm:$0xf] %v258_v53 }
  0x39   : > { %261 = vst [vmem:[%s1490_s27 + $0xd8] sm:$0xf] %v260_v54  ;;  %263 = vst [vmem:[%s1490_s27 + $0xdc] sm:$0xf] %v262_v55  ;;  %v264_v56 = vld [vmem:[%s1483_s26 + $0x2a0] sm:$0xf] }
  0x3a   : > { %v266_v57 = vld [vmem:[%s1483_s26 + $0x2ac] sm:$0xf]  ;;  %v268_v58 = vld [vmem:[%s1483_s26 + $0x2b8] sm:$0xf]  ;;  %265 = vst [vmem:[%s1490_s27 + $0xe0] sm:$0xf] %v264_v56 }
  0x3b   : > { %267 = vst [vmem:[%s1490_s27 + $0xe4] sm:$0xf] %v266_v57  ;;  %269 = vst [vmem:[%s1490_s27 + $0xe8] sm:$0xf] %v268_v58  ;;  %v270_v59 = vld [vmem:[%s1483_s26 + $0x2c4] sm:$0xf] }
  0x3c   : > { %v272_v60 = vld [vmem:[%s1483_s26 + $0x2d0] sm:$0xf]  ;;  %v274_v61 = vld [vmem:[%s1483_s26 + $0x2dc] sm:$0xf]  ;;  %271 = vst [vmem:[%s1490_s27 + $0xec] sm:$0xf] %v270_v59 }
  0x3d   : > { %273 = vst [vmem:[%s1490_s27 + $0xf0] sm:$0xf] %v272_v60  ;;  %275 = vst [vmem:[%s1490_s27 + $0xf4] sm:$0xf] %v274_v61  ;;  %v276_v62 = vld [vmem:[%s1483_s26 + $0x2e8] sm:$0xf] }
  0x3e   : > { %v278_v63 = vld [vmem:[%s1483_s26 + $0x2f4] sm:$0xf]  ;;  %v280_v0 = vld [vmem:[%s1483_s26 + $0x300] sm:$0xf]  ;;  %277 = vst [vmem:[%s1490_s27 + $0xf8] sm:$0xf] %v276_v62 }
  0x3f   : > { %279 = vst [vmem:[%s1490_s27 + $0xfc] sm:$0xf] %v278_v63  ;;  %281 = vst [vmem:[%s1490_s27 + $0x100] sm:$0xf] %v280_v0  ;;  %v282_v1 = vld [vmem:[%s1483_s26 + $0x30c] sm:$0xf] }
  0x40   : > { %v284_v2 = vld [vmem:[%s1483_s26 + $0x318] sm:$0xf]  ;;  %v286_v3 = vld [vmem:[%s1483_s26 + $0x324] sm:$0xf]  ;;  %283 = vst [vmem:[%s1490_s27 + $0x104] sm:$0xf] %v282_v1 }
  0x41   : > { %285 = vst [vmem:[%s1490_s27 + $0x108] sm:$0xf] %v284_v2  ;;  %287 = vst [vmem:[%s1490_s27 + $0x10c] sm:$0xf] %v286_v3  ;;  %v288_v4 = vld [vmem:[%s1483_s26 + $0x330] sm:$0xf] }
  0x42   : > { %v290_v5 = vld [vmem:[%s1483_s26 + $0x33c] sm:$0xf]  ;;  %v292_v6 = vld [vmem:[%s1483_s26 + $0x348] sm:$0xf]  ;;  %289 = vst [vmem:[%s1490_s27 + $0x110] sm:$0xf] %v288_v4 }
  0x43   : > { %291 = vst [vmem:[%s1490_s27 + $0x114] sm:$0xf] %v290_v5  ;;  %293 = vst [vmem:[%s1490_s27 + $0x118] sm:$0xf] %v292_v6  ;;  %v294_v7 = vld [vmem:[%s1483_s26 + $0x354] sm:$0xf] }
  0x44   : > { %295 = vst [vmem:[%s1490_s27 + $0x11c] sm:$0xf] %v294_v7 }
  0x45 PF: > { %p1200_p7 = scmp.ge.s32.totalorder %s1420_s14, 1  ;;  %p461_p8 = scmp.lt.s32.totalorder %s1420_s14, 4 }
  0x47   : > { %p462_p9 = pnand %p1200_p7, %p461_p8 }
  0x48   : > { %s468_s28 = sand.u32 (!%p462_p9), 1, %s1412_s12   ;;  %v1637_v8 = vld [vmem:[%s1788_s1 + $0x4] ss:$8 sps:$4 sm:$0xff] (!%p462_p9)   ;;  %v1422_v9 = vmov (!%p462_p9), 0   ;;  %vm609_vm0 = vcmask (!%p462_p9), 130048   ;;  %v497_v12 = vld [vmem:[%s1789_s2 + $0x10] sm:$0xff] (!%p462_p9) }
  0x49   : > { %465 = sbr.rel (%p462_p9) target bundleno = 391 (0x187), region = 69  ;;  %616 = vmatprep.subr.bf16.mxu0 (!%p462_p9), %v1422_v9  ;;  %742 = vmatprep.subr.bf16.mxu1 (!%p462_p9), %v1422_v9  ;;  %v495_v10 = vld [vmem:[%s1789_s2] sm:$0xff] (!%p462_p9)  ;;  %v496_v11 = vld [vmem:[%s1789_s2 + $0x8] sm:$0xff] (!%p462_p9)  ;;  %v498_v14 = vld [vmem:[%s1789_s2 + $0x18] sm:$0xff] (!%p462_p9)  ;;  %s1201_s27 = sshll.u32 (!%p462_p9), %s468_s28, 4 }
  0x4a   : > { %s1328_s4 = smul.u32 (!%p462_p9), 288, %s468_s28  ;;  %1215 = vmatprep.mubr.msk.bf16.mxu0 (!%p462_p9), %vm609_vm0, %v1637_v8  ;;  %1244 = vmatprep.mubr.msk.bf16.mxu1 (!%p462_p9), %vm609_vm0, %v1637_v8  ;;  %v1700_v32 = vld [vmem:[%s1788_s1] ss:$8 sps:$4 sm:$0xff] (!%p462_p9)   ;;  %v1709_v35 = vld [vmem:[%s1788_s1 + $0x14] ss:$8 sps:$4 sm:$0xff] (!%p462_p9)   ;;  %s489_s12 = scalar_lea.vmem (!%p462_p9), [#allocation3], %s1201_s27 }
  0x4b   : > { %1354 = vset.pattern.permute.xlu0 (!%p462_p9), %v1422_v9  ;;  %1355 = vset.pattern.permute.xlu1 (!%p462_p9), %v1422_v9  ;;  %v1391_v38 = vld [vmem:[%s1788_s1 + $0x10] ss:$8 sps:$4 sm:$0xff] (!%p462_p9)  }
  0x4c   : > { %s1658_s11 = scalar_lea.vmem (!%p462_p9), [#allocation2], %s1328_s4  ;;  %519 = vperm.xlu0 (!%p462_p9), %1354, %v495_v10   ;;  %529 = vperm.xlu1 (!%p462_p9), %1355, %v497_v12  }
  0x4d   : > { %v1356_v13 = vld [vmem:[%s1658_s11] sm:$0xff] (!%p462_p9)   ;;  %v1357_v15 = vld [vmem:[%s1658_s11 + $0x48] sm:$0xff] (!%p462_p9)   ;;  %v1359_v17 = vld [vmem:[%s1658_s11 + $0x50] sm:$0xff] (!%p462_p9)  }
  0x4e   : > { %617 = vmatpush1.bf16.msra.mxu0 (!%p462_p9), %v1356_v13  ;;  %v1358_v16 = vld [vmem:[%s1658_s11 + $0x8] sm:$0xff] (!%p462_p9)   ;;  %743 = vmatpush1.bf16.msra.mxu1 (!%p462_p9), %v1357_v15  ;;  %v1360_v18 = vld [vmem:[%s1658_s11 + $0x10] sm:$0xff] (!%p462_p9)   ;;  %v1361_v19 = vld [vmem:[%s1658_s11 + $0x58] sm:$0xff] (!%p462_p9)  }
  0x4f   : > { %618 = vmatprep.subr.bf16.mxu0 (!%p462_p9), %v1422_v9  ;;  %744 = vmatprep.subr.bf16.mxu1 (!%p462_p9), %v1422_v9  ;;  %v1362_v20 = vld [vmem:[%s1658_s11 + $0x18] sm:$0xff] (!%p462_p9)   ;;  %v1363_v21 = vld [vmem:[%s1658_s11 + $0x60] sm:$0xff] (!%p462_p9)   ;;  %v1365_v23 = vld [vmem:[%s1658_s11 + $0x68] sm:$0xff] (!%p462_p9)  }
  0x50   : > { %524 = vperm.xlu0 %1354, %v496_v11   ;;  %534 = vperm.xlu1 %1355, %v498_v14   ;;  %v1364_v22 = vld [vmem:[%s1658_s11 + $0x20] sm:$0xff]   ;;  %v1366_v24 = vld [vmem:[%s1658_s11 + $0x28] sm:$0xff]   ;;  %v1367_v25 = vld [vmem:[%s1658_s11 + $0x70] sm:$0xff]   ;;  %s1309_s28 = sshll.u32 (%p1473_p5), %s1195_s15, 2 }
  0x51   : > { %v1368_v26 = vld [vmem:[%s1658_s11 + $0x30] sm:$0xff]   ;;  %v1369_v27 = vld [vmem:[%s1658_s11 + $0x78] sm:$0xff]   ;;  %v1371_v29 = vld [vmem:[%s1658_s11 + $0x80] sm:$0xff]   ;;  %s1087_s4 = scalar_lea.vmem (%p1473_p5), %s1790_s3, %s1309_s28 }
  0x52   : > { %619 = vmatpush1.bf16.msra.mxu0 %v1358_v16  ;;  %745 = vmatpush1.bf16.msra.mxu1 %v1359_v17  ;;  %v1370_v28 = vld [vmem:[%s1658_s11 + $0x38] sm:$0xff]   ;;  %v1372_v30 = vld [vmem:[%s1658_s11 + $0x40] sm:$0xff]   ;;  %v1373_v31 = vld [vmem:[%s1658_s11 + $0x88] sm:$0xff]  }
  0x53   : > { %620 = vmatprep.subr.bf16.mxu0 %v1422_v9  ;;  %746 = vmatprep.subr.bf16.mxu1 %v1422_v9  ;;  %v1377_v33 = vld [vmem:[%s1658_s11 + $0x90] sm:$0xff]   ;;  %v1378_v34 = vld [vmem:[%s1658_s11 + $0xd8] sm:$0xff]   ;;  %v1380_v37 = vld [vmem:[%s1658_s11 + $0xe0] sm:$0xff]  }
  0x54   : > { %v1379_v36 = vld [vmem:[%s1658_s11 + $0x98] sm:$0xff]   ;;  %v1381_v39 = vld [vmem:[%s1658_s11 + $0xa0] sm:$0xff]   ;;  %v1382_v40 = vld [vmem:[%s1658_s11 + $0xe8] sm:$0xff]  }
  0x55   : > { %v1383_v41 = vld [vmem:[%s1658_s11 + $0xa8] sm:$0xff]   ;;  %v1384_v42 = vld [vmem:[%s1658_s11 + $0xf0] sm:$0xff]   ;;  %v1386_v44 = vld [vmem:[%s1658_s11 + $0xf8] sm:$0xff]  }
  0x56   : > { %621 = vmatpush1.bf16.msra.mxu0 %v1360_v18  ;;  %747 = vmatpush1.bf16.msra.mxu1 %v1361_v19  ;;  %v1385_v43 = vld [vmem:[%s1658_s11 + $0xb0] sm:$0xff]   ;;  %v1387_v45 = vld [vmem:[%s1658_s11 + $0xb8] sm:$0xff]   ;;  %v1388_v46 = vld [vmem:[%s1658_s11 + $0x100] sm:$0xff]  }
  0x57   : > { %622 = vmatprep.subr.bf16.mxu0 %v1422_v9  ;;  %748 = vmatprep.subr.bf16.mxu1 %v1422_v9  ;;  %v1392_v47 = vld [vmem:[%s1658_s11 + $0xc0] sm:$0xff]   ;;  %v1393_v48 = vld [vmem:[%s1658_s11 + $0x108] sm:$0xff]   ;;  %v1395_v50 = vld [vmem:[%s1658_s11 + $0x110] sm:$0xff]  }
  0x58   : > { %v1394_v49 = vld [vmem:[%s1658_s11 + $0xc8] sm:$0xff]   ;;  %v1396_v51 = vld [vmem:[%s1658_s11 + $0xd0] sm:$0xff]   ;;  %v1397_v52 = vld [vmem:[%s1658_s11 + $0x118] sm:$0xff]  }
  0x5a   : > { %623 = vmatpush1.bf16.msra.mxu0 %v1362_v20  ;;  %749 = vmatpush1.bf16.msra.mxu1 %v1363_v21 }
  0x5b   : > { %624 = vmatprep.subr.bf16.mxu0 %v1422_v9  ;;  %750 = vmatprep.subr.bf16.mxu1 %v1422_v9 }
  0x5e   : > { %625 = vmatpush1.bf16.msra.mxu0 %v1364_v22  ;;  %751 = vmatpush1.bf16.msra.mxu1 %v1365_v23 }
  0x5f   : > { %626 = vmatprep.subr.bf16.mxu0 %v1422_v9  ;;  %752 = vmatprep.subr.bf16.mxu1 %v1422_v9 }
  0x62   : > { %627 = vmatpush1.bf16.msra.mxu0 %v1366_v24  ;;  %753 = vmatpush1.bf16.msra.mxu1 %v1367_v25 }
  0x63   : > { %628 = vmatprep.subr.bf16.mxu0 %v1422_v9  ;;  %754 = vmatprep.subr.bf16.mxu1 %v1422_v9 }
  0x66   : > { %629 = vmatpush1.bf16.msra.mxu0 %v1368_v26  ;;  %755 = vmatpush1.bf16.msra.mxu1 %v1369_v27 }
  0x67   : > { %630 = vmatprep.subr.bf16.mxu0 %v1422_v9  ;;  %756 = vmatprep.subr.bf16.mxu1 %v1422_v9 }
  0x6a   : > { %631 = vmatpush1.bf16.msra.mxu0 %v1370_v28  ;;  %757 = vmatpush1.bf16.msra.mxu1 %v1371_v29 }
  0x6b   : > { %632 = vmatprep.subr.bf16.mxu0 %v1422_v9  ;;  %758 = vmatprep.subr.bf16.mxu1 %v1422_v9 }
  0x6e   : > { %633 = vmatpush1.bf16.msra.mxu0 %v1372_v30  ;;  %759 = vmatpush1.bf16.msra.mxu1 %v1373_v31 }
  0x6f   : > { %872 = vmatprep.subr.bf16.mxu0 %v1422_v9  ;;  %998 = vmatprep.subr.bf16.mxu1 %v1422_v9 }
  0x71   : > { %649 = vmatmul.mubr.bf16.vlgmr.msra.gmra.mrb[0].mxu0 %v1700_v32  ;;  %775 = vmatmul.mubr.bf16.vlgmr.msra.gmra.mrb[0].mxu1 %v1700_v32 }
  0x72   : > { %873 = vmatpush1.bf16.msra.mxu0 %v1377_v33  ;;  %999 = vmatpush1.bf16.msra.mxu1 %v1378_v34 }
  0x73   : > { %874 = vmatprep.subr.bf16.mxu0 %v1422_v9  ;;  %1000 = vmatprep.subr.bf16.mxu1 %v1422_v9 }
  0x74   : > { %1216 = vmatprep.mubr.msk.bf16.mxu0 %vm609_vm0, %v1709_v35  ;;  %1245 = vmatprep.mubr.msk.bf16.mxu1 %vm609_vm0, %v1709_v35 }
  0x76   : > { %875 = vmatpush1.bf16.msra.mxu0 %v1379_v36  ;;  %1001 = vmatpush1.bf16.msra.mxu1 %v1380_v37 }
  0x77   : > { %876 = vmatprep.subr.bf16.mxu0 %v1422_v9  ;;  %1002 = vmatprep.subr.bf16.mxu1 %v1422_v9 }
  0x79   : > { %657 = vmatmul.mubr.bf16.gmra.mrb[4].mxu0 %v1391_v38  ;;  %783 = vmatmul.mubr.bf16.gmra.mrb[4].mxu1 %v1391_v38 }
  0x7a   : > { %877 = vmatpush1.bf16.msra.mxu0 %v1381_v39  ;;  %1003 = vmatpush1.bf16.msra.mxu1 %v1382_v40 }
  0x7b   : > { %878 = vmatprep.subr.bf16.mxu0 %v1422_v9  ;;  %1004 = vmatprep.subr.bf16.mxu1 %v1422_v9 }
  0x7c   : > { %1273 = vmatprep.mubr.msk.bf16.mxu0 %vm609_vm0, %v1637_v8  ;;  %1302 = vmatprep.mubr.msk.bf16.mxu1 %vm609_vm0, %v1637_v8 }
  0x7e   : > { %879 = vmatpush1.bf16.msra.mxu0 %v1383_v41  ;;  %1005 = vmatpush1.bf16.msra.mxu1 %v1384_v42 }
  0x7f   : > { %880 = vmatprep.subr.bf16.mxu0 %v1422_v9  ;;  %1006 = vmatprep.subr.bf16.mxu1 %v1422_v9 }
  0x82   : > { %881 = vmatpush1.bf16.msra.mxu0 %v1385_v43  ;;  %1007 = vmatpush1.bf16.msra.mxu1 %v1386_v44 }
  0x83   : > { %882 = vmatprep.subr.bf16.mxu0 %v1422_v9  ;;  %1008 = vmatprep.subr.bf16.mxu1 %v1422_v9 }
  0x86   : > { %883 = vmatpush1.bf16.msra.mxu0 %v1387_v45  ;;  %1009 = vmatpush1.bf16.msra.mxu1 %v1388_v46 }
  0x87   : > { %884 = vmatprep.subr.bf16.mxu0 %v1422_v9  ;;  %1010 = vmatprep.subr.bf16.mxu1 %v1422_v9 }
  0x8a   : > { %885 = vmatpush1.bf16.msra.mxu0 %v1392_v47  ;;  %1011 = vmatpush1.bf16.msra.mxu1 %v1393_v48 }
  0x8b   : > { %886 = vmatprep.subr.bf16.mxu0 %v1422_v9  ;;  %1012 = vmatprep.subr.bf16.mxu1 %v1422_v9 }
  0x8e   : > { %887 = vmatpush1.bf16.msra.mxu0 %v1394_v49  ;;  %1013 = vmatpush1.bf16.msra.mxu1 %v1395_v50 }
  0x8f   : > { %888 = vmatprep.subr.bf16.mxu0 %v1422_v9  ;;  %1014 = vmatprep.subr.bf16.mxu1 %v1422_v9 }
  0x92   : > { %889 = vmatpush1.bf16.msra.mxu0 %v1396_v51  ;;  %1015 = vmatpush1.bf16.msra.mxu1 %v1397_v52 }
  0x95   : > { %905 = vmatmul.mubr.bf16.vlgmr.msra.gmra.mrb[8].mxu0 %v1700_v32  ;;  %1031 = vmatmul.mubr.bf16.vlgmr.msra.gmra.mrb[8].mxu1 %v1700_v32 }
  0x96   : > { %1274 = vmatprep.mubr.msk.bf16.mxu0 %vm609_vm0, %v1709_v35  ;;  %1303 = vmatprep.mubr.msk.bf16.mxu1 %vm609_vm0, %v1709_v35 }
  0x9d   : > { %913 = vmatmul.mubr.bf16.gmra.mrb[12].mxu0 %v1391_v38  ;;  %1039 = vmatmul.mubr.bf16.gmra.mrb[12].mxu1 %v1391_v38 }
  0xcb   : > { %v520_v53 = vpop.permute.xlu0 %519  ;;  %v1762_v54 = vpop.permute.xlu1 %529 }
  0xcf   : > { %v525_v56 = vpop.permute.xlu0 %524  ;;  %v535_v11 = vpop.permute.xlu1 %534 }
 0x144   : > { %v650_v55 = vpop.f32.mrb[0].mxu0  ;;  %v776_v58 = vpop.f32.mrb[0].mxu1 }
 0x145   : > { %v651_v57 = vadd.f32 %v650_v55, %v520_v53  ;;  %v652_v59 = vpop.f32.mrb[1].mxu0  ;;  %v777_v60 = vadd.f32 %v776_v58, %v520_v53  ;;  %v778_v61 = vpop.f32.mrb[1].mxu1 }
 0x146   : > { %v653_v62 = vpop.f32.mrb[2].mxu0  ;;  %v779_v1 = vpop.f32.mrb[2].mxu1 }
 0x147   : > { %v665_v63 = vmax.f32 %v651_v57, 0.0  ;;  %v654_v0 = vadd.f32 %v653_v62, %v525_v56  ;;  %v655_v2 = vpop.f32.mrb[3].mxu0  ;;  %v791_v3 = vmax.f32 %v777_v60, 0.0  ;;  %v780_v4 = vadd.f32 %v779_v1, %v525_v56  ;;  %v781_v5 = vpop.f32.mrb[3].mxu1 }
 0x149   : > { %v666_v6 = vmax.f32 %v654_v0, 0.0  ;;  %v795_v7 = vmax.f32 %v665_v63, %v791_v3  ;;  %v792_v8 = vmax.f32 %v780_v4, 0.0 }
 0x14b   : > { %v796_v9 = vmax.f32 %v666_v6, %v792_v8 }
 0x14c   : > { %v658_v10 = vpop.f32.mrb[4].mxu0  ;;  %v784_v13 = vpop.f32.mrb[4].mxu1 }
 0x14d   : > { %v659_v12 = vadd.f32 %v658_v10, %v1762_v54  ;;  %v660_v14 = vpop.f32.mrb[5].mxu0  ;;  %v785_v15 = vadd.f32 %v784_v13, %v1762_v54  ;;  %v786_v16 = vpop.f32.mrb[5].mxu1 }
 0x14e   : > { %v661_v17 = vpop.f32.mrb[6].mxu0  ;;  %v787_v19 = vpop.f32.mrb[6].mxu1 }
 0x14f   : > { %v667_v18 = vmax.f32 %v659_v12, 0.0  ;;  %v662_v20 = vadd.f32 %v661_v17, %v535_v11  ;;  %v663_v21 = vpop.f32.mrb[7].mxu0  ;;  %v793_v22 = vmax.f32 %v785_v15, 0.0  ;;  %v788_v23 = vadd.f32 %v787_v19, %v535_v11  ;;  %v789_v24 = vpop.f32.mrb[7].mxu1 }
 0x151   : > { %v668_v25 = vmax.f32 %v662_v20, 0.0  ;;  %v797_v26 = vmax.f32 %v667_v18, %v793_v22  ;;  %v794_v27 = vmax.f32 %v788_v23, 0.0 }
 0x153   : > { %v798_v28 = vmax.f32 %v668_v25, %v794_v27 }
 0x168   : > { %v906_v29 = vpop.f32.mrb[8].mxu0  ;;  %v1032_v31 = vpop.f32.mrb[8].mxu1 }
 0x169   : > { %v907_v30 = vadd.f32 %v906_v29, %v520_v53  ;;  %v908_v32 = vpop.f32.mrb[9].mxu0  ;;  %v1033_v33 = vadd.f32 %v1032_v31, %v520_v53  ;;  %v1034_v34 = vpop.f32.mrb[9].mxu1 }
 0x16a   : > { %v909_v35 = vpop.f32.mrb[10].mxu0  ;;  %v1035_v38 = vpop.f32.mrb[10].mxu1 }
 0x16b   : > { %v921_v36 = vmax.f32 %v907_v30, 0.0  ;;  %v910_v37 = vadd.f32 %v909_v35, %v525_v56  ;;  %v911_v39 = vpop.f32.mrb[11].mxu0  ;;  %v1047_v40 = vmax.f32 %v1033_v33, 0.0  ;;  %v1036_v41 = vadd.f32 %v1035_v38, %v525_v56  ;;  %v1037_v42 = vpop.f32.mrb[11].mxu1 }
 0x16d   : > { %v922_v43 = vmax.f32 %v910_v37, 0.0  ;;  %v1051_v44 = vmax.f32 %v921_v36, %v1047_v40  ;;  %v1048_v45 = vmax.f32 %v1036_v41, 0.0 }
 0x16f   : > { %v1055_v46 = vmax.f32 %v795_v7, %v1051_v44  ;;  %v1052_v47 = vmax.f32 %v922_v43, %v1048_v45 }
 0x170   : > { %v914_v48 = vpop.f32.mrb[12].mxu0  ;;  %v1040_v50 = vpop.f32.mrb[12].mxu1 }
 0x171   : > { %v915_v49 = vadd.f32 %v914_v48, %v1762_v54  ;;  %v916_v51 = vpop.f32.mrb[13].mxu0  ;;  %v1056_v52 = vmax.f32 %v796_v9, %v1052_v47  ;;  %v1041_v53 = vadd.f32 %v1040_v50, %v1762_v54  ;;  %v1042_v55 = vpop.f32.mrb[13].mxu1 }
 0x172   : > { %v917_v57 = vpop.f32.mrb[14].mxu0  ;;  %v1043_v59 = vpop.f32.mrb[14].mxu1 }
 0x173   : > { %v923_v58 = vmax.f32 %v915_v49, 0.0  ;;  %v918_v56 = vadd.f32 %v917_v57, %v535_v11  ;;  %v919_v60 = vpop.f32.mrb[15].mxu0  ;;  %v1319_v61 = vpack.c.bf16 %v1056_v52, %v1055_v46  ;;  %v1049_v62 = vmax.f32 %v1041_v53, 0.0  ;;  %v1045_v0 = vpop.f32.mrb[15].mxu1 }
 0x174   : > { %v1044_v63 = vadd.f32 %v1043_v59, %v535_v11 }
 0x175   : > { %v924_v1 = vmax.f32 %v918_v56, 0.0  ;;  %1320 = vst [vmem:[%s489_s12] sm:$0xff] %v1319_v61   ;;  %v1053_v2 = vmax.f32 %v923_v58, %v1049_v62 }
 0x176   : > { %v1050_v3 = vmax.f32 %v1044_v63, 0.0 }
 0x177   : > { %v1057_v4 = vmax.f32 %v797_v26, %v1053_v2 }
 0x178   : > { %v1054_v5 = vmax.f32 %v924_v1, %v1050_v3  ;;  %1085 = sbr.rel (!%p1473_p5) target bundleno = 391 (0x187), region = 77 }
 0x17a   : > { %v1058_v6 = vmax.f32 %v798_v28, %v1054_v5 }
 0x17c   : > { %v1324_v7 = vpack.c.bf16 %v1058_v6, %v1057_v4  ;;  %v1103_v54 = vld [vmem:[%s489_s12] sm:$0xf] (%p1473_p5)  ;;  %v1105_v8 = vld [vmem:[%s489_s12 + $0x4] sm:$0xf] (%p1473_p5) }
 0x17d   : > { %1104 = vst [vmem:[%s1087_s4] sm:$0xf] (%p1473_p5), %v1103_v54  ;;  %1106 = vst [vmem:[%s1087_s4 + $0xc] sm:$0xf] (%p1473_p5), %v1105_v8 }
 0x17e   : > { %1326 = vst [vmem:[%s489_s12 + $0x8] sm:$0xff] %v1324_v7  }
 0x185   : > { %v1107_v9 = vld [vmem:[%s489_s12 + $0x8] sm:$0xf]  ;;  %v1109_v10 = vld [vmem:[%s489_s12 + $0xc] sm:$0xf] }
 0x186   : > { %1108 = vst [vmem:[%s1087_s4 + $0x18] sm:$0xf] %v1107_v9  ;;  %1110 = vst [vmem:[%s1087_s4 + $0x24] sm:$0xf] %v1109_v10 }
 0x187 PF: > { %p10_p10 = scmp.ge.s32.totalorder %s1460_s16, 5   ;;  %s1792_s12 = smov %s1416_s13 }
 0x188   : > { %s1793_s13 = smov %s1471_s19  ;;  %s1794_s14 = smov %s1460_s16 }
 0x189   :  { %12 = sbr.rel (!%p10_p10) target bundleno = 2 (0x2), region = 152 }

// kernel: cnn_forward.6
= control target key start
LH: loop header
LB: loop body
LE: loop exit
PB: predicated region body
PF: predicated region fallthrough
CT: control target
= control target key end

     0   :  { %v1921_v1 = vmov 0   ;;  %vm283_vm0 = vcmask 261120   ;;  %s2456_s0 = inlined_call_operand.vmem [shape: bf16[4,288,128], index: 0, kind: input, shape index: {}]   ;;  %s2457_s1 = inlined_call_operand.vmem [shape: bf16[64,288], index: 1, kind: input, shape index: {}]   ;;  %s2458_s2 = inlined_call_operand.vmem [shape: f32[64,1], index: 2, kind: input, shape index: {}]   ;;  %s2459_s3 = inlined_call_operand.vmem [shape: bf16[64,128], index: 3, kind: output, shape index: {}]  }
   0x1   :  { %v1833_v0 = vld [vmem:[%s2456_s0 + $0x40] sm:$0xff]   ;;  %1831 = vset.pattern.permute.xlu0 %v1921_v1  ;;  %1832 = vset.pattern.permute.xlu1 %v1921_v1  ;;  %v1834_v2 = vld [vmem:[%s2456_s0 + $0xd0] sm:$0xff]   ;;  %v1837_v5 = vld [vmem:[%s2456_s0 + $0x48] sm:$0xff]  }
   0x2   :  { %1598 = vmatprep.subr.bf16.mxu0 %v1833_v0  ;;  %v1835_v3 = vld [vmem:[%s2456_s0] sm:$0xff]   ;;  %1644 = vmatprep.subr.bf16.mxu1 %v1834_v2  ;;  %v1836_v4 = vld [vmem:[%s2456_s0 + $0x90] sm:$0xff]   ;;  %v1838_v6 = vld [vmem:[%s2456_s0 + $0xd8] sm:$0xff]  }
   0x3   :  { %1599 = vmatpush3.bf16.msra.mxu0 %v1835_v3  ;;  %1645 = vmatpush3.bf16.msra.mxu1 %v1836_v4  ;;  %v1839_v7 = vld [vmem:[%s2456_s0 + $0x8] sm:$0xff]   ;;  %v1840_v8 = vld [vmem:[%s2456_s0 + $0x98] sm:$0xff]   ;;  %v1841_v9 = vld [vmem:[%s2456_s0 + $0x50] sm:$0xff]  }
   0x4   :  { %1600 = vmatprep.subr.bf16.mxu0 %v1837_v5  ;;  %1646 = vmatprep.subr.bf16.mxu1 %v1838_v6  ;;  %v1842_v10 = vld [vmem:[%s2456_s0 + $0xe0] sm:$0xff]   ;;  %v1843_v11 = vld [vmem:[%s2456_s0 + $0x10] sm:$0xff]   ;;  %v1845_v13 = vld [vmem:[%s2456_s0 + $0x58] sm:$0xff]  }
   0x5   :  { %v1844_v12 = vld [vmem:[%s2456_s0 + $0xa0] sm:$0xff]   ;;  %v1846_v14 = vld [vmem:[%s2456_s0 + $0xe8] sm:$0xff]   ;;  %v1847_v15 = vld [vmem:[%s2456_s0 + $0x18] sm:$0xff]  }
   0x6   :  { %v1848_v16 = vld [vmem:[%s2456_s0 + $0xa8] sm:$0xff]   ;;  %v1849_v17 = vld [vmem:[%s2456_s0 + $0x60] sm:$0xff]   ;;  %v1850_v18 = vld [vmem:[%s2456_s0 + $0xf0] sm:$0xff]  }
   0x7   :  { %1601 = vmatpush3.bf16.msra.mxu0 %v1839_v7  ;;  %1647 = vmatpush3.bf16.msra.mxu1 %v1840_v8  ;;  %v1851_v19 = vld [vmem:[%s2456_s0 + $0x20] sm:$0xff]   ;;  %v1852_v20 = vld [vmem:[%s2456_s0 + $0xb0] sm:$0xff]   ;;  %v1853_v21 = vld [vmem:[%s2456_s0 + $0x68] sm:$0xff]  }
   0x8   :  { %1602 = vmatprep.subr.bf16.mxu0 %v1841_v9  ;;  %1648 = vmatprep.subr.bf16.mxu1 %v1842_v10  ;;  %v1854_v22 = vld [vmem:[%s2456_s0 + $0xf8] sm:$0xff]   ;;  %v1855_v23 = vld [vmem:[%s2456_s0 + $0x28] sm:$0xff]   ;;  %v1857_v25 = vld [vmem:[%s2456_s0 + $0x70] sm:$0xff]  }
   0x9   :  { %v1856_v24 = vld [vmem:[%s2456_s0 + $0xb8] sm:$0xff]   ;;  %v1858_v26 = vld [vmem:[%s2456_s0 + $0x100] sm:$0xff]   ;;  %v1859_v27 = vld [vmem:[%s2456_s0 + $0x30] sm:$0xff]  }
   0xa   :  { %v1860_v28 = vld [vmem:[%s2456_s0 + $0xc0] sm:$0xff]   ;;  %v1861_v29 = vld [vmem:[%s2456_s0 + $0x78] sm:$0xff]   ;;  %v1862_v30 = vld [vmem:[%s2456_s0 + $0x108] sm:$0xff]  }
   0xb   :  { %1603 = vmatpush3.bf16.msra.mxu0 %v1843_v11  ;;  %1649 = vmatpush3.bf16.msra.mxu1 %v1844_v12  ;;  %v1863_v31 = vld [vmem:[%s2456_s0 + $0x38] sm:$0xff]   ;;  %v1864_v32 = vld [vmem:[%s2456_s0 + $0xc8] sm:$0xff]   ;;  %v2041_v33 = vld [vmem:[%s2457_s1 + $0x4] ss:$12 sps:$4 sm:$0xff]  }
   0xc   :  { %1604 = vmatprep.subr.bf16.mxu0 %v1845_v13  ;;  %1650 = vmatprep.subr.bf16.mxu1 %v1846_v14  ;;  %v2046_v34 = vld [vmem:[%s2457_s1] ss:$12 sps:$4 sm:$0xff]   ;;  %v2070_v40 = vld [vmem:[%s2457_s1 + $0x1c] ss:$12 sps:$4 sm:$0xff]   ;;  %v2075_v41 = vld [vmem:[%s2457_s1 + $0x18] ss:$12 sps:$4 sm:$0xff]  }
   0xd   :  { %328 = vmatprep.mubr.bf16.mxu0 %v2041_v33  ;;  %611 = vmatprep.mubr.bf16.mxu1 %v2041_v33  ;;  %v1868_v35 = vld [vmem:[%s2456_s0 + $0x160] sm:$0xff]   ;;  %v1871_v38 = vld [vmem:[%s2456_s0 + $0x168] sm:$0xff]   ;;  %v1876_v42 = vld [vmem:[%s2456_s0 + $0x170] sm:$0xff]  }
   0xe   :  { %v1869_v36 = vld [vmem:[%s2456_s0 + $0x120] sm:$0xff]   ;;  %v1872_v39 = vld [vmem:[%s2456_s0 + $0x128] sm:$0xff]   ;;  %v1877_v43 = vld [vmem:[%s2456_s0 + $0x130] sm:$0xff]  }
   0xf   :  { %1605 = vmatpush3.bf16.msra.mxu0 %v1847_v15  ;;  %1651 = vmatpush3.bf16.msra.mxu1 %v1848_v16  ;;  %v1870_v37 = vld [vmem:[%s2456_s0 + $0x80] sm:$0xff]   ;;  %v1878_v44 = vld [vmem:[%s2456_s0 + $0x178] sm:$0xff]   ;;  %v1885_v49 = vld [vmem:[%s2456_s0 + $0x88] sm:$0xff]  }
  0x10   :  { %1606 = vmatprep.subr.bf16.mxu0 %v1849_v17  ;;  %1652 = vmatprep.subr.bf16.mxu1 %v1850_v18  ;;  %v1879_v45 = vld [vmem:[%s2456_s0 + $0x138] sm:$0xff]   ;;  %v2096_v46 = vld [vmem:[%s2457_s1 + $0x34] ss:$12 sps:$4 sm:$0xff]   ;;  %v1886_v51 = vld [vmem:[%s2456_s0 + $0x188] sm:$0xff]  }
  0x11   :  { %v2101_v47 = vld [vmem:[%s2457_s1 + $0x30] ss:$12 sps:$4 sm:$0xff]   ;;  %v1883_v48 = vld [vmem:[%s2456_s0 + $0x180] sm:$0xff]   ;;  %v2120_v52 = vld [vmem:[%s2457_s1 + $0x4c] ss:$12 sps:$4 sm:$0xff]  }
  0x12   :  { %v1884_v50 = vld [vmem:[%s2456_s0 + $0x140] sm:$0xff]   ;;  %v1887_v53 = vld [vmem:[%s2456_s0 + $0x148] sm:$0xff]   ;;  %v1891_v54 = vld [vmem:[%s2456_s0 + $0x190] sm:$0xff]  }
  0x13   :  { %1607 = vmatpush3.bf16.msra.mxu0 %v1851_v19  ;;  %1653 = vmatpush3.bf16.msra.mxu1 %v1852_v20  ;;  %v2135_v55 = vld [vmem:[%s2457_s1 + $0x48] ss:$12 sps:$4 sm:$0xff]   ;;  %v1893_v58 = vld [vmem:[%s2456_s0 + $0x198] sm:$0xff]   ;;  %v2165_v62 = vld [vmem:[%s2457_s1 + $0x20] ss:$12 sps:$4 sm:$0xff]  }
  0x14   :  { %1608 = vmatprep.subr.bf16.mxu0 %v1853_v21  ;;  %1654 = vmatprep.subr.bf16.mxu1 %v1854_v22  ;;  %v2140_v56 = vld [vmem:[%s2457_s1 + $0x8] ss:$12 sps:$4 sm:$0xff]   ;;  %v1894_v60 = vld [vmem:[%s2456_s0 + $0x158] sm:$0xff]   ;;  %v1904_v4 = vld [vmem:[%s2456_s0 + $0x200] sm:$0xff]  }
  0x15   :  { %v1892_v57 = vld [vmem:[%s2456_s0 + $0x150] sm:$0xff]   ;;  %v2173_v0 = vld [vmem:[%s2457_s1 + $0x38] ss:$12 sps:$4 sm:$0xff]   ;;  %v1907_v8 = vld [vmem:[%s2456_s0 + $0x208] sm:$0xff]  }
  0x16   :  { %v1899_v59 = vld [vmem:[%s2456_s0 + $0x110] sm:$0xff]   ;;  %v1900_v1 = vld [vmem:[%s2456_s0 + $0x1f8] sm:$0xff]   ;;  %v1911_v6 = vld [vmem:[%s2456_s0 + $0x1a0] sm:$0xff]  }
  0x17   :  { %1609 = vmatpush3.bf16.msra.mxu0 %v1855_v23  ;;  %1655 = vmatpush3.bf16.msra.mxu1 %v1856_v24  ;;  %v1897_v61 = vld [vmem:[%s2456_s0 + $0x1f0] sm:$0xff]   ;;  %v1906_v2 = vld [vmem:[%s2456_s0 + $0x118] sm:$0xff]   ;;  %v1905_v7 = vld [vmem:[%s2456_s0 + $0x1c0] sm:$0xff]  }
  0x18   :  { %1610 = vmatprep.subr.bf16.mxu0 %v1857_v25  ;;  %1656 = vmatprep.subr.bf16.mxu1 %v1858_v26  ;;  %v1898_v63 = vld [vmem:[%s2456_s0 + $0x1b0] sm:$0xff]   ;;  %v1901_v3 = vld [vmem:[%s2456_s0 + $0x1b8] sm:$0xff]   ;;  %v1908_v9 = vld [vmem:[%s2456_s0 + $0x1c8] sm:$0xff]  }
  0x19   :  { %v2196_v5 = vld [vmem:[%s2457_s1 + $0x50] ss:$12 sps:$4 sm:$0xff]   ;;  %v31_v12 = vld [vmem:[%s2458_s2] sm:$0xff]  ;;  %v1916_v15 = vld [vmem:[%s2456_s0 + $0x1a8] sm:$0xff]  }
  0x1a   :  { %v1909_v10 = vld [vmem:[%s2456_s0 + $0x210] sm:$0xff]   ;;  %v1912_v13 = vld [vmem:[%s2456_s0 + $0x218] sm:$0xff]   ;;  %77 = vperm.xlu0 %1831, %v31_v12   ;;  %v32_v16 = vld [vmem:[%s2458_s2 + $0x8] sm:$0xff] }
  0x1b   :  { %1611 = vmatpush3.bf16.msra.mxu0 %v1859_v27  ;;  %1657 = vmatpush3.bf16.msra.mxu1 %v1860_v28  ;;  %v1910_v11 = vld [vmem:[%s2456_s0 + $0x1d0] sm:$0xff]   ;;  %v1913_v17 = vld [vmem:[%s2456_s0 + $0x1d8] sm:$0xff]   ;;  %v1914_v20 = vld [vmem:[%s2456_s0 + $0x220] sm:$0xff]  }
  0x1c   :  { %1612 = vmatprep.subr.bf16.mxu0 %v1861_v29  ;;  %1658 = vmatprep.subr.bf16.mxu1 %v1862_v30  ;;  %v33_v14 = vld [vmem:[%s2458_s2 + $0x10] sm:$0xff]  ;;  %v34_v19 = vld [vmem:[%s2458_s2 + $0x18] sm:$0xff]  ;;  %v35_v21 = vld [vmem:[%s2458_s2 + $0x20] sm:$0xff] }
  0x1d   :  { %87 = vperm.xlu1 %1832, %v33_v14   ;;  %v1919_v18 = vld [vmem:[%s2456_s0 + $0x230] sm:$0xff]   ;;  %v1915_v22 = vld [vmem:[%s2456_s0 + $0x1e0] sm:$0xff]   ;;  %v1917_v23 = vld [vmem:[%s2456_s0 + $0x228] sm:$0xff]  }
  0x1e   :  { %82 = vperm.xlu0 %1831, %v32_v16   ;;  %v36_v24 = vld [vmem:[%s2458_s2 + $0x28] sm:$0xff]  ;;  %v37_v25 = vld [vmem:[%s2458_s2 + $0x30] sm:$0xff]  ;;  %v38_v27 = vld [vmem:[%s2458_s2 + $0x38] sm:$0xff] }
  0x1f   :  { %1613 = vmatpush3.bf16.msra.mxu0 %v1863_v31  ;;  %1659 = vmatpush3.bf16.msra.mxu1 %v1864_v32  ;;  %v1918_v26 = vld [vmem:[%s2456_s0 + $0x1e8] sm:$0xff]   ;;  %v1920_v28 = vld [vmem:[%s2456_s0 + $0x238] sm:$0xff]  }
  0x20   :  { %1690 = vmatprep.subr.bf16.mxu1 %v1868_v35  ;;  %1782 = vmatprep.subr.bf16.mxu0 %v1870_v37 }
  0x21   :  { %92 = vperm.xlu1 %1832, %v34_v19  }
  0x22   :  { %329 = vmatmul.mubr.bf16.vlgmr.msra.gmra.mrb[0].mxu0 %v2046_v34  ;;  %612 = vmatmul.mubr.bf16.vlgmr.msra.gmra.mrb[0].mxu1 %v2046_v34 }
  0x23   :  { %1691 = vmatpush3.bf16.msra.mxu1 %v1869_v36  ;;  %1783 = vmatpush3.bf16.msra.mxu0 %v1870_v37 }
  0x24   :  { %1692 = vmatprep.subr.bf16.mxu1 %v1871_v38  ;;  %336 = vmatprep.mubr.bf16.mxu0 %v2070_v40 }
  0x25   :  { %619 = vmatprep.mubr.bf16.mxu1 %v2070_v40  ;;  %1784 = vmatprep.subr.bf16.mxu0 %v1885_v49 }
  0x26   :  { %97 = vperm.xlu0 %1831, %v35_v21   ;;  %102 = vperm.xlu1 %1832, %v36_v24  }
  0x27   :  { %1693 = vmatpush3.bf16.msra.mxu1 %v1872_v39  ;;  %1785 = vmatpush3.bf16.msra.mxu0 %v1885_v49 }
  0x28   :  { %1694 = vmatprep.subr.bf16.mxu1 %v1876_v42  ;;  %1794 = vmatprep.subr.bf16.mxu0 %v1899_v59 }
  0x2a   :  { %337 = vmatmul.mubr.bf16.gmra.mrb[4].mxu0 %v2075_v41  ;;  %620 = vmatmul.mubr.bf16.gmra.mrb[4].mxu1 %v2075_v41 }
  0x2b   :  { %1695 = vmatpush3.bf16.msra.mxu1 %v1877_v43  ;;  %344 = vmatprep.mubr.bf16.mxu0 %v2096_v46 }
  0x2c   :  { %1696 = vmatprep.subr.bf16.mxu1 %v1878_v44  ;;  %627 = vmatprep.mubr.bf16.mxu1 %v2096_v46 }
  0x2d   :  { %107 = vperm.xlu0 %1831, %v37_v25   ;;  %112 = vperm.xlu1 %1832, %v38_v27  }
  0x2f   :  { %1697 = vmatpush3.bf16.msra.mxu1 %v1879_v45 }
  0x30   :  { %1698 = vmatprep.subr.bf16.mxu1 %v1883_v48 }
  0x32   :  { %345 = vmatmul.mubr.bf16.gmra.mrb[8].mxu0 %v2101_v47  ;;  %628 = vmatmul.mubr.bf16.gmra.mrb[8].mxu1 %v2101_v47 }
  0x33   :  { %352 = vmatprep.mubr.bf16.mxu0 %v2120_v52  ;;  %1699 = vmatpush3.bf16.msra.mxu1 %v1884_v50 }
  0x34   :  { %635 = vmatprep.mubr.bf16.mxu1 %v2120_v52  ;;  %1700 = vmatprep.subr.bf16.mxu1 %v1886_v51 }
  0x37   :  { %1701 = vmatpush3.bf16.msra.mxu1 %v1887_v53 }
  0x38   :  { %1702 = vmatprep.subr.bf16.mxu1 %v1891_v54 }
  0x3a   :  { %353 = vmatmul.mubr.bf16.gmra.mrb[12].mxu0 %v2135_v55  ;;  %636 = vmatmul.mubr.bf16.gmra.mrb[12].mxu1 %v2135_v55 }
  0x3b   :  { %1786 = vmatprep.mubr.msk.bf16.mxu0 %vm283_vm0, %v2140_v56  ;;  %1703 = vmatpush3.bf16.msra.mxu1 %v1892_v57 }
  0x3c   :  { %902 = vmatprep.mubr.bf16.mxu1 %v2041_v33  ;;  %1704 = vmatprep.subr.bf16.mxu1 %v1893_v58 }
  0x3f   :  { %1705 = vmatpush3.bf16.msra.mxu1 %v1894_v60 }
  0x40   :  { %1736 = vmatprep.subr.bf16.mxu1 %v1897_v61 }
  0x42   :  { %1787 = vmatmul.mubr.msk.bf16.vlgmr.msra.gmra.mrb[16].mxu0 %vm283_vm0, %v2165_v62  ;;  %903 = vmatmul.mubr.bf16.vlgmr.msra.gmra.mrb[16].mxu1 %v2046_v34 }
  0x43   :  { %1795 = vmatpush3.bf16.msra.mxu0 %v1899_v59  ;;  %1737 = vmatpush3.bf16.msra.mxu1 %v1898_v63 }
  0x44   :  { %1790 = vmatprep.mubr.msk.bf16.mxu0 %vm283_vm0, %v2173_v0  ;;  %1738 = vmatprep.subr.bf16.mxu1 %v1900_v1 }
  0x45   :  { %910 = vmatprep.mubr.bf16.mxu1 %v2070_v40  ;;  %1796 = vmatprep.subr.bf16.mxu0 %v1906_v2 }
  0x47   :  { %1797 = vmatpush3.bf16.msra.mxu0 %v1906_v2  ;;  %1739 = vmatpush3.bf16.msra.mxu1 %v1901_v3 }
  0x48   :  { %1740 = vmatprep.subr.bf16.mxu1 %v1904_v4  ;;  %1806 = vmatprep.subr.bf16.mxu0 %v1911_v6 }
  0x4a   :  { %1791 = vmatmul.mubr.msk.bf16.gmra.mrb[20].mxu0 %vm283_vm0, %v2196_v5  ;;  %911 = vmatmul.mubr.bf16.gmra.mrb[20].mxu1 %v2075_v41 }
  0x4b   :  { %1798 = vmatprep.mubr.msk.bf16.mxu0 %vm283_vm0, %v2140_v56  ;;  %1741 = vmatpush3.bf16.msra.mxu1 %v1905_v7 }
  0x4c   :  { %918 = vmatprep.mubr.bf16.mxu1 %v2096_v46  ;;  %1742 = vmatprep.subr.bf16.mxu1 %v1907_v8 }
  0x4f   :  { %1743 = vmatpush3.bf16.msra.mxu1 %v1908_v9 }
  0x50   :  { %1744 = vmatprep.subr.bf16.mxu1 %v1909_v10 }
  0x52   :  { %1799 = vmatmul.mubr.msk.bf16.vlgmr.msra.gmra.mrb[24].mxu0 %vm283_vm0, %v2165_v62  ;;  %919 = vmatmul.mubr.bf16.gmra.mrb[24].mxu1 %v2101_v47 }
  0x53   :  { %1807 = vmatpush3.bf16.msra.mxu0 %v1911_v6  ;;  %1745 = vmatpush3.bf16.msra.mxu1 %v1910_v11 }
  0x54   :  { %1802 = vmatprep.mubr.msk.bf16.mxu0 %vm283_vm0, %v2173_v0  ;;  %1746 = vmatprep.subr.bf16.mxu1 %v1912_v13 }
  0x55   :  { %926 = vmatprep.mubr.bf16.mxu1 %v2120_v52  ;;  %1808 = vmatprep.subr.bf16.mxu0 %v1916_v15 }
  0x57   :  { %1809 = vmatpush3.bf16.msra.mxu0 %v1916_v15  ;;  %1747 = vmatpush3.bf16.msra.mxu1 %v1913_v17 }
  0x58   :  { %1818 = vmatprep.subr.bf16.mxu0 %v1919_v18  ;;  %1748 = vmatprep.subr.bf16.mxu1 %v1914_v20 }
  0x5a   :  { %1803 = vmatmul.mubr.msk.bf16.gmra.mrb[28].mxu0 %vm283_vm0, %v2196_v5  ;;  %927 = vmatmul.mubr.bf16.gmra.mrb[28].mxu1 %v2135_v55 }
  0x5b   :  { %1810 = vmatprep.mubr.msk.bf16.mxu0 %vm283_vm0, %v2140_v56  ;;  %1749 = vmatpush3.bf16.msra.mxu1 %v1915_v22 }
  0x5c   :  { %1185 = vmatprep.mubr.bf16.mxu1 %v2041_v33  ;;  %1750 = vmatprep.subr.bf16.mxu1 %v1917_v23 }
  0x5f   :  { %1751 = vmatpush3.bf16.msra.mxu1 %v1918_v26 }
  0x62   :  { %1811 = vmatmul.mubr.msk.bf16.vlgmr.msra.gmra.mrb[32].mxu0 %vm283_vm0, %v2165_v62  ;;  %1186 = vmatmul.mubr.bf16.vlgmr.msra.gmra.mrb[32].mxu1 %v2046_v34 }
  0x63   :  { %1819 = vmatpush3.bf16.msra.mxu0 %v1919_v18  ;;  %1814 = vmatprep.mubr.msk.bf16.mxu0 %vm283_vm0, %v2173_v0 }
  0x64   :  { %1193 = vmatprep.mubr.bf16.mxu1 %v2070_v40  ;;  %1820 = vmatprep.subr.bf16.mxu0 %v1920_v28 }
  0x67   :  { %1821 = vmatpush3.bf16.msra.mxu0 %v1920_v28 }
  0x6a   :  { %1815 = vmatmul.mubr.msk.bf16.gmra.mrb[36].mxu0 %vm283_vm0, %v2196_v5  ;;  %1194 = vmatmul.mubr.bf16.gmra.mrb[36].mxu1 %v2075_v41 }
  0x6b   :  { %1822 = vmatprep.mubr.msk.bf16.mxu0 %vm283_vm0, %v2140_v56  ;;  %1201 = vmatprep.mubr.bf16.mxu1 %v2096_v46 }
  0x72   :  { %1823 = vmatmul.mubr.msk.bf16.vlgmr.msra.gmra.mrb[40].mxu0 %vm283_vm0, %v2165_v62  ;;  %1202 = vmatmul.mubr.bf16.gmra.mrb[40].mxu1 %v2101_v47 }
  0x73   :  { %1826 = vmatprep.mubr.msk.bf16.mxu0 %vm283_vm0, %v2173_v0  ;;  %1209 = vmatprep.mubr.bf16.mxu1 %v2120_v52 }
  0x7a   :  { %1827 = vmatmul.mubr.msk.bf16.gmra.mrb[44].mxu0 %vm283_vm0, %v2196_v5  ;;  %1210 = vmatmul.mubr.bf16.gmra.mrb[44].mxu1 %v2135_v55 }
  0x99   :  { %v2314_v53 = vpop.permute.xlu0 %77 }
  0x9c   :  { %v2320_v2 = vpop.permute.xlu1 %87 }
  0x9d   :  { %v2322_v3 = vpop.permute.xlu0 %82 }
  0xa0   :  { %v2326_v13 = vpop.permute.xlu1 %92 }
  0xa5   :  { %v2330_v17 = vpop.permute.xlu0 %97  ;;  %v2333_v19 = vpop.permute.xlu1 %102 }
  0xf5   :  { %v1614_v29 = vpop.f32.mrb[0].mxu0  ;;  %v1660_v30 = vpop.f32.mrb[0].mxu1 }
  0xf6   :  { %v1615_v31 = vpop.f32.mrb[1].mxu0  ;;  %v1661_v32 = vpop.f32.mrb[1].mxu1 }
  0xf7   :  { %v1616_v33 = vadd.f32 %v1615_v31, %v1614_v29  ;;  %v1617_v34 = vpop.f32.mrb[2].mxu0  ;;  %v2306_v35 = vadd.f32 %v1661_v32, %v1660_v30  ;;  %v1663_v36 = vpop.f32.mrb[2].mxu1 }
  0xf8   :  { %v1618_v37 = vpop.f32.mrb[3].mxu0  ;;  %v1664_v38 = vpop.f32.mrb[3].mxu1 }
  0xf9   :  { %v1619_v39 = vadd.f32 %v1618_v37, %v1617_v34  ;;  %v2308_v40 = vadd.f32 %v1664_v38, %v1663_v36  ;;  %v331_v21 = vadd.f32 %v1616_v33, %v2314_v53  ;;  %v2342_v33 = vpop.permute.xlu0 %107 }
  0xfb   :  { %v334_v29 = vadd.f32 %v1619_v39, %v2322_v3 }
  0xfd   :  { %v1620_v41 = vpop.f32.mrb[4].mxu0  ;;  %v1666_v42 = vpop.f32.mrb[4].mxu1 }
  0xfe   :  { %v1621_v43 = vpop.f32.mrb[5].mxu0  ;;  %v1667_v44 = vpop.f32.mrb[5].mxu1 }
  0xff   :  { %v1622_v45 = vadd.f32 %v1621_v43, %v1620_v41  ;;  %v1623_v46 = vpop.f32.mrb[6].mxu0  ;;  %v2310_v47 = vadd.f32 %v1667_v44, %v1666_v42  ;;  %v1669_v48 = vpop.f32.mrb[6].mxu1 }
 0x100   :  { %v1624_v49 = vpop.f32.mrb[7].mxu0  ;;  %v1670_v50 = vpop.f32.mrb[7].mxu1 }
 0x101   :  { %v1625_v51 = vadd.f32 %v1624_v49, %v1623_v46  ;;  %v2312_v52 = vadd.f32 %v1670_v50, %v1669_v48  ;;  %v339_v18 = vadd.f32 %v1622_v45, %v2320_v2  ;;  %v2344_v41 = vpop.permute.xlu1 %112 }
 0x103   :  { %v342_v25 = vadd.f32 %v1625_v51, %v2326_v13 }
 0x105   :  { %v1626_v54 = vpop.f32.mrb[8].mxu0  ;;  %v1672_v55 = vpop.f32.mrb[8].mxu1 }
 0x106   :  { %v1627_v56 = vpop.f32.mrb[9].mxu0  ;;  %v1673_v57 = vpop.f32.mrb[9].mxu1 }
 0x107   :  { %v1628_v58 = vadd.f32 %v1627_v56, %v1626_v54  ;;  %v1629_v59 = vpop.f32.mrb[10].mxu0  ;;  %v2316_v60 = vadd.f32 %v1673_v57, %v1672_v55  ;;  %v1675_v61 = vpop.f32.mrb[10].mxu1 }
 0x108   :  { %v1630_v62 = vpop.f32.mrb[11].mxu0  ;;  %v1676_v63 = vpop.f32.mrb[11].mxu1 }
 0x109   :  { %v1631_v0 = vadd.f32 %v1630_v62, %v1629_v59  ;;  %v2318_v1 = vadd.f32 %v1676_v63, %v1675_v61  ;;  %v347_v44 = vadd.f32 %v1628_v58, %v2330_v17  ;;  %v622_v63 = vadd.f32 %v2310_v47, %v2320_v2 }
 0x10b   :  { %v350_v54 = vadd.f32 %v1631_v0, %v2333_v19 }
 0x10d   :  { %v1632_v4 = vpop.f32.mrb[12].mxu0  ;;  %v1678_v5 = vpop.f32.mrb[12].mxu1 }
 0x10e   :  { %v1633_v6 = vpop.f32.mrb[13].mxu0  ;;  %v1679_v7 = vpop.f32.mrb[13].mxu1 }
 0x10f   :  { %v1634_v8 = vadd.f32 %v1633_v6, %v1632_v4  ;;  %v1635_v9 = vpop.f32.mrb[14].mxu0  ;;  %v2324_v10 = vadd.f32 %v1679_v7, %v1678_v5  ;;  %v1681_v11 = vpop.f32.mrb[14].mxu1  ;;  %v614_v5 = vadd.f32 %v2306_v35, %v2314_v53 }
 0x110   :  { %v1636_v12 = vpop.f32.mrb[15].mxu0  ;;  %v1682_v14 = vpop.f32.mrb[15].mxu1 }
 0x111   :  { %v1637_v15 = vadd.f32 %v1636_v12, %v1635_v9  ;;  %v2328_v16 = vadd.f32 %v1682_v14, %v1681_v11  ;;  %v355_v42 = vadd.f32 %v1634_v8, %v2342_v33  ;;  %v625_v8 = vadd.f32 %v2312_v52, %v2326_v13 }
 0x112   :  { %v617_v14 = vadd.f32 %v2308_v40, %v2322_v3 }
 0x113   :  { %v358_v48 = vadd.f32 %v1637_v15, %v2344_v41 }
 0x115   :  { %v1788_v20 = vpop.f32.mrb[16].mxu0  ;;  %v1706_v23 = vpop.f32.mrb[16].mxu1 }
 0x116   :  { %v404_v22 = vadd.f32 %v1788_v20, %v339_v18  ;;  %v395_v24 = vpop.f32.mrb[17].mxu0  ;;  %v1707_v27 = vpop.f32.mrb[17].mxu1 }
 0x117   :  { %v396_v26 = vadd.f32 %v395_v24, %v331_v21  ;;  %v1789_v28 = vpop.f32.mrb[18].mxu0  ;;  %v2338_v30 = vadd.f32 %v1707_v27, %v1706_v23  ;;  %v1709_v32 = vpop.f32.mrb[18].mxu1 }
 0x118   :  { %v407_v31 = vadd.f32 %v1789_v28, %v342_v25  ;;  %v398_v34 = vpop.f32.mrb[19].mxu0  ;;  %v1710_v37 = vpop.f32.mrb[19].mxu1  ;;  %v428_v15 = vmax.f32 %v404_v22, 0.0 }
 0x119   :  { %v399_v36 = vadd.f32 %v398_v34, %v334_v29  ;;  %v2340_v38 = vadd.f32 %v1710_v37, %v1709_v32  ;;  %v426_v35 = vmax.f32 %v396_v26, 0.0 }
 0x11a   :  { %v429_v28 = vmax.f32 %v407_v31, 0.0  ;;  %v630_v31 = vadd.f32 %v2316_v60, %v2330_v17 }
 0x11b   :  { %v427_v34 = vmax.f32 %v399_v36, 0.0  ;;  %v641_v36 = vadd.f32 %v2328_v16, %v2344_v41 }
 0x11d   :  { %v1792_v43 = vpop.f32.mrb[20].mxu0  ;;  %v1712_v39 = vpop.f32.mrb[20].mxu1 }
 0x11e   :  { %v2348_v45 = vadd.f32 %v1792_v43, %v355_v42  ;;  %v411_v46 = vpop.f32.mrb[21].mxu0  ;;  %v1713_v50 = vpop.f32.mrb[21].mxu1  ;;  %v638_v42 = vadd.f32 %v2324_v10, %v2342_v33 }
 0x11f   :  { %v2351_v49 = vadd.f32 %v411_v46, %v347_v44  ;;  %v1793_v51 = vpop.f32.mrb[22].mxu0  ;;  %v2354_v55 = vadd.f32 %v1713_v50, %v1712_v39  ;;  %v1715_v57 = vpop.f32.mrb[22].mxu1 }
 0x120   :  { %v2356_v56 = vadd.f32 %v1793_v51, %v358_v48  ;;  %v414_v59 = vpop.f32.mrb[23].mxu0  ;;  %v1716_v58 = vpop.f32.mrb[23].mxu1  ;;  %v432_v10 = vmax.f32 %v2348_v45, 0.0 }
 0x121   :  { %v2358_v61 = vadd.f32 %v414_v59, %v350_v54  ;;  %v2360_v62 = vadd.f32 %v1716_v58, %v1715_v57  ;;  %v633_v54 = vadd.f32 %v2318_v1, %v2333_v19  ;;  %v430_v60 = vmax.f32 %v2351_v49, 0.0 }
 0x122   :  { %v433_v16 = vmax.f32 %v2356_v56, 0.0  ;;  %v905_v56 = vadd.f32 %v2338_v30, %v2314_v53 }
 0x123   :  { %v431_v1 = vmax.f32 %v2358_v61, 0.0  ;;  %v916_v61 = vadd.f32 %v2360_v62, %v2326_v13 }
 0x125   :  { %v1800_v4 = vpop.f32.mrb[24].mxu0  ;;  %v1718_v0 = vpop.f32.mrb[24].mxu1 }
 0x126   :  { %v687_v6 = vadd.f32 %v1800_v4, %v622_v63  ;;  %v678_v7 = vpop.f32.mrb[25].mxu0  ;;  %v1719_v11 = vpop.f32.mrb[25].mxu1 }
 0x127   :  { %v679_v9 = vadd.f32 %v678_v7, %v614_v5  ;;  %v1801_v12 = vpop.f32.mrb[26].mxu0  ;;  %v2370_v20 = vadd.f32 %v1719_v11, %v1718_v0  ;;  %v1721_v21 = vpop.f32.mrb[26].mxu1 }
 0x128   :  { %v711_v18 = vmax.f32 %v687_v6, 0.0  ;;  %v690_v47 = vadd.f32 %v1801_v12, %v625_v8  ;;  %v681_v23 = vpop.f32.mrb[27].mxu0  ;;  %v1722_v27 = vpop.f32.mrb[27].mxu1 }
 0x129   :  { %v709_v24 = vmax.f32 %v679_v9, 0.0  ;;  %v682_v25 = vadd.f32 %v681_v23, %v617_v14  ;;  %v2374_v32 = vadd.f32 %v1722_v27, %v1721_v21  ;;  %v913_v14 = vadd.f32 %v2354_v55, %v2320_v2 }
 0x12a   :  { %v2372_v29 = vmax.f32 %v428_v15, %v711_v18  ;;  %v712_v52 = vmax.f32 %v690_v47, 0.0 }
 0x12b   :  { %v2376_v37 = vmax.f32 %v426_v35, %v709_v24  ;;  %v710_v40 = vmax.f32 %v682_v25, 0.0  ;;  %v908_v25 = vadd.f32 %v2340_v38, %v2322_v3 }
 0x12c   :  { %v2378_v22 = vmax.f32 %v429_v28, %v712_v52 }
 0x12d   :  { %v2382_v43 = vmax.f32 %v427_v34, %v710_v40  ;;  %v1804_v26 = vpop.f32.mrb[28].mxu0  ;;  %v1724_v39 = vpop.f32.mrb[28].mxu1 }
 0x12e   :  { %v703_v44 = vadd.f32 %v1804_v26, %v638_v42  ;;  %v694_v46 = vpop.f32.mrb[29].mxu0  ;;  %v1725_v50 = vpop.f32.mrb[29].mxu1 }
 0x12f   :  { %v695_v48 = vadd.f32 %v694_v46, %v630_v31  ;;  %v1805_v51 = vpop.f32.mrb[30].mxu0  ;;  %v1726_v59 = vadd.f32 %v1725_v50, %v1724_v39  ;;  %v1727_v63 = vpop.f32.mrb[30].mxu1  ;;  %v921_v31 = vadd.f32 %v2370_v20, %v2330_v17  ;;  %v924_v50 = vadd.f32 %v2374_v32, %v2333_v19 }
 0x130   :  { %v715_v57 = vmax.f32 %v703_v44, 0.0  ;;  %v706_v58 = vadd.f32 %v1805_v51, %v641_v36  ;;  %v697_v4 = vpop.f32.mrb[31].mxu0  ;;  %v1728_v0 = vpop.f32.mrb[31].mxu1 }
 0x131   :  { %v713_v5 = vmax.f32 %v695_v48, 0.0  ;;  %v698_v6 = vadd.f32 %v697_v4, %v633_v54  ;;  %v1729_v9 = vadd.f32 %v1728_v0, %v1727_v63  ;;  %v929_v30 = vadd.f32 %v1726_v59, %v2342_v33 }
 0x132   :  { %v2393_v7 = vmax.f32 %v432_v10, %v715_v57  ;;  %v716_v8 = vmax.f32 %v706_v58, 0.0 }
 0x133   :  { %v2396_v11 = vmax.f32 %v430_v60, %v713_v5  ;;  %v714_v45 = vmax.f32 %v698_v6, 0.0  ;;  %v932_v46 = vadd.f32 %v1729_v9, %v2344_v41 }
 0x134   :  { %v2398_v12 = vmax.f32 %v433_v16, %v716_v8 }
 0x135   :  { %v2402_v49 = vmax.f32 %v431_v1, %v714_v45  ;;  %v1812_v15 = vpop.f32.mrb[32].mxu0  ;;  %v1752_v47 = vpop.f32.mrb[32].mxu1 }
 0x136   :  { %v978_v18 = vadd.f32 %v1812_v15, %v913_v14  ;;  %v969_v21 = vpop.f32.mrb[33].mxu0  ;;  %v1753_v35 = vpop.f32.mrb[33].mxu1 }
 0x137   :  { %v970_v23 = vadd.f32 %v969_v21, %v905_v56  ;;  %v1813_v24 = vpop.f32.mrb[34].mxu0  ;;  %v1754_v27 = vadd.f32 %v1753_v35, %v1752_v47  ;;  %v1755_v28 = vpop.f32.mrb[34].mxu1 }
 0x138   :  { %v981_v55 = vadd.f32 %v1813_v24, %v916_v61  ;;  %v972_v52 = vpop.f32.mrb[35].mxu0  ;;  %v1756_v40 = vpop.f32.mrb[35].mxu1  ;;  %v1002_v45 = vmax.f32 %v978_v18, 0.0 }
 0x139   :  { %v973_v34 = vadd.f32 %v972_v52, %v908_v25  ;;  %v1757_v42 = vadd.f32 %v1756_v40, %v1755_v28  ;;  %v1188_v60 = vadd.f32 %v1754_v27, %v2314_v53 }
 0x13a   :  { %v1003_v24 = vmax.f32 %v981_v55, 0.0 }
 0x13b   :  { %v1191_v1 = vadd.f32 %v1757_v42, %v2322_v3 }
 0x13d   :  { %v1816_v26 = vpop.f32.mrb[36].mxu0  ;;  %v1758_v44 = vpop.f32.mrb[36].mxu1 }
 0x13e   :  { %v2413_v62 = vadd.f32 %v1816_v26, %v929_v30  ;;  %v985_v39 = vpop.f32.mrb[37].mxu0  ;;  %v1759_v36 = vpop.f32.mrb[37].mxu1 }
 0x13f   :  { %v2416_v38 = vadd.f32 %v985_v39, %v921_v31  ;;  %v1817_v48 = vpop.f32.mrb[38].mxu0  ;;  %v1760_v51 = vadd.f32 %v1759_v36, %v1758_v44  ;;  %v1761_v10 = vpop.f32.mrb[38].mxu1 }
 0x140   :  { %v2420_v54 = vadd.f32 %v1817_v48, %v932_v46  ;;  %v988_v57 = vpop.f32.mrb[39].mxu0  ;;  %v1762_v20 = vpop.f32.mrb[39].mxu1 }
 0x141   :  { %v2422_v59 = vadd.f32 %v988_v57, %v924_v50  ;;  %v1763_v58 = vadd.f32 %v1762_v20, %v1761_v10  ;;  %v1196_v63 = vadd.f32 %v1760_v51, %v2320_v2  ;;  %v1000_v2 = vmax.f32 %v970_v23, 0.0 }
 0x143   :  { %v1199_v16 = vadd.f32 %v1763_v58, %v2326_v13  ;;  %v1001_v13 = vmax.f32 %v973_v34, 0.0 }
 0x145   :  { %v1824_v4 = vpop.f32.mrb[40].mxu0  ;;  %v1764_v5 = vpop.f32.mrb[40].mxu1 }
 0x146   :  { %v1261_v6 = vadd.f32 %v1824_v4, %v1196_v63  ;;  %v1252_v0 = vpop.f32.mrb[41].mxu0  ;;  %v1765_v32 = vpop.f32.mrb[41].mxu1  ;;  %v1005_v63 = vmax.f32 %v2422_v59, 0.0  ;;  %v1007_v59 = vmax.f32 %v2420_v54, 0.0 }
 0x147   :  { %v1253_v8 = vadd.f32 %v1252_v0, %v1188_v60  ;;  %v1825_v9 = vpop.f32.mrb[42].mxu0  ;;  %v1766_v15 = vadd.f32 %v1765_v32, %v1764_v5  ;;  %v1767_v56 = vpop.f32.mrb[42].mxu1  ;;  %v1006_v0 = vmax.f32 %v2413_v62, 0.0 }
 0x148   :  { %v1285_v14 = vmax.f32 %v1261_v6, 0.0  ;;  %v1264_v47 = vadd.f32 %v1825_v9, %v1199_v16  ;;  %v1255_v21 = vpop.f32.mrb[43].mxu0  ;;  %v1768_v35 = vpop.f32.mrb[43].mxu1 }
 0x149   :  { %v1283_v61 = vmax.f32 %v1253_v8, 0.0  ;;  %v1256_v53 = vadd.f32 %v1255_v21, %v1191_v1  ;;  %v1769_v28 = vadd.f32 %v1768_v35, %v1767_v56  ;;  %v1204_v31 = vadd.f32 %v1766_v15, %v2330_v17 }
 0x14a   :  { %v1293_v25 = vmax.f32 %v1002_v45, %v1285_v14  ;;  %v1286_v27 = vmax.f32 %v1264_v47, 0.0 }
 0x14b   :  { %v1291_v52 = vmax.f32 %v1000_v2, %v1283_v61  ;;  %v1284_v40 = vmax.f32 %v1256_v53, 0.0  ;;  %v1207_v48 = vadd.f32 %v1769_v28, %v2333_v19 }
 0x14c   :  { %v1301_v30 = vmax.f32 %v2372_v29, %v1293_v25  ;;  %v1294_v3 = vmax.f32 %v1003_v24, %v1286_v27 }
 0x14d   :  { %v1299_v18 = vmax.f32 %v2376_v37, %v1291_v52  ;;  %v1292_v42 = vmax.f32 %v1001_v13, %v1284_v40  ;;  %v1828_v26 = vpop.f32.mrb[44].mxu0  ;;  %v1770_v44 = vpop.f32.mrb[44].mxu1  ;;  %v1004_v37 = vmax.f32 %v2416_v38, 0.0 }
 0x14e   :  { %v1302_v23 = vmax.f32 %v2378_v22, %v1294_v3  ;;  %v1268_v39 = vpop.f32.mrb[45].mxu0  ;;  %v1771_v46 = vpop.f32.mrb[45].mxu1 }
 0x14f   :  { %v1300_v55 = vmax.f32 %v2382_v43, %v1292_v42  ;;  %v1269_v36 = vadd.f32 %v1268_v39, %v1204_v31  ;;  %v1829_v34 = vpop.f32.mrb[46].mxu0  ;;  %v1772_v29 = vadd.f32 %v1771_v46, %v1770_v44  ;;  %v1773_v51 = vpop.f32.mrb[46].mxu1 }
 0x150   :  { %v1583_v50 = vpack.c.bf16 %v1302_v23, %v1301_v30  ;;  %v1271_v10 = vpop.f32.mrb[47].mxu0  ;;  %v1774_v17 = vpop.f32.mrb[47].mxu1 }
 0x151   :  { %v1578_v57 = vpack.c.bf16 %v1300_v55, %v1299_v18  ;;  %v1287_v20 = vmax.f32 %v1269_v36, 0.0  ;;  %v1272_v58 = vadd.f32 %v1271_v10, %v1207_v48  ;;  %v1212_v22 = vadd.f32 %v1772_v29, %v2342_v33 }
 0x152   :  { %1595 = vst [vmem:[%s2459_s3 + $0x8] sm:$0xff] %v1583_v50   ;;  %v1775_v43 = vadd.f32 %v1774_v17, %v1773_v51 }
 0x153   :  { %1579 = vst [vmem:[%s2459_s3] sm:$0xff] %v1578_v57   ;;  %v1295_v19 = vmax.f32 %v1004_v37, %v1287_v20  ;;  %v1288_v4 = vmax.f32 %v1272_v58, 0.0  ;;  %v1277_v38 = vadd.f32 %v1828_v26, %v1212_v22 }
 0x154   :  { %v1215_v60 = vadd.f32 %v1775_v43, %v2344_v41 }
 0x155   :  { %v1303_v5 = vmax.f32 %v2396_v11, %v1295_v19  ;;  %v1296_v6 = vmax.f32 %v1005_v63, %v1288_v4  ;;  %v1289_v16 = vmax.f32 %v1277_v38, 0.0 }
 0x156   :  { %v1280_v32 = vadd.f32 %v1829_v34, %v1215_v60 }
 0x157   :  { %v1304_v33 = vmax.f32 %v2402_v49, %v1296_v6  ;;  %v1297_v8 = vmax.f32 %v1006_v0, %v1289_v16 }
 0x158   :  { %v1290_v9 = vmax.f32 %v1280_v32, 0.0 }
 0x159   :  { %v1588_v1 = vpack.c.bf16 %v1304_v33, %v1303_v5  ;;  %v1305_v45 = vmax.f32 %v2393_v7, %v1297_v8 }
 0x15a   :  { %v1298_v14 = vmax.f32 %v1007_v59, %v1290_v9 }
 0x15b   :  { %1596 = vst [vmem:[%s2459_s3 + $0x10] sm:$0xff] %v1588_v1  }
 0x15c   :  { %v1306_v41 = vmax.f32 %v2398_v12, %v1298_v14 }
 0x15e   :  { %v1593_v11 = vpack.c.bf16 %v1306_v41, %v1305_v45 }
 0x160   :  { %1597 = vst [vmem:[%s2459_s3 + $0x18] sm:$0xff] %v1593_v11  }

// kernel: cnn_forward.7
= control target key start
LH: loop header
LB: loop body
LE: loop exit
PB: predicated region body
PF: predicated region fallthrough
CT: control target
= control target key end

     0   :  { %v717_v21 = vmov 1966171168   ;;  %v108_v23 = vlaneseq  ;;  %v718_v40 = vmov 0.0   ;;  %vm719_vm0 = vmmov 0   ;;  %s873_s1 = inlined_call_operand.vmem [shape: bf16[576,10], index: 1, kind: input, shape index: {}]   ;;  %s874_s0 = inlined_call_operand.vmem [shape: bf16[2,576], index: 0, kind: input, shape index: {}]   ;;  %s875_s3 = inlined_call_operand.vmem [shape: bf16[10,1], index: 3, kind: input, shape index: {}]   ;;  %s876_s4 = inlined_call_operand.<no memory space> [shape: f32[1,1], index: 4, kind: input, shape index: {}]   ;;  %s877_s2 = inlined_call_operand.vmem [shape: f32[1,10], index: 2, kind: input, shape index: {}]   ;;  %s878_s5 = inlined_call_operand.vmem [shape: f32[2,1], index: 5, kind: output, shape index: {}]  }
   0x1   :  { %v675_v0 = vld [vmem:[%s873_s1 + $0x40] sm:$0xff]   ;;  %v679_v4 = vld [vmem:[%s873_s1 + $0x48] sm:$0xff]   ;;  %v683_v8 = vld [vmem:[%s873_s1 + $0x50] sm:$0xff]   ;;  %v106_v22 = vunpack.c.l.s4 %v717_v21  ;;  %vm363_vm1 = vcmask 523264   ;;  %vm507_vm2 = vcmask 1044480   ;;  %v10_v55 = vstv %s876_s4 }
   0x2   :  { %v676_v1 = vld [vmem:[%s873_s1] sm:$0xff]   ;;  %603 = vmatprep.subr.bf16.mxu0 %v675_v0  ;;  %v680_v5 = vld [vmem:[%s873_s1 + $0x8] sm:$0xff]   ;;  %v684_v9 = vld [vmem:[%s873_s1 + $0x10] sm:$0xff]   ;;  %v109_v29 = vshrl.u32 %v108_v23, 7  ;;  %11 = vst [vmem:[#allocation2] sm:$0x1] %v10_v55 }
   0x3   :  { %v677_v2 = vld [vmem:[%s873_s1 + $0xc0] sm:$0xff]   ;;  %604 = vmatpush3.bf16.msra.mxu0 %v676_v1  ;;  %v681_v6 = vld [vmem:[%s873_s1 + $0xc8] sm:$0xff]   ;;  %v685_v10 = vld [vmem:[%s873_s1 + $0xd0] sm:$0xff]   ;;  %v107_v28 = vunpack.c.0.s8 %v106_v22  ;;  %vm503_vm3 = vcmask 80896   ;;  %vm556_vm4 = vcmask 1024  }
   0x4   :  { %v678_v3 = vld [vmem:[%s873_s1 + $0x80] sm:$0xff]   ;;  %625 = vmatprep.subr.bf16.mxu1 %v677_v2  ;;  %605 = vmatprep.subr.bf16.mxu0 %v679_v4  ;;  %v682_v7 = vld [vmem:[%s873_s1 + $0x88] sm:$0xff]   ;;  %v686_v11 = vld [vmem:[%s873_s1 + $0x90] sm:$0xff]  }
   0x5   :  { %626 = vmatpush3.bf16.msra.mxu1 %v678_v3  ;;  %v687_v12 = vld [vmem:[%s873_s1 + $0x58] sm:$0xff]   ;;  %v691_v16 = vld [vmem:[%s873_s1 + $0x60] sm:$0xff]   ;;  %v695_v20 = vld [vmem:[%s873_s1 + $0x68] sm:$0xff]   ;;  %v110_v34 = vsub.s32 %v107_v28, %v109_v29 }
   0x6   :  { %627 = vmatprep.subr.bf16.mxu1 %v681_v6  ;;  %v688_v13 = vld [vmem:[%s873_s1 + $0x18] sm:$0xff]   ;;  %v692_v17 = vld [vmem:[%s873_s1 + $0x20] sm:$0xff]   ;;  %v696_v24 = vld [vmem:[%s873_s1 + $0x28] sm:$0xff]  }
   0x7   :  { %606 = vmatpush3.bf16.msra.mxu0 %v680_v5  ;;  %v689_v14 = vld [vmem:[%s873_s1 + $0xd8] sm:$0xff]   ;;  %v693_v18 = vld [vmem:[%s873_s1 + $0xe0] sm:$0xff]   ;;  %v697_v25 = vld [vmem:[%s873_s1 + $0xe8] sm:$0xff]  }
   0x8   :  { %607 = vmatprep.subr.bf16.mxu0 %v683_v8  ;;  %v690_v15 = vld [vmem:[%s873_s1 + $0x98] sm:$0xff]   ;;  %v694_v19 = vld [vmem:[%s873_s1 + $0xa0] sm:$0xff]   ;;  %v698_v26 = vld [vmem:[%s873_s1 + $0xa8] sm:$0xff]  }
   0x9   :  { %628 = vmatpush3.bf16.msra.mxu1 %v682_v7  ;;  %v699_v27 = vld [vmem:[%s873_s1 + $0x70] sm:$0xff]   ;;  %v703_v33 = vld [vmem:[%s873_s1 + $0x78] sm:$0xff]   ;;  %v23_v37 = vld [vmem:[%s874_s0] sm:$0x1f] }
   0xa   :  { %629 = vmatprep.subr.bf16.mxu1 %v685_v10  ;;  %v700_v30 = vld [vmem:[%s873_s1 + $0x30] sm:$0xff]   ;;  %v704_v35 = vld [vmem:[%s873_s1 + $0x38] sm:$0xff]   ;;  %v111_v38 = vrot.slane %v23_v37, %v110_v34  ;;  %v708_v44 = vld [vmem:[%s873_s1 + $0x100] sm:$0xff]   ;;  %v104_v48 = vcombine.high %v23_v37, %v23_v37 }
   0xb   :  { %608 = vmatpush3.bf16.msra.mxu0 %v684_v9  ;;  %v701_v31 = vld [vmem:[%s873_s1 + $0xf0] sm:$0xff]   ;;  %v705_v36 = vld [vmem:[%s873_s1 + $0xf8] sm:$0xff]   ;;  %v709_v47 = vld [vmem:[%s873_s1 + $0x108] sm:$0xff]  }
   0xc   :  { %609 = vmatprep.subr.bf16.mxu0 %v687_v12  ;;  %v702_v32 = vld [vmem:[%s873_s1 + $0xb0] sm:$0xff]   ;;  %v707_v39 = vld [vmem:[%s873_s1 + $0xb8] sm:$0xff]   ;;  %v119_v41 = vcombine.high %v111_v38, %v111_v38  ;;  %v126_v42 = vrot.slane %v111_v38, %v110_v34  ;;  %v118_v50 = vrot.slane %v104_v48, %v110_v34  ;;  %v712_v53 = vld [vmem:[%s875_s3] sm:$0x1f]  }
   0xd   :  { %630 = vmatpush3.bf16.msra.mxu1 %v686_v11  ;;  %v710_v49 = vld [vmem:[%s873_s1 + $0x110] sm:$0xff]   ;;  %v711_v51 = vld [vmem:[%s873_s1 + $0x118] sm:$0xff]   ;;  %v509_v54 = vsel %vm507_vm2, %v712_v53, 0  ;;  %v562_v57 = vld [vmem:[%s877_s2] ss:$0 sm:$0xff] }
   0xe   :  { %631 = vmatprep.subr.bf16.mxu1 %v689_v14  ;;  %v140_v43 = vrot.slane %v119_v41, %v110_v34  ;;  %v141_v45 = vcombine.high %v126_v42, %v126_v42  ;;  %v133_v52 = vrot.slane %v118_v50, %v110_v34  ;;  %v600_v12 = vld [vmem:[#allocation2] ss:$0 sm:$0xff] }
   0xf   :  { %610 = vmatpush3.bf16.msra.mxu0 %v688_v13 }
  0x10   :  { %611 = vmatprep.subr.bf16.mxu0 %v691_v16  ;;  %399 = vmatprep.mubr.bf16.mxu0 %v140_v43  ;;  %v142_v46 = vcombine.high %v140_v43, %v140_v43 }
  0x11   :  { %632 = vmatpush3.bf16.msra.mxu1 %v690_v15 }
  0x12   :  { %633 = vmatprep.subr.bf16.mxu1 %v693_v18  ;;  %439 = vmatprep.mubr.bf16.mxu1 %v142_v46 }
  0x13   :  { %612 = vmatpush3.bf16.msra.mxu0 %v692_v17 }
  0x14   :  { %613 = vmatprep.subr.bf16.mxu0 %v695_v20 }
  0x15   :  { %634 = vmatpush3.bf16.msra.mxu1 %v694_v19 }
  0x16   :  { %635 = vmatprep.subr.bf16.mxu1 %v697_v25 }
  0x17   :  { %614 = vmatpush3.bf16.msra.mxu0 %v696_v24 }
  0x18   :  { %615 = vmatprep.subr.bf16.mxu0 %v699_v27 }
  0x19   :  { %636 = vmatpush3.bf16.msra.mxu1 %v698_v26 }
  0x1a   :  { %637 = vmatprep.subr.bf16.mxu1 %v701_v31 }
  0x1b   :  { %616 = vmatpush3.bf16.msra.mxu0 %v700_v30 }
  0x1c   :  { %617 = vmatprep.subr.bf16.mxu0 %v703_v33 }
  0x1d   :  { %638 = vmatpush3.bf16.msra.mxu1 %v702_v32 }
  0x1e   :  { %639 = vmatprep.subr.bf16.mxu1 %v705_v36 }
  0x1f   :  { %618 = vmatpush3.bf16.msra.mxu0 %v704_v35 }
  0x20   :  { %654 = vmatprep.subr.bf16.mxu0 %v718_v40 }
  0x21   :  { %640 = vmatpush3.bf16.msra.mxu1 %v707_v39 }
  0x22   :  { %666 = vmatprep.subr.bf16.mxu1 %v718_v40  ;;  %400 = vmatmul.mubr.bf16.vlgmr.msra.gmra.mrb[0].mxu0 %v126_v42 }
  0x23   :  { %655 = vmatpush3.bf16.msra.mxu0 %v708_v44  ;;  %662 = vmatprep.mubr.msk.bf16.mxu0 %vm719_vm0, %v718_v40 }
  0x24   :  { %440 = vmatmul.mubr.bf16.vlgmr.msra.gmra.mrb[0].mxu1 %v141_v45  ;;  %656 = vmatprep.subr.bf16.mxu0 %v718_v40 }
  0x25   :  { %668 = vmatprep.mubr.msk.bf16.mxu1 %vm719_vm0, %v718_v40  ;;  %667 = vmatpush3.bf16.msra.mxu1 %v509_v54 }
  0x27   :  { %657 = vmatpush3.bf16.msra.mxu0 %v709_v47 }
  0x28   :  { %658 = vmatprep.subr.bf16.mxu0 %v718_v40 }
  0x2b   :  { %659 = vmatpush3.bf16.msra.mxu0 %v710_v49 }
  0x2c   :  { %660 = vmatprep.subr.bf16.mxu0 %v718_v40 }
  0x2f   :  { %661 = vmatpush3.bf16.msra.mxu0 %v711_v51 }
  0x32   :  { %663 = vmatmul.mubr.msk.bf16.vlgmr.msra.gmra.mrb[4].mxu0 %vm363_vm1, %v133_v52 }
  0xf5   :  { %v619_v56 = vpop.f32.mrb[0].mxu0 }
  0xf6   :  { %v620_v58 = vpop.f32.mrb[1].mxu0 }
  0xf7   :  { %v621_v59 = vadd.f32 %v620_v58, %v619_v56  ;;  %v622_v60 = vpop.f32.mrb[2].mxu0  ;;  %v641_v61 = vpop.f32.mrb[0].mxu1 }
  0xf8   :  { %v623_v62 = vpop.f32.mrb[3].mxu0  ;;  %v642_v63 = vpop.f32.mrb[1].mxu1 }
  0xf9   :  { %v402_v0 = vadd.f32 %v621_v59, %v562_v57  ;;  %v643_v1 = vadd.f32 %v642_v63, %v641_v61  ;;  %v644_v2 = vpop.f32.mrb[2].mxu1 }
  0xfa   :  { %v645_v3 = vpop.f32.mrb[3].mxu1 }
  0xfb   :  { %v442_v4 = vadd.f32 %v643_v1, %v402_v0 }
 0x105   :  { %v481_v5 = vpop.f32.mrb[4].mxu0 }
 0x106   :  { %v482_v6 = vadd.f32 %v481_v5, %v442_v4  ;;  %v664_v7 = vpop.f32.mrb[5].mxu0 }
 0x107   :  { %v484_v8 = vpop.f32.mrb[6].mxu0 }
 0x108   :  { %v487_v9 = vmax.f32 %v482_v6, 0.0  ;;  %v665_v10 = vpop.f32.mrb[7].mxu0 }
 0x10a   :  { %v488_v11 = vpack.c.bf16 %v487_v9, %v487_v9 }
 0x10c   :  { %669 = vmatmul.mubr.msk.bf16.vlgmr.msra.gmra.mrb[4].mxu1 %vm503_vm3, %v488_v11 }
 0x1df   :  { %v545_v13 = vpop.f32.mrb[4].mxu1 }
 0x1e0   :  { %v546_v14 = vadd.f32 %v600_v12, %v545_v13  ;;  %v670_v15 = vpop.f32.mrb[5].mxu1 }
 0x1e1   :  { %v548_v16 = vpop.f32.mrb[6].mxu1 }
 0x1e2   :  { %v551_v17 = vsub.f32 0.0, %v546_v14  ;;  %v671_v18 = vpop.f32.mrb[7].mxu1 }
 0x1e4   :  { %v552_v19 = vmul.f32 1.442695, %v551_v17 }
 0x1e6   :  { %713 = vpow2.f32 %v552_v19 }
 0x1f0   :  { %v714_v20 = vpop.eup %713 }
 0x1f1   :  { %v554_v21 = vadd.f32 1.0, %v714_v20 }
 0x1f3   :  { %715 = vrcp.f32 %v554_v21 }
 0x1fd   :  { %v716_v22 = vpop.eup %715 }
 0x1fe   :  { %557 = vst.msk [vmem:[%s878_s5] sm:$0x3] %vm556_vm4, %v716_v22 }

</bundles_post_ra>
